<compile_context>
chip_gen: v6e
topology: v6e:2x2x1
jax: 0.10.0
libtpu: 0.0.40
codegen_flags: <defaults>
</compile_context>

<pallas_src>
import jax
import jax.numpy as jnp
from jax.experimental import pallas as pl
from jax.experimental.pallas import tpu as pltpu

EMBEDDINGS_SIZE = 20          # Options().get('model.network.embeddings_size', 20)
IN_FEATURES = 2000
HIDDEN = 2000
BN_EPS = 1e-5

H_SPLIT = 2                   # hidden-column blocks; the 'parallel' grid axis
H_PAD = 2048                  # HIDDEN padded to a lane-aligned multiple of H_SPLIT
H_BLK = H_PAD // H_SPLIT      # 1024 columns per block
EMB_PAD = 128                 # lane-dense fc02 output / W2 column width


def _mlp_kernel(x_ref, w1_ref, gamma_ref, beta_ref, w2_ref, out_ref):
    """One grid step = one block of 1024 fc01 output columns (full batch)."""
    # fc01 on this column block: (N, 2000) bf16 @ (2000, 1024) bf16 -> f32.
    # The bf16 cast of x runs on the VPU and is hidden under the W1 DMA.
    x = x_ref[...].astype(jnp.bfloat16)
    h = jnp.dot(x, w1_ref[...], preferred_element_type=jnp.float32)   # (N, H_BLK)

    # Training-mode BatchNorm1d over the batch axis.  Statistics are
    # per-feature (per-column), so the column-block split is exact and the
    # full batch is present in every block.  Fused into one scale/shift FMA.
    n = h.shape[0]
    inv_n = 1.0 / n
    mean = jnp.sum(h, axis=0, keepdims=True) * inv_n                  # (1, H_BLK)
    centered = h - mean
    var = jnp.sum(centered * centered, axis=0, keepdims=True) * inv_n
    scale = gamma_ref[...] * jax.lax.rsqrt(var + BN_EPS)
    shift = beta_ref[...] - mean * scale
    h = jnp.maximum(h * scale + shift, 0.0)                           # ReLU

    # Partial fc02 contribution of this column block (lane-dense 128-wide).
    # Bias + final ReLU are applied after summing the partials in the wrapper.
    y = jnp.dot(h.astype(jnp.bfloat16), w2_ref[...],
                preferred_element_type=jnp.float32)                   # (N, EMB_PAD)
    out_ref[...] = y[None].astype(out_ref.dtype)


def msembedding_mlp_forward(peaks, params):
    """peaks: (N, 2000) float32.  Returns (N, EMBEDDINGS_SIZE) float32."""
    n = peaks.shape[0]

    flops = 2 * n * IN_FEATURES * H_PAD + 2 * n * H_PAD * EMB_PAD + 10 * n * H_PAD
    bytes_accessed = (IN_FEATURES * H_PAD * 2          # W1 bf16
                      + H_PAD * EMB_PAD * 2            # W2 bf16
                      + n * IN_FEATURES * 4            # x f32
                      + H_SPLIT * n * EMB_PAD * 4      # partial outputs
                      + 2 * H_PAD * 4)                 # gamma, beta

    partial = pl.pallas_call(
        _mlp_kernel,
        out_shape=jax.ShapeDtypeStruct((H_SPLIT, n, EMB_PAD), jnp.float32),
        grid_spec=pltpu.PrefetchScalarGridSpec(
            num_scalar_prefetch=0,
            grid=(H_SPLIT,),
            in_specs=[
                pl.BlockSpec((n, IN_FEATURES), lambda j: (0, 0)),        # x (full)
                pl.BlockSpec((IN_FEATURES, H_BLK), lambda j: (0, j)),    # W1 cols
                pl.BlockSpec((1, H_BLK), lambda j: (0, j)),              # gamma
                pl.BlockSpec((1, H_BLK), lambda j: (0, j)),              # beta
                pl.BlockSpec((H_BLK, EMB_PAD), lambda j: (j, 0)),        # W2 rows
            ],
            out_specs=pl.BlockSpec((1, n, EMB_PAD), lambda j: (j, 0, 0)),
        ),
        compiler_params=pltpu.CompilerParams(
            # Independent column blocks -> megacore-shardable on v7x; on
            # v5e/v6e they simply run as two sequential grid steps.
            dimension_semantics=("parallel",),
            # ~8.7 MB resident; 32 MiB gives headroom over v5e's 16 MiB scoped
            # default and is legal on v7x (64 MiB physical per TC).
            vmem_limit_bytes=32 * 1024 * 1024),
        cost_estimate=pl.CostEstimate(flops=flops, transcendentals=H_PAD,
                                      bytes_accessed=bytes_accessed),
    )(peaks, params["w1"], params["gamma"], params["beta"], params["w2"])

    # Tiny (H_SPLIT, N, 128) combine: sum column-block partials, add fc02
    # bias, final ReLU, then un-pad the lane-dense output back to 20.
    y = jnp.maximum(jnp.sum(partial, axis=0) + params["b2"], 0.0)
    return y[:, :EMBEDDINGS_SIZE]


def init_params(key):
    """Deterministic init mirroring PyTorch Linear/BatchNorm defaults."""
    k1, k2, k3 = jax.random.split(key, 3)
    bound1 = 1.0 / jnp.sqrt(jnp.float32(IN_FEATURES))
    bound2 = 1.0 / jnp.sqrt(jnp.float32(HIDDEN))
    # Stored transposed: (in, out).  fc01 bias intentionally omitted: it is
    # exactly cancelled by the training-mode BatchNorm that follows.
    w1_t = jax.random.uniform(k1, (IN_FEATURES, HIDDEN), jnp.float32,
                              -bound1, bound1)
    w2_t = jax.random.uniform(k2, (HIDDEN, EMBEDDINGS_SIZE), jnp.float32,
                              -bound2, bound2)
    b2 = jax.random.uniform(k3, (1, EMBEDDINGS_SIZE), jnp.float32,
                            -bound2, bound2)

    # bf16 weights, zero-padded to lane-aligned kernel shapes.  Padded W1
    # columns produce all-zero activations (mean 0, var 0 -> normalized 0)
    # and multiply zero W2 rows, so they contribute nothing.
    w1 = jnp.zeros((IN_FEATURES, H_PAD), jnp.bfloat16)
    w1 = w1.at[:, :HIDDEN].set(w1_t.astype(jnp.bfloat16))
    w2 = jnp.zeros((H_PAD, EMB_PAD), jnp.bfloat16)
    w2 = w2.at[:HIDDEN, :EMBEDDINGS_SIZE].set(w2_t.astype(jnp.bfloat16))
    gamma = jnp.ones((1, H_PAD), jnp.float32)     # BatchNorm1d weight
    beta = jnp.zeros((1, H_PAD), jnp.float32)     # BatchNorm1d bias
    b2_pad = jnp.zeros((1, EMB_PAD), jnp.float32).at[:, :EMBEDDINGS_SIZE].set(b2)
    return dict(w1=w1, gamma=gamma, beta=beta, w2=w2, b2=b2_pad)


def _reference_forward(peaks, p):
    """Pure-JAX reference computed with the same bf16-cast operands."""
    x = peaks.astype(jnp.bfloat16).astype(jnp.float32)
    w1 = p["w1"][:, :HIDDEN].astype(jnp.float32)
    h = x @ w1                                    # fc01 (bias cancelled by BN)
    mean = jnp.mean(h, axis=0, keepdims=True)
    var = jnp.mean((h - mean) ** 2, axis=0, keepdims=True)
    h = ((h - mean) * jax.lax.rsqrt(var + BN_EPS) * p["gamma"][:, :HIDDEN]
         + p["beta"][:, :HIDDEN])
    h = jnp.maximum(h, 0.0)
    y = (h.astype(jnp.bfloat16).astype(jnp.float32)
         @ p["w2"][:HIDDEN, :EMBEDDINGS_SIZE].astype(jnp.float32)
         + p["b2"][:, :EMBEDDINGS_SIZE])
    return jnp.maximum(y, 0.0)


if __name__ == "__main__":
    key = jax.random.PRNGKey(0)
    kp, kx = jax.random.split(key)
    params = init_params(kp)

    batch_size = 8  # small demo batch; feature sizes (2000 -> 20) are fixed
    peaks = jax.random.normal(kx, (batch_size, IN_FEATURES), jnp.float32)

    fwd = jax.jit(msembedding_mlp_forward)
    out = jax.block_until_ready(fwd(peaks, params))
    ref = _reference_forward(peaks, params)

    assert out.shape == (batch_size, EMBEDDINGS_SIZE)
    assert jnp.allclose(out, ref, atol=2e-3, rtol=2e-3), "mismatch vs reference"

    print("KERNEL_OK")
</pallas_src>

<mosaic_0001>
module attributes {stable_mosaic.version = 11 : i64} {
  func.func @_mlp_kernel(%arg0: i32, %arg1: memref<8x2000xf32, #tpu.memory_space<vmem>>, %arg2: memref<2000x1024xbf16, #tpu.memory_space<vmem>>, %arg3: memref<1x1024xf32, #tpu.memory_space<vmem>>, %arg4: memref<1x1024xf32, #tpu.memory_space<vmem>>, %arg5: memref<1024x128xbf16, #tpu.memory_space<vmem>>, %arg6: memref<1x8x128xf32, #tpu.memory_space<vmem>>) attributes {dimension_semantics = [#tpu.dimension_semantics<parallel>], iteration_bounds = array<i64: 2>, scalar_prefetch = 0 : i64, scratch_operands = 0 : i64, tpu.core_type = #tpu.core_type<tc>, window_params = [{pipeline_mode = #tpu.pipeline_mode<synchronous>, transform_indices = @transform_0, window_bounds = array<i64: 8, 2000>}, {transform_indices = @transform_1, window_bounds = array<i64: 2000, 1024>}, {transform_indices = @transform_2, window_bounds = array<i64: 1, 1024>}, {transform_indices = @transform_3, window_bounds = array<i64: 1, 1024>}, {transform_indices = @transform_4, window_bounds = array<i64: 1024, 128>}, {transform_indices = @transform_5, window_bounds = array<i64: 1, 8, 128>}]} {
    %c0 = arith.constant 0 : index
    %c0_0 = arith.constant 0 : index
    %0 = vector.load %arg1[%c0, %c0_0] : memref<8x2000xf32, #tpu.memory_space<vmem>>, vector<8x2000xf32>
    %1 = arith.truncf %0 : vector<8x2000xf32> to vector<8x2000xbf16>
    %c0_1 = arith.constant 0 : index
    %c0_2 = arith.constant 0 : index
    %2 = vector.load %arg2[%c0_1, %c0_2] : memref<2000x1024xbf16, #tpu.memory_space<vmem>>, vector<2000x1024xbf16>
    %cst = arith.constant dense<0.000000e+00> : vector<8x1024xf32>
    %3 = tpu.matmul %1, %2, %cst {dimension_numbers = #tpu.dot_dimension_numbers<[1], [0], [0], [1], [0, 0, 1, 1], [], []>} : vector<8x2000xbf16>, vector<2000x1024xbf16>, vector<8x1024xf32> -> vector<8x1024xf32>
    %cst_3 = arith.constant dense<0.000000e+00> : vector<1024xf32>
    %4 = vector.multi_reduction <add>, %3, %cst_3 [0] : vector<8x1024xf32> to vector<1024xf32>
    %5 = vector.shape_cast %4 : vector<1024xf32> to vector<1x1024xf32>
    %cst_4 = arith.constant 1.250000e-01 : f32
    %6 = vector.broadcast %cst_4 : f32 to vector<1x1024xf32>
    %7 = arith.mulf %5, %6 : vector<1x1024xf32>
    %8 = vector.broadcast %7 : vector<1x1024xf32> to vector<8x1024xf32>
    %9 = arith.subf %3, %8 : vector<8x1024xf32>
    %10 = arith.mulf %9, %9 : vector<8x1024xf32>
    %cst_5 = arith.constant dense<0.000000e+00> : vector<1024xf32>
    %11 = vector.multi_reduction <add>, %10, %cst_5 [0] : vector<8x1024xf32> to vector<1024xf32>
    %12 = vector.shape_cast %11 : vector<1024xf32> to vector<1x1024xf32>
    %cst_6 = arith.constant 1.250000e-01 : f32
    %13 = vector.broadcast %cst_6 : f32 to vector<1x1024xf32>
    %14 = arith.mulf %12, %13 : vector<1x1024xf32>
    %c0_7 = arith.constant 0 : index
    %c0_8 = arith.constant 0 : index
    %15 = vector.load %arg3[%c0_7, %c0_8] : memref<1x1024xf32, #tpu.memory_space<vmem>>, vector<1x1024xf32>
    %cst_9 = arith.constant 9.99999974E-6 : f32
    %16 = vector.broadcast %cst_9 : f32 to vector<1x1024xf32>
    %17 = arith.addf %14, %16 : vector<1x1024xf32>
    %18 = math.rsqrt %17 : vector<1x1024xf32>
    %19 = arith.mulf %15, %18 : vector<1x1024xf32>
    %c0_10 = arith.constant 0 : index
    %c0_11 = arith.constant 0 : index
    %20 = vector.load %arg4[%c0_10, %c0_11] : memref<1x1024xf32, #tpu.memory_space<vmem>>, vector<1x1024xf32>
    %21 = arith.mulf %7, %19 : vector<1x1024xf32>
    %22 = arith.subf %20, %21 : vector<1x1024xf32>
    %23 = vector.broadcast %19 : vector<1x1024xf32> to vector<8x1024xf32>
    %24 = arith.mulf %3, %23 : vector<8x1024xf32>
    %25 = vector.broadcast %22 : vector<1x1024xf32> to vector<8x1024xf32>
    %26 = arith.addf %24, %25 : vector<8x1024xf32>
    %cst_12 = arith.constant 0.000000e+00 : f32
    %27 = vector.broadcast %cst_12 : f32 to vector<8x1024xf32>
    %28 = arith.maximumf %26, %27 : vector<8x1024xf32>
    %29 = arith.truncf %28 : vector<8x1024xf32> to vector<8x1024xbf16>
    %c0_13 = arith.constant 0 : index
    %c0_14 = arith.constant 0 : index
    %30 = vector.load %arg5[%c0_13, %c0_14] : memref<1024x128xbf16, #tpu.memory_space<vmem>>, vector<1024x128xbf16>
    %cst_15 = arith.constant dense<0.000000e+00> : vector<8x128xf32>
    %31 = tpu.matmul %29, %30, %cst_15 {dimension_numbers = #tpu.dot_dimension_numbers<[1], [0], [0], [1], [0, 0, 1, 1], [], []>} : vector<8x1024xbf16>, vector<1024x128xbf16>, vector<8x128xf32> -> vector<8x128xf32>
    %32 = vector.shape_cast %31 : vector<8x128xf32> to vector<1x8x128xf32>
    %c0_16 = arith.constant 0 : index
    %c0_17 = arith.constant 0 : index
    %c0_18 = arith.constant 0 : index
    %33 = vector.load %arg6[%c0_16, %c0_17, %c0_18] : memref<1x8x128xf32, #tpu.memory_space<vmem>>, vector<1x8x128xf32>
    tpu.vector_store %arg6[%c0_16, %c0_17, %c0_18], %32 {strides = array<i32>} : memref<1x8x128xf32, #tpu.memory_space<vmem>>, vector<1x8x128xf32>,
    return
  }
  func.func @transform_0(%arg0: i32) -> (i32, i32) {
    %c0_i32 = arith.constant 0 : i32
    %c0_i32_0 = arith.constant 0 : i32
    %c0_i32_1 = arith.constant 0 : i32
    return %c0_i32, %c0_i32_0 : i32, i32
  }
  func.func @transform_1(%arg0: i32) -> (i32, i32) {
    %c0_i32 = arith.constant 0 : i32
    %c0_i32_0 = arith.constant 0 : i32
    return %c0_i32, %arg0 : i32, i32
  }
  func.func @transform_2(%arg0: i32) -> (i32, i32) {
    %c0_i32 = arith.constant 0 : i32
    %c0_i32_0 = arith.constant 0 : i32
    return %c0_i32, %arg0 : i32, i32
  }
  func.func @transform_3(%arg0: i32) -> (i32, i32) {
    %c0_i32 = arith.constant 0 : i32
    %c0_i32_0 = arith.constant 0 : i32
    return %c0_i32, %arg0 : i32, i32
  }
  func.func @transform_4(%arg0: i32) -> (i32, i32) {
    %c0_i32 = arith.constant 0 : i32
    %c0_i32_0 = arith.constant 0 : i32
    return %arg0, %c0_i32 : i32, i32
  }
  func.func @transform_5(%arg0: i32) -> (i32, i32, i32) {
    %c0_i32 = arith.constant 0 : i32
    %c0_i32_0 = arith.constant 0 : i32
    %c0_i32_1 = arith.constant 0 : i32
    return %arg0, %c0_i32, %c0_i32_0 : i32, i32, i32
  }
}

</mosaic_0001>

<bundles_post_ra>
// kernel: msembedding_mlp_forward.1
= control target key start
LH: loop header
LB: loop body
LE: loop exit
PB: predicated region body
PF: predicated region fallthrough
CT: control target
= control target key end

     0   :  { %s12087_s0 = inlined_call_operand.hbm [shape: f32[8,2000], index: 0, kind: input, shape index: {}]   ;;  %s12088_s1 = inlined_call_operand.hbm [shape: bf16[2000,2048], index: 1, kind: input, shape index: {}]   ;;  %s12089_s2 = inlined_call_operand.hbm [shape: f32[1,2048], index: 2, kind: input, shape index: {}]   ;;  %s12090_s3 = inlined_call_operand.hbm [shape: f32[1,2048], index: 3, kind: input, shape index: {}]   ;;  %s12091_s4 = inlined_call_operand.hbm [shape: bf16[2048,128], index: 4, kind: input, shape index: {}]   ;;  %s12092_s5 = inlined_call_operand.vmem [shape: f32[2,8,128], index: 5, kind: output, shape index: {}]  }
   0x1   :  { %12098 = sst [smem:[#allocation13_spill]] %s12088_s1 }
   0x2   :  { %10 = vsyncpa [#allocation3], 0 }
   0x3   :  { %11 = vsyncpa [#allocation5], 0 }
   0x4   :  { %13 = vsyncpa [#allocation5 + $0x1], 0 }
   0x5   :  { %14 = vsyncpa [#allocation8], 0 }
   0x6   :  { %16 = vsyncpa [#allocation8 + $0x1], 0  ;;  %s10477_s18 = smov 0   ;;  %s10479_s19 = smov 0  }
   0x7   :  { %s10481_s20 = smov 0   ;;  %s10483_s21 = smov 0  }
   0x8 LB: > { %s10498_s22 = sadd.s32 1, %s10434_s21   ;;  %s50_s23 = sadd.s32 1, %s10430_s20  ;;  %s10434_s21 = sphi %s10483_s21, %s12116_s21   ;;  %s10430_s20 = sphi %s10481_s20, %s12115_s20   ;;  %s10426_s19 = sphi %s10479_s19, %s12114_s19   ;;  %s10422_s18 = sphi %s10477_s18, %s12113_s18  }
   0x9   : > { %s47_s24 = ssub.s32 %s10434_s21, %s10498_s22  ;;  %p57_p0 = scmp.ne.s32.totalorder %s10430_s20, %s10426_s19 }
   0xa   : > { %p48_p1 = scmp.eq.s32.totalorder %s47_s24, 0  ;;  %p58_p2 = scmp.eq.s32.totalorder %s10434_s21, 0 }
   0xb   : > { %p10133_p3 = scmp.lt.s32.totalorder %s10434_s21, 2  ;;  %s12093_s26 = sand.u32 1, %s10434_s21  }
   0xc   : > { %s10508_s25 = scalar_select %p48_p1, %s10430_s20, %s50_s23  }
   0xd   : > { %p59_p4 = por %p58_p2, %p57_p0  ;;  %s10512_s27 = sand.u32 1, %s10430_s20  }
   0xe   : > { %s10101_s28 = smul.u32 8000, %s10512_s27  ;;  %s10009_s29 = sshll.u32 %s10434_s21, 9 }
   0xf   : > { %s12099_s1 = sld [smem:[#allocation13_spill]]  ;;  %p10521_p5 = pnand %p10133_p3, %p59_p4 }
  0x10   : > { %s206_s9 = scalar_lea.vmem [#allocation4], %s10101_s28  ;;  %s8924_s11 = sshll.u32 %s10512_s27, 3 }
  0x11   : > { %s213_s10 = sshll.u32 %s206_s9, 4  ;;  %s10530_s12 = scalar_lea.sflag [#allocation5], %s12093_s26  ;;  %s10525_s10 = int_to_ptr.vmem [resolvable:$true] %s213_s10 }
  0x12   : > { %p10536_p7 = pneg %p10521_p5 }
  0x15   : > { %s10519_s7 = scalar_lea.hbm %s12099_s1, %s10009_s29  ;;  %s10259_s17 = scalar_lea.hbm %s12099_s1, 256000 }
  0x16   : > { %s10254_s13 = scalar_lea.hbm %s10519_s7, 128000  ;;  %p10260_p10 = scmp.lt.s32.totalorder %s10519_s7, %s12099_s1 }
  0x17   : > { %p10255_p6 = scmp.ne.s32.totalorder %s10519_s7, %s10254_s13  ;;  %p10261_p11 = scmp.lt.s32.totalorder %s10259_s17, %s10254_s13 }
  0x19   : > { %p10257_p8 = pnand %p10536_p7, %p10255_p6  ;;  %p10262_p12 = por %p10261_p11, %p10260_p10 }
  0x1b   : > { %p10258_p9 = pneg %p10257_p8 }
  0x1d   : > { %p10263_p13 = pnand %p10262_p12, %p10258_p9 }
  0x1f   : > { %10266 = shalt.err (!%p10263_p13)
}
  0x20   : > { %s10267_s28 = scalar_lea.vmem %s10525_s10, 128000  ;;  %s10436_s29 = smov [#allocation4]  }
  0x21   : > { %p10268_p0 = scmp.ne.s32.totalorder %s10525_s10, %s10267_s28  ;;  %s10272_s30 = sshll.u32 %s10436_s29, 4  ;;  %s10273_s30 = int_to_ptr.vmem [resolvable:$false] %s10272_s30 }
  0x22   : > { %s10274_s6 = scalar_lea.vmem %s10273_s30, 256000  ;;  %p10275_p3 = scmp.lt.s32.totalorder %s10525_s10, %s10273_s30 }
  0x23   : > { %p10270_p1 = pnand %p10268_p0, %p10536_p7  ;;  %p10276_p4 = scmp.lt.s32.totalorder %s10274_s6, %s10267_s28 }
  0x25   : > { %p10271_p2 = pneg %p10270_p1  ;;  %p10277_p6 = por %p10276_p4, %p10275_p3 }
  0x27   : > { %p10278_p8 = pnand %p10277_p6, %p10271_p2 }
  0x29   : > { %10281 = shalt.err (!%p10278_p8)
}
  0x2a   : > { %s10437_s9 = smov 1024   ;;  %s10438_s13 = smov 512  }
  0x2b   : > { %s10439_s15 = smov 32   ;;  %s10010_s16 = sshll.u32 %s10434_s21, 7 }
  0x2c   : > { %10122 = dma.hbm_to_vmem [thread:$0]  (!%p10521_p5), %s10519_s7, 128000, %s10525_s10, %s10530_s12, %s10437_s9, %s10438_s13, %s10439_s15  }
  0x2d   : > { %s10563_s24 = scalar_lea.hbm %s12089_s2, %s10010_s16  ;;  %s10568_s30 = scalar_lea.hbm %s12090_s3, %s10010_s16 }
  0x2e   : > { %s246_s6 = scalar_lea.vmem [#allocation7], %s8924_s11  ;;  %s12102_s1 = sand.u32 1, %s10434_s21  }
  0x2f   : > { %s254_s26 = sshll.u32 %s246_s6, 4  ;;  %s10574_s7 = scalar_lea.sflag [#allocation8], %s12102_s1  ;;  %s255_s26 = int_to_ptr.vmem [resolvable:$true] %s254_s26 }
  0x30   : > { %s10282_s10 = scalar_lea.hbm %s10568_s30, 128  ;;  %s10287_s15 = scalar_lea.hbm %s12090_s3, 256 }
  0x31   : > { %p10283_p9 = scmp.ne.s32.totalorder %s10568_s30, %s10282_s10  ;;  %p10288_p12 = scmp.lt.s32.totalorder %s10568_s30, %s12090_s3 }
  0x32   : > { %p10289_p13 = scmp.lt.s32.totalorder %s10287_s15, %s10282_s10 }
  0x33   : > { %p10285_p10 = pnand %p10283_p9, %p10536_p7 }
  0x34   : > { %p10290_p0 = por %p10289_p13, %p10288_p12 }
  0x35   : > { %p10286_p11 = pneg %p10285_p10 }
  0x37   : > { %p10291_p1 = pnand %p10290_p0, %p10286_p11 }
  0x39   : > { %10294 = shalt.err (!%p10291_p1)
}
  0x3a   : > { %s10295_s23 = scalar_lea.vmem %s255_s26, 128  ;;  %s10440_s1 = smov [#allocation7]  }
  0x3b   : > { %p10296_p2 = scmp.ne.s32.totalorder %s255_s26, %s10295_s23  ;;  %s10300_s28 = sshll.u32 %s10440_s1, 4  ;;  %s10301_s28 = int_to_ptr.vmem [resolvable:$false] %s10300_s28 }
  0x3c   : > { %s10302_s29 = scalar_lea.vmem %s10301_s28, 256  ;;  %p10303_p6 = scmp.lt.s32.totalorder %s255_s26, %s10301_s28 }
  0x3d   : > { %p10298_p3 = pnand %p10296_p2, %p10536_p7  ;;  %p10304_p8 = scmp.lt.s32.totalorder %s10302_s29, %s10295_s23 }
  0x3f   : > { %p10299_p4 = pneg %p10298_p3  ;;  %p10305_p9 = por %p10304_p8, %p10303_p6 }
  0x41   : > { %p10306_p10 = pnand %p10305_p9, %p10299_p4 }
  0x43   : > { %10309 = shalt.err (!%p10306_p10)
}
  0x44   : > { %10128 = dma.hbm_to_vmem [thread:$0]  (!%p10521_p5), %s10568_s30, 128, %s255_s26, %s10574_s7  }
  0x45   : > { %s10594_s6 = sadd.s32 4294967295, %s10434_s21   ;;  %p63_p11 = scmp.ne.s32.totalorder %s10426_s19, %s10422_s18 }
  0x46   : > { %p12094_p12 = scmp.eq.s32.totalorder %s10594_s6, 0  ;;  %p8919_p13 = scmp.ge.s32.totalorder %s10434_s21, 1 }
  0x47   : > { %p178_p0 = scmp.lt.s32.totalorder %s10434_s21, 3  ;;  %s10441_s26 = smov [#allocation2]  }
  0x48   : > { %p10603_p1 = por %p12094_p12, %p63_p11  ;;  %s191_s30 = sshll.u32 %s10441_s26, 4  ;;  %s10611_s30 = int_to_ptr.vmem [resolvable:$true] %s191_s30 }
  0x49   : > { %p10607_p2 = pnand %p8919_p13, %p178_p0  ;;  %s227_s18 = scalar_lea.vmem [#allocation6], %s8924_s11 }
  0x4a   : > { %s12103_s10 = scalar_select %p10603_p1, 1, 0 }
  0x4b   : > { %s12104_s9 = scalar_select %p10607_p2, 1, 0 }
  0x4c   : > { %s235_s13 = sshll.u32 %s227_s18, 4  ;;  %s10310_s15 = scalar_lea.hbm %s10563_s24, 128  ;;  %s236_s13 = int_to_ptr.vmem [resolvable:$true] %s235_s13 }
  0x4d   : > { %p10311_p4 = scmp.ne.s32.totalorder %s10563_s24, %s10310_s15  ;;  %s10315_s23 = scalar_lea.hbm %s12089_s2, 256 }
  0x4e   : > { %p10316_p9 = scmp.lt.s32.totalorder %s10563_s24, %s12089_s2  ;;  %p10317_p10 = scmp.lt.s32.totalorder %s10315_s23, %s10310_s15 }
  0x4f   : > { %p10313_p6 = pnand %p10311_p4, %p10536_p7 }
  0x50   : > { %p10318_p11 = por %p10317_p10, %p10316_p9 }
  0x51   : > { %p10314_p8 = pneg %p10313_p6 }
  0x53   : > { %p10319_p13 = pnand %p10318_p11, %p10314_p8 }
  0x55   : > { %10322 = shalt.err (!%p10319_p13)
}
  0x56   : > { %s10323_s11 = scalar_lea.vmem %s236_s13, 128  ;;  %s10442_s29 = smov [#allocation6]  }
  0x57   : > { %p10324_p0 = scmp.ne.s32.totalorder %s236_s13, %s10323_s11  ;;  %s10328_s26 = sshll.u32 %s10442_s29, 4  ;;  %s10329_s26 = int_to_ptr.vmem [resolvable:$false] %s10328_s26 }
  0x58   : > { %s10330_s18 = scalar_lea.vmem %s10329_s26, 256  ;;  %p10331_p4 = scmp.lt.s32.totalorder %s236_s13, %s10329_s26 }
  0x59   : > { %p10326_p3 = pnand %p10324_p0, %p10536_p7  ;;  %p10332_p6 = scmp.lt.s32.totalorder %s10330_s18, %s10323_s11 }
  0x5b   : > { %p10327_p12 = pneg %p10326_p3  ;;  %p10333_p1 = por %p10332_p6, %p10331_p4 }
  0x5d   : > { %p10334_p2 = pnand %p10333_p1, %p10327_p12 }
  0x5f   : > { %10337 = shalt.err (!%p10334_p2)
}
  0x60   : > { %10125 = dma.hbm_to_vmem [thread:$0]  (!%p10521_p5), %s10563_s24, 128, %s236_s13, %s10530_s12  }
  0x61   : > { %p12105_p3 = scmp.eq.s32.totalorder %s10594_s6, 0  ;;  %p12106_p8 = scmp.ne.s32.totalorder %s12104_s9, 0 }
  0x62   : > { %s8930_s16 = sshll.u32 %s10512_s27, 9  ;;  %s10012_s17 = sshll.u32 %s10434_s21, 13 }
  0x63   : > { %p12107_p9 = pneg %p12106_p8  ;;  %s10648_s28 = scalar_lea.hbm %s12091_s4, %s10012_s17 }
  0x64   : > { %s10349_s11 = scalar_lea.vmem %s10611_s30, 2048  ;;  %p10357_p13 = scmp.lt.s32.totalorder %s10611_s30, %s10611_s30 }
  0x65   : > { %p10639_p10 = pnand %p12107_p9, %p12105_p3  ;;  %p10350_p1 = scmp.ne.s32.totalorder %s10611_s30, %s10349_s11 }
  0x66   : > { %p10358_p0 = scmp.lt.s32.totalorder %s10349_s11, %s10349_s11 }
  0x67   : > { %p10340_p12 = pneg %p10639_p10 }
  0x68   : > { %p10359_p4 = por %p10358_p0, %p10357_p13 }
  0x69   : > { %p10352_p2 = pnand %p10350_p1, %p10340_p12 }
  0x6b   : > { %p10353_p11 = pneg %p10352_p2 }
  0x6d   : > { %p10360_p6 = pnand %p10359_p4, %p10353_p11 }
  0x6f   : > { %10363 = shalt.err (!%p10360_p6)
}
  0x70   : > { %10118 = dma.hbm_to_vmem [thread:$0]  (!%p10639_p10), %s12087_s0, 2048, %s10611_s30, [#allocation3]  }
  0x71   : > { %s265_s12 = scalar_lea.vmem [#allocation9], %s8930_s16  ;;  %s10364_s13 = scalar_lea.hbm %s10648_s28, 8192 }
  0x72   : > { %s272_s24 = sshll.u32 %s265_s12, 4  ;;  %p10365_p3 = scmp.ne.s32.totalorder %s10648_s28, %s10364_s13  ;;  %s10662_s24 = int_to_ptr.vmem [resolvable:$true] %s272_s24 }
  0x73   : > { %s10369_s18 = scalar_lea.hbm %s12091_s4, 16384  ;;  %p10370_p1 = scmp.lt.s32.totalorder %s10648_s28, %s12091_s4 }
  0x74   : > { %p10367_p9 = pnand %p10365_p3, %p10536_p7  ;;  %p10371_p2 = scmp.lt.s32.totalorder %s10369_s18, %s10364_s13 }
  0x76   : > { %p10368_p12 = pneg %p10367_p9  ;;  %p10372_p11 = por %p10371_p2, %p10370_p1 }
  0x78   : > { %p10373_p10 = pnand %p10372_p11, %p10368_p12 }
  0x7a   : > { %10376 = shalt.err (!%p10373_p10)
}
  0x7b   : > { %s10377_s30 = scalar_lea.vmem %s10662_s24, 8192  ;;  %s10443_s16 = smov [#allocation9]  }
  0x7c   : > { %p10378_p13 = scmp.ne.s32.totalorder %s10662_s24, %s10377_s30  ;;  %s10382_s23 = sshll.u32 %s10443_s16, 4  ;;  %s10383_s23 = int_to_ptr.vmem [resolvable:$false] %s10382_s23 }
  0x7d   : > { %s10384_s1 = scalar_lea.vmem %s10383_s23, 16384  ;;  %p10385_p6 = scmp.lt.s32.totalorder %s10662_s24, %s10383_s23 }
  0x7e   : > { %p10380_p0 = pnand %p10378_p13, %p10536_p7  ;;  %p10386_p3 = scmp.lt.s32.totalorder %s10384_s1, %s10377_s30 }
  0x80   : > { %p10381_p4 = pneg %p10380_p0  ;;  %p10387_p9 = por %p10386_p3, %p10385_p6 }
  0x82   : > { %p10388_p8 = pnand %p10387_p9, %p10381_p4 }
  0x84   : > { %10391 = shalt.err (!%p10388_p8)
}
  0x85   : > { %s10444_s11 = smov 64   ;;  %s10445_s21 = smov 4  }
  0x86   : > { %10131 = dma.hbm_to_vmem [thread:$0]  (!%p10521_p5), %s10648_s28, 8192, %s10662_s24, %s10574_s7, %s10444_s11, %s10444_s11, %s10445_s21  }
  0x87   : > { %p12109_p7 = scmp.ne.s32.totalorder %s12104_s9, 0 }
  0x88   : > { %p12110_p12 = scmp.eq.s32.totalorder (!%p12109_p7), %s10594_s6, 0 }
  0x89   : > { %284 = sbr.rel (%p12109_p7) target bundleno = 1680 (0x690), region = 40 }
  0x8e   : > { %10409 = dma.done.wait (%p12110_p12), [#allocation3], 2048   ;;  %p12111_p1 = pmov %p12110_p12 }
  0x8f   : > { %s290_s14 = sand.u32 1, %s10594_s6   ;;  %s10693_s27 = sand.u32 1, %s10426_s19  }
  0x90   : > { %10411 = vsyncadd (%p12111_p1), [#allocation3], 4294965248  ;;  %s10102_s12 = smul.u32 8000, %s10693_s27  ;;  %s291_s13 = scalar_lea.sflag [#allocation5], %s290_s14 }
  0x91   : > { %p12112_p5 = scmp.ne.s32.totalorder %s12103_s10, 0 }
  0x92   : > { %s10696_s8 = scalar_lea.vmem [#allocation4], %s10102_s12 }
  0x93   : > { %10413 = dma.done.wait (%p12112_p5), %s291_s13, 128128  }
  0x94   : > { %10415 = vsyncadd (%p12112_p5), %s291_s13, 4294839168  ;;  %s8935_s7 = sshll.u32 %s10693_s27, 3  ;;  %s309_s28 = scalar_lea.sflag [#allocation8], %s290_s14 }
  0x95   : > { %s10703_s9 = scalar_lea.vmem [#allocation6], %s8935_s7  ;;  %s10705_s24 = scalar_lea.vmem [#allocation7], %s8935_s7 }
  0x96   : > { %10417 = dma.done.wait (%p12112_p5), %s309_s28, 8320  }
  0x97   : > { %10419 = vsyncadd (%p12112_p5), %s309_s28, 4294958976  ;;  %v459_v0 = vld [vmem:[%s10696_s8 + $0x1c0] sm:$0xff]  ;;  %v372_v53 = vld [vmem:[#allocation2 + $0x8] sm:$0xff]  ;;  %vm6403_vm0 = vcmask 654336   ;;  %s8937_s10 = sshll.u32 %s10693_s27, 9  ;;  %p366_p8 = scmp.lt.s32.totalorder %s10594_s6, 1 }
  0x98   : > { %v463_v1 = vld [vmem:[%s10696_s8 + $0x1e0] sm:$0xff]  ;;  %v374_v54 = vld [vmem:[#allocation2 + $0x18] sm:$0xff]  ;;  %v10741_v58 = vpack.c.bf16 %v372_v53, %v372_v53  ;;  %s11882_s29 = scalar_lea.vmem [#allocation9], %s8937_s10 }
  0x99   : > { %v587_v2 = vld [vmem:[%s10696_s8 + $0x5c0] sm:$0xff]  ;;  %v8996_v3 = vcombine.high %v459_v0, %v463_v1  ;;  %v8995_v5 = vcombine.low %v459_v0, %v463_v1  ;;  %v10743_v59 = vpack.c.bf16 %v374_v54, %v374_v54  ;;  %s12118_s6 = smov (!%p366_p8, %s10594_s6), 1 }
  0x9a   : > { %v591_v4 = vld [vmem:[%s10696_s8 + $0x5e0] sm:$0xff]  ;;  %6439 = vmatprep.mubr.bf16.mxu0 %v10741_v58  ;;  %s8938_s26 = sshll.u32 %s12118_s6, 3 }
  0x9b   : > { %v451_v6 = vld [vmem:[%s10696_s8 + $0x180] sm:$0xff]  ;;  %v9124_v8 = vcombine.high %v587_v2, %v591_v4  ;;  %v9123_v9 = vcombine.low %v587_v2, %v591_v4  ;;  %6407 = vmatprep.subr.bf16.mxu0 %v8996_v3  ;;  %6480 = vmatprep.mubr.bf16.mxu1 %v10743_v59  ;;  %s369_s17 = scalar_lea.vmem %s12092_s5, %s8938_s26 }
  0x9c   : > { %v455_v7 = vld [vmem:[%s10696_s8 + $0x1a0] sm:$0xff]  ;;  %6408 = vmatpush1.bf16.msra.mxu0 %v8995_v5 }
  0x9d   : > { %v8988_v10 = vcombine.high %v451_v6, %v455_v7  ;;  %v579_v11 = vld [vmem:[%s10696_s8 + $0x580] sm:$0xff]  ;;  %6448 = vmatprep.subr.bf16.mxu1 %v9124_v8  ;;  %v8987_v18 = vcombine.low %v451_v6, %v455_v7 }
  0x9e   : > { %v583_v12 = vld [vmem:[%s10696_s8 + $0x5a0] sm:$0xff]  ;;  %6449 = vmatpush1.bf16.msra.mxu1 %v9123_v9 }
  0x9f   : > { %v443_v13 = vld [vmem:[%s10696_s8 + $0x140] sm:$0xff]  ;;  %v9116_v14 = vcombine.high %v579_v11, %v583_v12  ;;  %6409 = vmatprep.subr.bf16.mxu0 %v8988_v10  ;;  %v9115_v19 = vcombine.low %v579_v11, %v583_v12 }
  0xa0   : > { %v447_v15 = vld [vmem:[%s10696_s8 + $0x160] sm:$0xff]  ;;  %6410 = vmatpush1.bf16.msra.mxu0 %v8987_v18 }
  0xa1   : > { %v571_v16 = vld [vmem:[%s10696_s8 + $0x540] sm:$0xff]  ;;  %v8980_v20 = vcombine.high %v443_v13, %v447_v15  ;;  %6450 = vmatprep.subr.bf16.mxu1 %v9116_v14  ;;  %v8979_v26 = vcombine.low %v443_v13, %v447_v15 }
  0xa2   : > { %v575_v17 = vld [vmem:[%s10696_s8 + $0x560] sm:$0xff]  ;;  %6451 = vmatpush1.bf16.msra.mxu1 %v9115_v19 }
  0xa3   : > { %v9108_v21 = vcombine.high %v571_v16, %v575_v17  ;;  %v435_v22 = vld [vmem:[%s10696_s8 + $0x100] sm:$0xff]  ;;  %6411 = vmatprep.subr.bf16.mxu0 %v8980_v20  ;;  %v9107_v27 = vcombine.low %v571_v16, %v575_v17 }
  0xa4   : > { %v439_v23 = vld [vmem:[%s10696_s8 + $0x120] sm:$0xff]  ;;  %6412 = vmatpush1.bf16.msra.mxu0 %v8979_v26 }
  0xa5   : > { %v563_v24 = vld [vmem:[%s10696_s8 + $0x500] sm:$0xff]  ;;  %v8972_v28 = vcombine.high %v435_v22, %v439_v23  ;;  %6452 = vmatprep.subr.bf16.mxu1 %v9108_v21  ;;  %v8971_v34 = vcombine.low %v435_v22, %v439_v23 }
  0xa6   : > { %v567_v25 = vld [vmem:[%s10696_s8 + $0x520] sm:$0xff]  ;;  %6453 = vmatpush1.bf16.msra.mxu1 %v9107_v27 }
  0xa7   : > { %v9100_v29 = vcombine.high %v563_v24, %v567_v25  ;;  %v427_v30 = vld [vmem:[%s10696_s8 + $0xc0] sm:$0xff]  ;;  %6413 = vmatprep.subr.bf16.mxu0 %v8972_v28  ;;  %v9099_v35 = vcombine.low %v563_v24, %v567_v25 }
  0xa8   : > { %v431_v31 = vld [vmem:[%s10696_s8 + $0xe0] sm:$0xff]  ;;  %6414 = vmatpush1.bf16.msra.mxu0 %v8971_v34 }
  0xa9   : > { %v555_v32 = vld [vmem:[%s10696_s8 + $0x4c0] sm:$0xff]  ;;  %v8964_v36 = vcombine.high %v427_v30, %v431_v31  ;;  %6454 = vmatprep.subr.bf16.mxu1 %v9100_v29  ;;  %v8963_v42 = vcombine.low %v427_v30, %v431_v31 }
  0xaa   : > { %v559_v33 = vld [vmem:[%s10696_s8 + $0x4e0] sm:$0xff]  ;;  %6455 = vmatpush1.bf16.msra.mxu1 %v9099_v35 }
  0xab   : > { %v9092_v37 = vcombine.high %v555_v32, %v559_v33  ;;  %v419_v38 = vld [vmem:[%s10696_s8 + $0x80] sm:$0xff]  ;;  %6415 = vmatprep.subr.bf16.mxu0 %v8964_v36  ;;  %v9091_v43 = vcombine.low %v555_v32, %v559_v33 }
  0xac   : > { %v423_v39 = vld [vmem:[%s10696_s8 + $0xa0] sm:$0xff]  ;;  %6416 = vmatpush1.bf16.msra.mxu0 %v8963_v42 }
  0xad   : > { %v547_v40 = vld [vmem:[%s10696_s8 + $0x480] sm:$0xff]  ;;  %v8956_v44 = vcombine.high %v419_v38, %v423_v39  ;;  %6456 = vmatprep.subr.bf16.mxu1 %v9092_v37  ;;  %v8955_v50 = vcombine.low %v419_v38, %v423_v39 }
  0xae   : > { %v551_v41 = vld [vmem:[%s10696_s8 + $0x4a0] sm:$0xff]  ;;  %6457 = vmatpush1.bf16.msra.mxu1 %v9091_v43 }
  0xaf   : > { %v9084_v45 = vcombine.high %v547_v40, %v551_v41  ;;  %v411_v46 = vld [vmem:[%s10696_s8 + $0x40] sm:$0xff]  ;;  %6417 = vmatprep.subr.bf16.mxu0 %v8956_v44  ;;  %v9083_v51 = vcombine.low %v547_v40, %v551_v41 }
  0xb0   : > { %v415_v47 = vld [vmem:[%s10696_s8 + $0x60] sm:$0xff]  ;;  %6418 = vmatpush1.bf16.msra.mxu0 %v8955_v50 }
  0xb1   : > { %v539_v48 = vld [vmem:[%s10696_s8 + $0x440] sm:$0xff]  ;;  %v8948_v52 = vcombine.high %v411_v46, %v415_v47  ;;  %6458 = vmatprep.subr.bf16.mxu1 %v9084_v45  ;;  %v8947_v62 = vcombine.low %v411_v46, %v415_v47 }
  0xb2   : > { %v543_v49 = vld [vmem:[%s10696_s8 + $0x460] sm:$0xff]  ;;  %6459 = vmatpush1.bf16.msra.mxu1 %v9083_v51 }
  0xb3   : > { %v9076_v55 = vcombine.high %v539_v48, %v543_v49  ;;  %v403_v56 = vld [vmem:[%s10696_s8] sm:$0xff]  ;;  %6419 = vmatprep.subr.bf16.mxu0 %v8948_v52  ;;  %v9075_v63 = vcombine.low %v539_v48, %v543_v49 }
  0xb4   : > { %v407_v57 = vld [vmem:[%s10696_s8 + $0x20] sm:$0xff]  ;;  %6420 = vmatpush1.bf16.msra.mxu0 %v8947_v62 }
  0xb5   : > { %v531_v60 = vld [vmem:[%s10696_s8 + $0x400] sm:$0xff]  ;;  %v8940_v0 = vcombine.high %v403_v56, %v407_v57  ;;  %6460 = vmatprep.subr.bf16.mxu1 %v9076_v55  ;;  %v8939_v6 = vcombine.low %v403_v56, %v407_v57 }
  0xb6   : > { %v535_v61 = vld [vmem:[%s10696_s8 + $0x420] sm:$0xff]  ;;  %6461 = vmatpush1.bf16.msra.mxu1 %v9075_v63 }
  0xb7   : > { %v9068_v1 = vcombine.high %v531_v60, %v535_v61  ;;  %v523_v2 = vld [vmem:[%s10696_s8 + $0x3c0] sm:$0xff]  ;;  %6421 = vmatprep.subr.bf16.mxu0 %v8940_v0  ;;  %v9067_v7 = vcombine.low %v531_v60, %v535_v61 }
  0xb8   : > { %v527_v3 = vld [vmem:[%s10696_s8 + $0x3e0] sm:$0xff]  ;;  %6422 = vmatpush1.bf16.msra.mxu0 %v8939_v6 }
  0xb9   : > { %v651_v4 = vld [vmem:[%s10696_s8 + $0x7c0] sm:$0xff]  ;;  %v9060_v8 = vcombine.high %v523_v2, %v527_v3  ;;  %6462 = vmatprep.subr.bf16.mxu1 %v9068_v1  ;;  %v9059_v14 = vcombine.low %v523_v2, %v527_v3 }
  0xba   : > { %v655_v5 = vld [vmem:[%s10696_s8 + $0x7e0] sm:$0xff]  ;;  %6463 = vmatpush1.bf16.msra.mxu1 %v9067_v7 }
  0xbb   : > { %v9188_v9 = vcombine.high %v651_v4, %v655_v5  ;;  %v515_v10 = vld [vmem:[%s10696_s8 + $0x380] sm:$0xff]  ;;  %6423 = vmatprep.subr.bf16.mxu0 %v9060_v8  ;;  %v9187_v15 = vcombine.low %v651_v4, %v655_v5 }
  0xbc   : > { %v519_v11 = vld [vmem:[%s10696_s8 + $0x3a0] sm:$0xff]  ;;  %6424 = vmatpush2.bf16.msra.mxu0 %v9059_v14 }
  0xbd   : > { %v643_v12 = vld [vmem:[%s10696_s8 + $0x780] sm:$0xff]  ;;  %v9052_v16 = vcombine.high %v515_v10, %v519_v11  ;;  %6464 = vmatprep.subr.bf16.mxu1 %v9188_v9  ;;  %v9051_v22 = vcombine.low %v515_v10, %v519_v11  ;;  %v373_v11 = vld [vmem:[#allocation2 + $0x10] sm:$0xff] }
  0xbe   : > { %v647_v13 = vld [vmem:[%s10696_s8 + $0x7a0] sm:$0xff]  ;;  %6465 = vmatpush2.bf16.msra.mxu1 %v9187_v15 }
  0xbf   : > { %v9180_v17 = vcombine.high %v643_v12, %v647_v13  ;;  %v507_v18 = vld [vmem:[%s10696_s8 + $0x340] sm:$0xff]  ;;  %6425 = vmatprep.subr.bf16.mxu0 %v9052_v16  ;;  %v9179_v23 = vcombine.low %v643_v12, %v647_v13 }
  0xc0   : > { %v511_v19 = vld [vmem:[%s10696_s8 + $0x360] sm:$0xff]  ;;  %6426 = vmatpush2.bf16.msra.mxu0 %v9051_v22  ;;  %v378_v22 = vld [vmem:[#allocation2 + $0x38] sm:$0xff] }
  0xc1   : > { %v635_v20 = vld [vmem:[%s10696_s8 + $0x740] sm:$0xff]  ;;  %v9044_v24 = vcombine.high %v507_v18, %v511_v19  ;;  %6466 = vmatprep.subr.bf16.mxu1 %v9180_v17  ;;  %v9043_v30 = vcombine.low %v507_v18, %v511_v19  ;;  %v376_v19 = vld [vmem:[#allocation2 + $0x28] sm:$0xff] }
  0xc2   : > { %v639_v21 = vld [vmem:[%s10696_s8 + $0x760] sm:$0xff]  ;;  %6467 = vmatpush2.bf16.msra.mxu1 %v9179_v23 }
  0xc3   : > { %v9172_v25 = vcombine.high %v635_v20, %v639_v21  ;;  %v499_v26 = vld [vmem:[%s10696_s8 + $0x300] sm:$0xff]  ;;  %6427 = vmatprep.subr.bf16.mxu0 %v9044_v24  ;;  %v9171_v31 = vcombine.low %v635_v20, %v639_v21  ;;  %v10791_v20 = vpack.c.bf16 %v373_v11, %v373_v11 }
  0xc4   : > { %v503_v27 = vld [vmem:[%s10696_s8 + $0x320] sm:$0xff]  ;;  %6428 = vmatpush2.bf16.msra.mxu0 %v9043_v30 }
  0xc5   : > { %v627_v28 = vld [vmem:[%s10696_s8 + $0x700] sm:$0xff]  ;;  %v9036_v32 = vcombine.high %v499_v26, %v503_v27  ;;  %6468 = vmatprep.subr.bf16.mxu1 %v9172_v25  ;;  %v9035_v38 = vcombine.low %v499_v26, %v503_v27 }
  0xc6   : > { %v631_v29 = vld [vmem:[%s10696_s8 + $0x720] sm:$0xff]  ;;  %6469 = vmatpush2.bf16.msra.mxu1 %v9171_v31  ;;  %v10800_v31 = vpack.c.bf16 %v378_v22, %v378_v22 }
  0xc7   : > { %v9164_v33 = vcombine.high %v627_v28, %v631_v29  ;;  %v491_v34 = vld [vmem:[%s10696_s8 + $0x2c0] sm:$0xff]  ;;  %6429 = vmatprep.subr.bf16.mxu0 %v9036_v32  ;;  %v9163_v39 = vcombine.low %v627_v28, %v631_v29  ;;  %v10795_v28 = vpack.c.bf16 %v376_v19, %v376_v19 }
  0xc8   : > { %v495_v35 = vld [vmem:[%s10696_s8 + $0x2e0] sm:$0xff]  ;;  %6430 = vmatpush2.bf16.msra.mxu0 %v9035_v38 }
  0xc9   : > { %v619_v36 = vld [vmem:[%s10696_s8 + $0x6c0] sm:$0xff]  ;;  %v9028_v40 = vcombine.high %v491_v34, %v495_v35  ;;  %6470 = vmatprep.subr.bf16.mxu1 %v9164_v33  ;;  %v9027_v46 = vcombine.low %v491_v34, %v495_v35 }
  0xca   : > { %v623_v37 = vld [vmem:[%s10696_s8 + $0x6e0] sm:$0xff]  ;;  %6471 = vmatpush2.bf16.msra.mxu1 %v9163_v39 }
  0xcb   : > { %v9156_v41 = vcombine.high %v619_v36, %v623_v37  ;;  %v483_v42 = vld [vmem:[%s10696_s8 + $0x280] sm:$0xff]  ;;  %6431 = vmatprep.subr.bf16.mxu0 %v9028_v40  ;;  %v9155_v47 = vcombine.low %v619_v36, %v623_v37 }
  0xcc   : > { %v487_v43 = vld [vmem:[%s10696_s8 + $0x2a0] sm:$0xff]  ;;  %6432 = vmatpush2.bf16.msra.mxu0 %v9027_v46 }
  0xcd   : > { %v611_v44 = vld [vmem:[%s10696_s8 + $0x680] sm:$0xff]  ;;  %v9020_v48 = vcombine.high %v483_v42, %v487_v43  ;;  %6472 = vmatprep.subr.bf16.mxu1 %v9156_v41  ;;  %v9019_v54 = vcombine.low %v483_v42, %v487_v43 }
  0xce   : > { %v615_v45 = vld [vmem:[%s10696_s8 + $0x6a0] sm:$0xff]  ;;  %6473 = vmatpush2.bf16.msra.mxu1 %v9155_v47 }
  0xcf   : > { %v9148_v49 = vcombine.high %v611_v44, %v615_v45  ;;  %v475_v50 = vld [vmem:[%s10696_s8 + $0x240] sm:$0xff]  ;;  %6433 = vmatprep.subr.bf16.mxu0 %v9020_v48  ;;  %v9147_v55 = vcombine.low %v611_v44, %v615_v45 }
  0xd0   : > { %v479_v51 = vld [vmem:[%s10696_s8 + $0x260] sm:$0xff]  ;;  %6434 = vmatpush2.bf16.msra.mxu0 %v9019_v54 }
  0xd1   : > { %v603_v52 = vld [vmem:[%s10696_s8 + $0x640] sm:$0xff]  ;;  %v9012_v56 = vcombine.high %v475_v50, %v479_v51  ;;  %6474 = vmatprep.subr.bf16.mxu1 %v9148_v49  ;;  %v9011_v0 = vcombine.low %v475_v50, %v479_v51 }
  0xd2   : > { %v607_v53 = vld [vmem:[%s10696_s8 + $0x660] sm:$0xff]  ;;  %6475 = vmatpush2.bf16.msra.mxu1 %v9147_v55 }
  0xd3   : > { %v9140_v57 = vcombine.high %v603_v52, %v607_v53  ;;  %v467_v60 = vld [vmem:[%s10696_s8 + $0x200] sm:$0xff]  ;;  %6435 = vmatprep.subr.bf16.mxu0 %v9012_v56  ;;  %v9139_v1 = vcombine.low %v603_v52, %v607_v53 }
  0xd4   : > { %v471_v61 = vld [vmem:[%s10696_s8 + $0x220] sm:$0xff]  ;;  %6436 = vmatpush2.bf16.msra.mxu0 %v9011_v0 }
  0xd5   : > { %v595_v62 = vld [vmem:[%s10696_s8 + $0x600] sm:$0xff]  ;;  %v9004_v2 = vcombine.high %v467_v60, %v471_v61  ;;  %6476 = vmatprep.subr.bf16.mxu1 %v9140_v57  ;;  %v9003_v8 = vcombine.low %v467_v60, %v471_v61 }
  0xd6   : > { %v599_v63 = vld [vmem:[%s10696_s8 + $0x620] sm:$0xff]  ;;  %6477 = vmatpush2.bf16.msra.mxu1 %v9139_v1 }
  0xd7   : > { %v9132_v3 = vcombine.high %v595_v62, %v599_v63  ;;  %v715_v4 = vld [vmem:[%s10696_s8 + $0x9c0] sm:$0xff]  ;;  %6437 = vmatprep.subr.bf16.mxu0 %v9004_v2  ;;  %v9131_v10 = vcombine.low %v595_v62, %v599_v63 }
  0xd8   : > { %v719_v5 = vld [vmem:[%s10696_s8 + $0x9e0] sm:$0xff]  ;;  %6438 = vmatpush2.bf16.msra.mxu0 %v9003_v8 }
  0xd9   : > { %v843_v6 = vld [vmem:[%s10696_s8 + $0xdc0] sm:$0xff]  ;;  %v9252_v12 = vcombine.high %v715_v4, %v719_v5  ;;  %6478 = vmatprep.subr.bf16.mxu1 %v9132_v3  ;;  %v9251_v21 = vcombine.low %v715_v4, %v719_v5 }
  0xda   : > { %v847_v7 = vld [vmem:[%s10696_s8 + $0xde0] sm:$0xff]  ;;  %6479 = vmatpush2.bf16.msra.mxu1 %v9131_v10 }
  0xdb   : > { %v371_v9 = vld [vmem:[#allocation2] sm:$0xff]  ;;  %v9380_v13 = vcombine.high %v843_v6, %v847_v7  ;;  %6489 = vmatprep.subr.bf16.mxu0 %v9252_v12  ;;  %v9379_v23 = vcombine.low %v843_v6, %v847_v7 }
  0xdc   : > { %v707_v14 = vld [vmem:[%s10696_s8 + $0x980] sm:$0xff]  ;;  %v10787_v16 = vpack.c.bf16 %v371_v9, %v371_v9 }
  0xdd   : > { %v711_v15 = vld [vmem:[%s10696_s8 + $0x9a0] sm:$0xff]  ;;  %6530 = vmatprep.subr.bf16.mxu1 %v9380_v13  ;;  %6481 = vmatmul.mubr.bf16.vlgmr.msra.gmra.mxu1 %v10791_v20 }
  0xde   : > { %v835_v17 = vld [vmem:[%s10696_s8 + $0xd80] sm:$0xff]  ;;  %v9244_v24 = vcombine.high %v707_v14, %v711_v15  ;;  %6440 = vmatmul.mubr.bf16.vlgmr.msra.gmra.mxu0 %v10787_v16  ;;  %v9243_v32 = vcombine.low %v707_v14, %v711_v15  ;;  %6531 = vmatpush1.bf16.msra.mxu1 %v9379_v23 }
  0xdf   : > { %v839_v18 = vld [vmem:[%s10696_s8 + $0xda0] sm:$0xff]  ;;  %6490 = vmatpush1.bf16.msra.mxu0 %v9251_v21  ;;  %6521 = vmatprep.mubr.bf16.mxu0 %v10795_v28 }
  0xe0   : > { %v9372_v25 = vcombine.high %v835_v17, %v839_v18  ;;  %v699_v26 = vld [vmem:[%s10696_s8 + $0x940] sm:$0xff]  ;;  %6491 = vmatprep.subr.bf16.mxu0 %v9244_v24  ;;  %v9371_v33 = vcombine.low %v835_v17, %v839_v18  ;;  %6562 = vmatprep.mubr.bf16.mxu1 %v10800_v31 }
  0xe1   : > { %v703_v27 = vld [vmem:[%s10696_s8 + $0x960] sm:$0xff] }
  0xe2   : > { %v827_v29 = vld [vmem:[%s10696_s8 + $0xd40] sm:$0xff]  ;;  %v9236_v34 = vcombine.high %v699_v26, %v703_v27  ;;  %6532 = vmatprep.subr.bf16.mxu1 %v9372_v25  ;;  %v9235_v40 = vcombine.low %v699_v26, %v703_v27 }
  0xe3   : > { %v831_v30 = vld [vmem:[%s10696_s8 + $0xd60] sm:$0xff]  ;;  %6492 = vmatpush1.bf16.msra.mxu0 %v9243_v32  ;;  %6533 = vmatpush1.bf16.msra.mxu1 %v9371_v33 }
  0xe4   : > { %v9364_v35 = vcombine.high %v827_v29, %v831_v30  ;;  %v691_v36 = vld [vmem:[%s10696_s8 + $0x900] sm:$0xff]  ;;  %6493 = vmatprep.subr.bf16.mxu0 %v9236_v34  ;;  %v9363_v41 = vcombine.low %v827_v29, %v831_v30 }
  0xe5   : > { %v695_v37 = vld [vmem:[%s10696_s8 + $0x920] sm:$0xff] }
  0xe6   : > { %v819_v38 = vld [vmem:[%s10696_s8 + $0xd00] sm:$0xff]  ;;  %v9228_v42 = vcombine.high %v691_v36, %v695_v37  ;;  %6534 = vmatprep.subr.bf16.mxu1 %v9364_v35  ;;  %v9227_v48 = vcombine.low %v691_v36, %v695_v37 }
  0xe7   : > { %v823_v39 = vld [vmem:[%s10696_s8 + $0xd20] sm:$0xff]  ;;  %6494 = vmatpush1.bf16.msra.mxu0 %v9235_v40  ;;  %6535 = vmatpush1.bf16.msra.mxu1 %v9363_v41 }
  0xe8   : > { %v9356_v43 = vcombine.high %v819_v38, %v823_v39  ;;  %v683_v44 = vld [vmem:[%s10696_s8 + $0x8c0] sm:$0xff]  ;;  %6495 = vmatprep.subr.bf16.mxu0 %v9228_v42  ;;  %v9355_v49 = vcombine.low %v819_v38, %v823_v39 }
  0xe9   : > { %v687_v45 = vld [vmem:[%s10696_s8 + $0x8e0] sm:$0xff] }
  0xea   : > { %v811_v46 = vld [vmem:[%s10696_s8 + $0xcc0] sm:$0xff]  ;;  %v9220_v50 = vcombine.high %v683_v44, %v687_v45  ;;  %6536 = vmatprep.subr.bf16.mxu1 %v9356_v43  ;;  %v9219_v56 = vcombine.low %v683_v44, %v687_v45 }
  0xeb   : > { %v815_v47 = vld [vmem:[%s10696_s8 + $0xce0] sm:$0xff]  ;;  %6496 = vmatpush1.bf16.msra.mxu0 %v9227_v48  ;;  %6537 = vmatpush1.bf16.msra.mxu1 %v9355_v49 }
  0xec   : > { %v9348_v51 = vcombine.high %v811_v46, %v815_v47  ;;  %v675_v52 = vld [vmem:[%s10696_s8 + $0x880] sm:$0xff]  ;;  %6497 = vmatprep.subr.bf16.mxu0 %v9220_v50  ;;  %v9347_v57 = vcombine.low %v811_v46, %v815_v47 }
  0xed   : > { %v679_v53 = vld [vmem:[%s10696_s8 + $0x8a0] sm:$0xff] }
  0xee   : > { %v803_v54 = vld [vmem:[%s10696_s8 + $0xc80] sm:$0xff]  ;;  %v9212_v60 = vcombine.high %v675_v52, %v679_v53  ;;  %6538 = vmatprep.subr.bf16.mxu1 %v9348_v51  ;;  %v9211_v2 = vcombine.low %v675_v52, %v679_v53 }
  0xef   : > { %v807_v55 = vld [vmem:[%s10696_s8 + $0xca0] sm:$0xff]  ;;  %6498 = vmatpush1.bf16.msra.mxu0 %v9219_v56  ;;  %6539 = vmatpush1.bf16.msra.mxu1 %v9347_v57 }
  0xf0   : > { %v9340_v61 = vcombine.high %v803_v54, %v807_v55  ;;  %v667_v62 = vld [vmem:[%s10696_s8 + $0x840] sm:$0xff]  ;;  %6499 = vmatprep.subr.bf16.mxu0 %v9212_v60  ;;  %v9339_v3 = vcombine.low %v803_v54, %v807_v55 }
  0xf1   : > { %v671_v63 = vld [vmem:[%s10696_s8 + $0x860] sm:$0xff] }
  0xf2   : > { %v795_v0 = vld [vmem:[%s10696_s8 + $0xc40] sm:$0xff]  ;;  %v9204_v4 = vcombine.high %v667_v62, %v671_v63  ;;  %6540 = vmatprep.subr.bf16.mxu1 %v9340_v61  ;;  %v9203_v10 = vcombine.low %v667_v62, %v671_v63 }
  0xf3   : > { %v799_v1 = vld [vmem:[%s10696_s8 + $0xc60] sm:$0xff]  ;;  %6500 = vmatpush1.bf16.msra.mxu0 %v9211_v2  ;;  %6541 = vmatpush1.bf16.msra.mxu1 %v9339_v3 }
  0xf4   : > { %v9332_v5 = vcombine.high %v795_v0, %v799_v1  ;;  %v659_v6 = vld [vmem:[%s10696_s8 + $0x800] sm:$0xff]  ;;  %6501 = vmatprep.subr.bf16.mxu0 %v9204_v4  ;;  %v9331_v11 = vcombine.low %v795_v0, %v799_v1 }
  0xf5   : > { %v663_v7 = vld [vmem:[%s10696_s8 + $0x820] sm:$0xff] }
  0xf6   : > { %v787_v8 = vld [vmem:[%s10696_s8 + $0xc00] sm:$0xff]  ;;  %v9196_v12 = vcombine.high %v659_v6, %v663_v7  ;;  %6542 = vmatprep.subr.bf16.mxu1 %v9332_v5  ;;  %v9195_v19 = vcombine.low %v659_v6, %v663_v7 }
  0xf7   : > { %v791_v9 = vld [vmem:[%s10696_s8 + $0xc20] sm:$0xff]  ;;  %6502 = vmatpush1.bf16.msra.mxu0 %v9203_v10  ;;  %6543 = vmatpush1.bf16.msra.mxu1 %v9331_v11 }
  0xf8   : > { %v9324_v13 = vcombine.high %v787_v8, %v791_v9  ;;  %v779_v14 = vld [vmem:[%s10696_s8 + $0xbc0] sm:$0xff]  ;;  %6503 = vmatprep.subr.bf16.mxu0 %v9196_v12  ;;  %v9323_v21 = vcombine.low %v787_v8, %v791_v9 }
  0xf9   : > { %v783_v15 = vld [vmem:[%s10696_s8 + $0xbe0] sm:$0xff] }
  0xfa   : > { %v907_v17 = vld [vmem:[%s10696_s8 + $0xfc0] sm:$0xff]  ;;  %v9316_v22 = vcombine.high %v779_v14, %v783_v15  ;;  %6544 = vmatprep.subr.bf16.mxu1 %v9324_v13  ;;  %v9315_v29 = vcombine.low %v779_v14, %v783_v15 }
  0xfb   : > { %v911_v18 = vld [vmem:[%s10696_s8 + $0xfe0] sm:$0xff]  ;;  %6504 = vmatpush1.bf16.msra.mxu0 %v9195_v19  ;;  %6545 = vmatpush1.bf16.msra.mxu1 %v9323_v21 }
  0xfc   : > { %v9444_v23 = vcombine.high %v907_v17, %v911_v18  ;;  %v771_v24 = vld [vmem:[%s10696_s8 + $0xb80] sm:$0xff]  ;;  %6505 = vmatprep.subr.bf16.mxu0 %v9316_v22  ;;  %v9443_v30 = vcombine.low %v907_v17, %v911_v18 }
  0xfd   : > { %v775_v25 = vld [vmem:[%s10696_s8 + $0xba0] sm:$0xff] }
  0xfe   : > { %v899_v26 = vld [vmem:[%s10696_s8 + $0xf80] sm:$0xff]  ;;  %v9308_v32 = vcombine.high %v771_v24, %v775_v25  ;;  %6546 = vmatprep.subr.bf16.mxu1 %v9444_v23  ;;  %v9307_v38 = vcombine.low %v771_v24, %v775_v25 }
  0xff   : > { %v903_v27 = vld [vmem:[%s10696_s8 + $0xfa0] sm:$0xff]  ;;  %6506 = vmatpush2.bf16.msra.mxu0 %v9315_v29  ;;  %6547 = vmatpush2.bf16.msra.mxu1 %v9443_v30  ;;  %v377_v30 = vld [vmem:[#allocation2 + $0x30] sm:$0xff] }
 0x100   : > { %v9436_v33 = vcombine.high %v899_v26, %v903_v27  ;;  %v763_v34 = vld [vmem:[%s10696_s8 + $0xb40] sm:$0xff]  ;;  %6507 = vmatprep.subr.bf16.mxu0 %v9308_v32  ;;  %v9435_v39 = vcombine.low %v899_v26, %v903_v27 }
 0x101   : > { %v767_v35 = vld [vmem:[%s10696_s8 + $0xb60] sm:$0xff] }
 0x102   : > { %v891_v36 = vld [vmem:[%s10696_s8 + $0xf40] sm:$0xff]  ;;  %v9300_v40 = vcombine.high %v763_v34, %v767_v35  ;;  %6548 = vmatprep.subr.bf16.mxu1 %v9436_v33  ;;  %v9299_v46 = vcombine.low %v763_v34, %v767_v35 }
 0x103   : > { %v895_v37 = vld [vmem:[%s10696_s8 + $0xf60] sm:$0xff]  ;;  %6508 = vmatpush2.bf16.msra.mxu0 %v9307_v38  ;;  %6549 = vmatpush2.bf16.msra.mxu1 %v9435_v39  ;;  %v380_v39 = vld [vmem:[#allocation2 + $0x48] sm:$0xff] }
 0x104   : > { %v9428_v41 = vcombine.high %v891_v36, %v895_v37  ;;  %v755_v42 = vld [vmem:[%s10696_s8 + $0xb00] sm:$0xff]  ;;  %6509 = vmatprep.subr.bf16.mxu0 %v9300_v40  ;;  %v9427_v47 = vcombine.low %v891_v36, %v895_v37  ;;  %v10867_v40 = vpack.c.bf16 %v377_v30, %v377_v30 }
 0x105   : > { %v759_v43 = vld [vmem:[%s10696_s8 + $0xb20] sm:$0xff] }
 0x106   : > { %v883_v44 = vld [vmem:[%s10696_s8 + $0xf00] sm:$0xff]  ;;  %v9292_v48 = vcombine.high %v755_v42, %v759_v43  ;;  %6550 = vmatprep.subr.bf16.mxu1 %v9428_v41  ;;  %v9291_v54 = vcombine.low %v755_v42, %v759_v43  ;;  %v382_v42 = vld [vmem:[#allocation2 + $0x58] sm:$0xff] }
 0x107   : > { %v887_v45 = vld [vmem:[%s10696_s8 + $0xf20] sm:$0xff]  ;;  %6510 = vmatpush2.bf16.msra.mxu0 %v9299_v46  ;;  %6551 = vmatpush2.bf16.msra.mxu1 %v9427_v47 }
 0x108   : > { %v9420_v49 = vcombine.high %v883_v44, %v887_v45  ;;  %v747_v50 = vld [vmem:[%s10696_s8 + $0xac0] sm:$0xff]  ;;  %6511 = vmatprep.subr.bf16.mxu0 %v9292_v48  ;;  %v9419_v55 = vcombine.low %v883_v44, %v887_v45  ;;  %v10871_v48 = vpack.c.bf16 %v380_v39, %v380_v39 }
 0x109   : > { %v751_v51 = vld [vmem:[%s10696_s8 + $0xae0] sm:$0xff] }
 0x10a   : > { %v875_v52 = vld [vmem:[%s10696_s8 + $0xec0] sm:$0xff]  ;;  %v9284_v56 = vcombine.high %v747_v50, %v751_v51  ;;  %6552 = vmatprep.subr.bf16.mxu1 %v9420_v49  ;;  %v9283_v0 = vcombine.low %v747_v50, %v751_v51  ;;  %v10876_v51 = vpack.c.bf16 %v382_v42, %v382_v42 }
 0x10b   : > { %v879_v53 = vld [vmem:[%s10696_s8 + $0xee0] sm:$0xff]  ;;  %6512 = vmatpush2.bf16.msra.mxu0 %v9291_v54  ;;  %6553 = vmatpush2.bf16.msra.mxu1 %v9419_v55 }
 0x10c   : > { %v9412_v57 = vcombine.high %v875_v52, %v879_v53  ;;  %v739_v60 = vld [vmem:[%s10696_s8 + $0xa80] sm:$0xff]  ;;  %6513 = vmatprep.subr.bf16.mxu0 %v9284_v56  ;;  %v9411_v1 = vcombine.low %v875_v52, %v879_v53 }
 0x10d   : > { %v743_v61 = vld [vmem:[%s10696_s8 + $0xaa0] sm:$0xff] }
 0x10e   : > { %v867_v62 = vld [vmem:[%s10696_s8 + $0xe80] sm:$0xff]  ;;  %v9276_v2 = vcombine.high %v739_v60, %v743_v61  ;;  %6554 = vmatprep.subr.bf16.mxu1 %v9412_v57  ;;  %v9275_v8 = vcombine.low %v739_v60, %v743_v61 }
 0x10f   : > { %v871_v63 = vld [vmem:[%s10696_s8 + $0xea0] sm:$0xff]  ;;  %6514 = vmatpush2.bf16.msra.mxu0 %v9283_v0  ;;  %6555 = vmatpush2.bf16.msra.mxu1 %v9411_v1 }
 0x110   : > { %v9404_v3 = vcombine.high %v867_v62, %v871_v63  ;;  %v731_v4 = vld [vmem:[%s10696_s8 + $0xa40] sm:$0xff]  ;;  %6515 = vmatprep.subr.bf16.mxu0 %v9276_v2  ;;  %v9403_v9 = vcombine.low %v867_v62, %v871_v63 }
 0x111   : > { %v735_v5 = vld [vmem:[%s10696_s8 + $0xa60] sm:$0xff] }
 0x112   : > { %v859_v6 = vld [vmem:[%s10696_s8 + $0xe40] sm:$0xff]  ;;  %v9268_v10 = vcombine.high %v731_v4, %v735_v5  ;;  %6556 = vmatprep.subr.bf16.mxu1 %v9404_v3  ;;  %v9267_v17 = vcombine.low %v731_v4, %v735_v5 }
 0x113   : > { %v863_v7 = vld [vmem:[%s10696_s8 + $0xe60] sm:$0xff]  ;;  %6516 = vmatpush2.bf16.msra.mxu0 %v9275_v8  ;;  %6557 = vmatpush2.bf16.msra.mxu1 %v9403_v9 }
 0x114   : > { %v9396_v11 = vcombine.high %v859_v6, %v863_v7  ;;  %v723_v12 = vld [vmem:[%s10696_s8 + $0xa00] sm:$0xff]  ;;  %6517 = vmatprep.subr.bf16.mxu0 %v9268_v10  ;;  %v9395_v18 = vcombine.low %v859_v6, %v863_v7 }
 0x115   : > { %v727_v13 = vld [vmem:[%s10696_s8 + $0xa20] sm:$0xff] }
 0x116   : > { %v851_v14 = vld [vmem:[%s10696_s8 + $0xe00] sm:$0xff]  ;;  %v9260_v19 = vcombine.high %v723_v12, %v727_v13  ;;  %6558 = vmatprep.subr.bf16.mxu1 %v9396_v11  ;;  %v9259_v26 = vcombine.low %v723_v12, %v727_v13 }
 0x117   : > { %v855_v15 = vld [vmem:[%s10696_s8 + $0xe20] sm:$0xff]  ;;  %6518 = vmatpush2.bf16.msra.mxu0 %v9267_v17  ;;  %6559 = vmatpush2.bf16.msra.mxu1 %v9395_v18 }
 0x118   : > { %v9388_v21 = vcombine.high %v851_v14, %v855_v15  ;;  %v971_v22 = vld [vmem:[%s10696_s8 + $0x11c0] sm:$0xff]  ;;  %6519 = vmatprep.subr.bf16.mxu0 %v9260_v19  ;;  %v9387_v29 = vcombine.low %v851_v14, %v855_v15 }
 0x119   : > { %v975_v23 = vld [vmem:[%s10696_s8 + $0x11e0] sm:$0xff] }
 0x11a   : > { %v1099_v24 = vld [vmem:[%s10696_s8 + $0x15c0] sm:$0xff]  ;;  %v9508_v32 = vcombine.high %v971_v22, %v975_v23  ;;  %6560 = vmatprep.subr.bf16.mxu1 %v9388_v21  ;;  %v9507_v41 = vcombine.low %v971_v22, %v975_v23 }
 0x11b   : > { %v1103_v25 = vld [vmem:[%s10696_s8 + $0x15e0] sm:$0xff]  ;;  %6520 = vmatpush2.bf16.msra.mxu0 %v9259_v26  ;;  %6561 = vmatpush2.bf16.msra.mxu1 %v9387_v29 }
 0x11c   : > { %v375_v27 = vld [vmem:[#allocation2 + $0x20] sm:$0xff]  ;;  %v9636_v33 = vcombine.high %v1099_v24, %v1103_v25  ;;  %6571 = vmatprep.subr.bf16.mxu0 %v9508_v32  ;;  %v9635_v43 = vcombine.low %v1099_v24, %v1103_v25 }
 0x11d   : > { %v963_v34 = vld [vmem:[%s10696_s8 + $0x1180] sm:$0xff]  ;;  %v10863_v36 = vpack.c.bf16 %v375_v27, %v375_v27 }
 0x11e   : > { %v967_v35 = vld [vmem:[%s10696_s8 + $0x11a0] sm:$0xff]  ;;  %6612 = vmatprep.subr.bf16.mxu1 %v9636_v33  ;;  %6563 = vmatmul.mubr.bf16.vlgmr.msra.gmra.mxu1 %v10867_v40 }
 0x11f   : > { %v1091_v37 = vld [vmem:[%s10696_s8 + $0x1580] sm:$0xff]  ;;  %v9500_v44 = vcombine.high %v963_v34, %v967_v35  ;;  %6522 = vmatmul.mubr.bf16.vlgmr.msra.gmra.mxu0 %v10863_v36  ;;  %v9499_v52 = vcombine.low %v963_v34, %v967_v35  ;;  %6613 = vmatpush1.bf16.msra.mxu1 %v9635_v43 }
 0x120   : > { %v1095_v38 = vld [vmem:[%s10696_s8 + $0x15a0] sm:$0xff]  ;;  %6572 = vmatpush1.bf16.msra.mxu0 %v9507_v41  ;;  %6603 = vmatprep.mubr.bf16.mxu0 %v10871_v48 }
 0x121   : > { %v9628_v45 = vcombine.high %v1091_v37, %v1095_v38  ;;  %v955_v46 = vld [vmem:[%s10696_s8 + $0x1140] sm:$0xff]  ;;  %6573 = vmatprep.subr.bf16.mxu0 %v9500_v44  ;;  %v9627_v53 = vcombine.low %v1091_v37, %v1095_v38  ;;  %6644 = vmatprep.mubr.bf16.mxu1 %v10876_v51 }
 0x122   : > { %v959_v47 = vld [vmem:[%s10696_s8 + $0x1160] sm:$0xff] }
 0x123   : > { %v1083_v49 = vld [vmem:[%s10696_s8 + $0x1540] sm:$0xff]  ;;  %v9492_v54 = vcombine.high %v955_v46, %v959_v47  ;;  %6614 = vmatprep.subr.bf16.mxu1 %v9628_v45  ;;  %v9491_v62 = vcombine.low %v955_v46, %v959_v47 }
 0x124   : > { %v1087_v50 = vld [vmem:[%s10696_s8 + $0x1560] sm:$0xff]  ;;  %6574 = vmatpush1.bf16.msra.mxu0 %v9499_v52  ;;  %6615 = vmatpush1.bf16.msra.mxu1 %v9627_v53 }
 0x125   : > { %v9620_v55 = vcombine.high %v1083_v49, %v1087_v50  ;;  %v947_v56 = vld [vmem:[%s10696_s8 + $0x1100] sm:$0xff]  ;;  %6575 = vmatprep.subr.bf16.mxu0 %v9492_v54  ;;  %v9619_v63 = vcombine.low %v1083_v49, %v1087_v50 }
 0x126   : > { %v951_v57 = vld [vmem:[%s10696_s8 + $0x1120] sm:$0xff] }
 0x127   : > { %v1075_v60 = vld [vmem:[%s10696_s8 + $0x1500] sm:$0xff]  ;;  %v9484_v0 = vcombine.high %v947_v56, %v951_v57  ;;  %6616 = vmatprep.subr.bf16.mxu1 %v9620_v55  ;;  %v9483_v6 = vcombine.low %v947_v56, %v951_v57 }
 0x128   : > { %v1079_v61 = vld [vmem:[%s10696_s8 + $0x1520] sm:$0xff]  ;;  %6576 = vmatpush1.bf16.msra.mxu0 %v9491_v62  ;;  %6617 = vmatpush1.bf16.msra.mxu1 %v9619_v63 }
 0x129   : > { %v9612_v1 = vcombine.high %v1075_v60, %v1079_v61  ;;  %v939_v2 = vld [vmem:[%s10696_s8 + $0x10c0] sm:$0xff]  ;;  %6577 = vmatprep.subr.bf16.mxu0 %v9484_v0  ;;  %v9611_v7 = vcombine.low %v1075_v60, %v1079_v61 }
 0x12a   : > { %v943_v3 = vld [vmem:[%s10696_s8 + $0x10e0] sm:$0xff] }
 0x12b   : > { %v1067_v4 = vld [vmem:[%s10696_s8 + $0x14c0] sm:$0xff]  ;;  %v9476_v8 = vcombine.high %v939_v2, %v943_v3  ;;  %6618 = vmatprep.subr.bf16.mxu1 %v9612_v1  ;;  %v9475_v14 = vcombine.low %v939_v2, %v943_v3 }
 0x12c   : > { %v1071_v5 = vld [vmem:[%s10696_s8 + $0x14e0] sm:$0xff]  ;;  %6578 = vmatpush1.bf16.msra.mxu0 %v9483_v6  ;;  %6619 = vmatpush1.bf16.msra.mxu1 %v9611_v7 }
 0x12d   : > { %v9604_v9 = vcombine.high %v1067_v4, %v1071_v5  ;;  %v931_v10 = vld [vmem:[%s10696_s8 + $0x1080] sm:$0xff]  ;;  %6579 = vmatprep.subr.bf16.mxu0 %v9476_v8  ;;  %v9603_v15 = vcombine.low %v1067_v4, %v1071_v5 }
 0x12e   : > { %v935_v11 = vld [vmem:[%s10696_s8 + $0x10a0] sm:$0xff] }
 0x12f   : > { %v1059_v12 = vld [vmem:[%s10696_s8 + $0x1480] sm:$0xff]  ;;  %v9468_v17 = vcombine.high %v931_v10, %v935_v11  ;;  %6620 = vmatprep.subr.bf16.mxu1 %v9604_v9  ;;  %v9467_v24 = vcombine.low %v931_v10, %v935_v11 }
 0x130   : > { %v1063_v13 = vld [vmem:[%s10696_s8 + $0x14a0] sm:$0xff]  ;;  %6580 = vmatpush1.bf16.msra.mxu0 %v9475_v14  ;;  %6621 = vmatpush1.bf16.msra.mxu1 %v9603_v15 }
 0x131   : > { %v9596_v18 = vcombine.high %v1059_v12, %v1063_v13  ;;  %v923_v19 = vld [vmem:[%s10696_s8 + $0x1040] sm:$0xff]  ;;  %6581 = vmatprep.subr.bf16.mxu0 %v9468_v17  ;;  %v9595_v25 = vcombine.low %v1059_v12, %v1063_v13 }
 0x132   : > { %v927_v21 = vld [vmem:[%s10696_s8 + $0x1060] sm:$0xff] }
 0x133   : > { %v1051_v22 = vld [vmem:[%s10696_s8 + $0x1440] sm:$0xff]  ;;  %v9460_v26 = vcombine.high %v923_v19, %v927_v21  ;;  %6622 = vmatprep.subr.bf16.mxu1 %v9596_v18  ;;  %v9459_v34 = vcombine.low %v923_v19, %v927_v21 }
 0x134   : > { %v1055_v23 = vld [vmem:[%s10696_s8 + $0x1460] sm:$0xff]  ;;  %6582 = vmatpush1.bf16.msra.mxu0 %v9467_v24  ;;  %6623 = vmatpush1.bf16.msra.mxu1 %v9595_v25 }
 0x135   : > { %v9588_v27 = vcombine.high %v1051_v22, %v1055_v23  ;;  %v915_v29 = vld [vmem:[%s10696_s8 + $0x1000] sm:$0xff]  ;;  %6583 = vmatprep.subr.bf16.mxu0 %v9460_v26  ;;  %v9587_v35 = vcombine.low %v1051_v22, %v1055_v23 }
 0x136   : > { %v919_v30 = vld [vmem:[%s10696_s8 + $0x1020] sm:$0xff] }
 0x137   : > { %v1043_v32 = vld [vmem:[%s10696_s8 + $0x1400] sm:$0xff]  ;;  %v9452_v37 = vcombine.high %v915_v29, %v919_v30  ;;  %6624 = vmatprep.subr.bf16.mxu1 %v9588_v27  ;;  %v9451_v44 = vcombine.low %v915_v29, %v919_v30 }
 0x138   : > { %v1047_v33 = vld [vmem:[%s10696_s8 + $0x1420] sm:$0xff]  ;;  %6584 = vmatpush1.bf16.msra.mxu0 %v9459_v34  ;;  %6625 = vmatpush1.bf16.msra.mxu1 %v9587_v35 }
 0x139   : > { %v9580_v38 = vcombine.high %v1043_v32, %v1047_v33  ;;  %v1035_v39 = vld [vmem:[%s10696_s8 + $0x13c0] sm:$0xff]  ;;  %6585 = vmatprep.subr.bf16.mxu0 %v9452_v37  ;;  %v9579_v45 = vcombine.low %v1043_v32, %v1047_v33 }
 0x13a   : > { %v1039_v41 = vld [vmem:[%s10696_s8 + $0x13e0] sm:$0xff] }
 0x13b   : > { %v1163_v42 = vld [vmem:[%s10696_s8 + $0x17c0] sm:$0xff]  ;;  %v9572_v46 = vcombine.high %v1035_v39, %v1039_v41  ;;  %6626 = vmatprep.subr.bf16.mxu1 %v9580_v38  ;;  %v9571_v54 = vcombine.low %v1035_v39, %v1039_v41 }
 0x13c   : > { %v1167_v43 = vld [vmem:[%s10696_s8 + $0x17e0] sm:$0xff]  ;;  %6586 = vmatpush1.bf16.msra.mxu0 %v9451_v44  ;;  %6627 = vmatpush1.bf16.msra.mxu1 %v9579_v45 }
 0x13d   : > { %v9700_v47 = vcombine.high %v1163_v42, %v1167_v43  ;;  %v1027_v49 = vld [vmem:[%s10696_s8 + $0x1380] sm:$0xff]  ;;  %6587 = vmatprep.subr.bf16.mxu0 %v9572_v46  ;;  %v9699_v55 = vcombine.low %v1163_v42, %v1167_v43 }
 0x13e   : > { %v1031_v50 = vld [vmem:[%s10696_s8 + $0x13a0] sm:$0xff] }
 0x13f   : > { %v1155_v52 = vld [vmem:[%s10696_s8 + $0x1780] sm:$0xff]  ;;  %v9564_v56 = vcombine.high %v1027_v49, %v1031_v50  ;;  %6628 = vmatprep.subr.bf16.mxu1 %v9700_v47  ;;  %v9563_v0 = vcombine.low %v1027_v49, %v1031_v50 }
 0x140   : > { %v1159_v53 = vld [vmem:[%s10696_s8 + $0x17a0] sm:$0xff]  ;;  %6588 = vmatpush2.bf16.msra.mxu0 %v9571_v54  ;;  %6629 = vmatpush2.bf16.msra.mxu1 %v9699_v55 }
 0x141   : > { %v9692_v57 = vcombine.high %v1155_v52, %v1159_v53  ;;  %v1019_v60 = vld [vmem:[%s10696_s8 + $0x1340] sm:$0xff]  ;;  %6589 = vmatprep.subr.bf16.mxu0 %v9564_v56  ;;  %v9691_v1 = vcombine.low %v1155_v52, %v1159_v53 }
 0x142   : > { %v1023_v61 = vld [vmem:[%s10696_s8 + $0x1360] sm:$0xff] }
 0x143   : > { %v1147_v62 = vld [vmem:[%s10696_s8 + $0x1740] sm:$0xff]  ;;  %v9556_v2 = vcombine.high %v1019_v60, %v1023_v61  ;;  %6630 = vmatprep.subr.bf16.mxu1 %v9692_v57  ;;  %v9555_v8 = vcombine.low %v1019_v60, %v1023_v61  ;;  %v381_v61 = vld [vmem:[#allocation2 + $0x50] sm:$0xff] }
 0x144   : > { %v1151_v63 = vld [vmem:[%s10696_s8 + $0x1760] sm:$0xff]  ;;  %6590 = vmatpush2.bf16.msra.mxu0 %v9563_v0  ;;  %6631 = vmatpush2.bf16.msra.mxu1 %v9691_v1 }
 0x145   : > { %v9684_v3 = vcombine.high %v1147_v62, %v1151_v63  ;;  %v1011_v4 = vld [vmem:[%s10696_s8 + $0x1300] sm:$0xff]  ;;  %6591 = vmatprep.subr.bf16.mxu0 %v9556_v2  ;;  %v9683_v9 = vcombine.low %v1147_v62, %v1151_v63 }
 0x146   : > { %v1015_v5 = vld [vmem:[%s10696_s8 + $0x1320] sm:$0xff] }
 0x147   : > { %v1139_v6 = vld [vmem:[%s10696_s8 + $0x1700] sm:$0xff]  ;;  %v9548_v10 = vcombine.high %v1011_v4, %v1015_v5  ;;  %6632 = vmatprep.subr.bf16.mxu1 %v9684_v3  ;;  %v9547_v17 = vcombine.low %v1011_v4, %v1015_v5  ;;  %v386_v5 = vld [vmem:[#allocation2 + $0x78] sm:$0xff] }
 0x148   : > { %v1143_v7 = vld [vmem:[%s10696_s8 + $0x1720] sm:$0xff]  ;;  %6592 = vmatpush2.bf16.msra.mxu0 %v9555_v8  ;;  %6633 = vmatpush2.bf16.msra.mxu1 %v9683_v9  ;;  %v384_v8 = vld [vmem:[#allocation2 + $0x68] sm:$0xff] }
 0x149   : > { %v9676_v11 = vcombine.high %v1139_v6, %v1143_v7  ;;  %v1003_v12 = vld [vmem:[%s10696_s8 + $0x12c0] sm:$0xff]  ;;  %6593 = vmatprep.subr.bf16.mxu0 %v9548_v10  ;;  %v9675_v18 = vcombine.low %v1139_v6, %v1143_v7  ;;  %v10943_v6 = vpack.c.bf16 %v381_v61, %v381_v61 }
 0x14a   : > { %v1007_v13 = vld [vmem:[%s10696_s8 + $0x12e0] sm:$0xff] }
 0x14b   : > { %v1131_v14 = vld [vmem:[%s10696_s8 + $0x16c0] sm:$0xff]  ;;  %v9540_v19 = vcombine.high %v1003_v12, %v1007_v13  ;;  %6634 = vmatprep.subr.bf16.mxu1 %v9676_v11  ;;  %v9539_v26 = vcombine.low %v1003_v12, %v1007_v13 }
 0x14c   : > { %v1135_v15 = vld [vmem:[%s10696_s8 + $0x16e0] sm:$0xff]  ;;  %6594 = vmatpush2.bf16.msra.mxu0 %v9547_v17  ;;  %6635 = vmatpush2.bf16.msra.mxu1 %v9675_v18  ;;  %v10952_v18 = vpack.c.bf16 %v384_v8, %v384_v8 }
 0x14d   : > { %v9668_v21 = vcombine.high %v1131_v14, %v1135_v15  ;;  %v995_v22 = vld [vmem:[%s10696_s8 + $0x1280] sm:$0xff]  ;;  %6595 = vmatprep.subr.bf16.mxu0 %v9540_v19  ;;  %v9667_v27 = vcombine.low %v1131_v14, %v1135_v15  ;;  %v10947_v14 = vpack.c.bf16 %v386_v5, %v386_v5 }
 0x14e   : > { %v999_v23 = vld [vmem:[%s10696_s8 + $0x12a0] sm:$0xff] }
 0x14f   : > { %v1123_v24 = vld [vmem:[%s10696_s8 + $0x1680] sm:$0xff]  ;;  %v9532_v29 = vcombine.high %v995_v22, %v999_v23  ;;  %6636 = vmatprep.subr.bf16.mxu1 %v9668_v21  ;;  %v9531_v37 = vcombine.low %v995_v22, %v999_v23 }
 0x150   : > { %v1127_v25 = vld [vmem:[%s10696_s8 + $0x16a0] sm:$0xff]  ;;  %6596 = vmatpush2.bf16.msra.mxu0 %v9539_v26  ;;  %6637 = vmatpush2.bf16.msra.mxu1 %v9667_v27 }
 0x151   : > { %v9660_v30 = vcombine.high %v1123_v24, %v1127_v25  ;;  %v987_v32 = vld [vmem:[%s10696_s8 + $0x1240] sm:$0xff]  ;;  %6597 = vmatprep.subr.bf16.mxu0 %v9532_v29  ;;  %v9659_v38 = vcombine.low %v1123_v24, %v1127_v25 }
 0x152   : > { %v991_v33 = vld [vmem:[%s10696_s8 + $0x1260] sm:$0xff] }
 0x153   : > { %v1115_v34 = vld [vmem:[%s10696_s8 + $0x1640] sm:$0xff]  ;;  %v9524_v39 = vcombine.high %v987_v32, %v991_v33  ;;  %6638 = vmatprep.subr.bf16.mxu1 %v9660_v30  ;;  %v9523_v46 = vcombine.low %v987_v32, %v991_v33 }
 0x154   : > { %v1119_v35 = vld [vmem:[%s10696_s8 + $0x1660] sm:$0xff]  ;;  %6598 = vmatpush2.bf16.msra.mxu0 %v9531_v37  ;;  %6639 = vmatpush2.bf16.msra.mxu1 %v9659_v38 }
 0x155   : > { %v9652_v41 = vcombine.high %v1115_v34, %v1119_v35  ;;  %v979_v42 = vld [vmem:[%s10696_s8 + $0x1200] sm:$0xff]  ;;  %6599 = vmatprep.subr.bf16.mxu0 %v9524_v39  ;;  %v9651_v47 = vcombine.low %v1115_v34, %v1119_v35 }
 0x156   : > { %v983_v43 = vld [vmem:[%s10696_s8 + $0x1220] sm:$0xff] }
 0x157   : > { %v1107_v44 = vld [vmem:[%s10696_s8 + $0x1600] sm:$0xff]  ;;  %v9516_v49 = vcombine.high %v979_v42, %v983_v43  ;;  %6640 = vmatprep.subr.bf16.mxu1 %v9652_v41  ;;  %v9515_v56 = vcombine.low %v979_v42, %v983_v43 }
 0x158   : > { %v1111_v45 = vld [vmem:[%s10696_s8 + $0x1620] sm:$0xff]  ;;  %6600 = vmatpush2.bf16.msra.mxu0 %v9523_v46  ;;  %6641 = vmatpush2.bf16.msra.mxu1 %v9651_v47 }
 0x159   : > { %v9644_v50 = vcombine.high %v1107_v44, %v1111_v45  ;;  %v1227_v52 = vld [vmem:[%s10696_s8 + $0x19c0] sm:$0xff]  ;;  %6601 = vmatprep.subr.bf16.mxu0 %v9516_v49  ;;  %v9643_v60 = vcombine.low %v1107_v44, %v1111_v45 }
 0x15a   : > { %v1231_v53 = vld [vmem:[%s10696_s8 + $0x19e0] sm:$0xff] }
 0x15b   : > { %v1355_v54 = vld [vmem:[%s10696_s8 + $0x1dc0] sm:$0xff]  ;;  %v9764_v62 = vcombine.high %v1227_v52, %v1231_v53  ;;  %6642 = vmatprep.subr.bf16.mxu1 %v9644_v50  ;;  %v9763_v7 = vcombine.low %v1227_v52, %v1231_v53 }
 0x15c   : > { %v1359_v55 = vld [vmem:[%s10696_s8 + $0x1de0] sm:$0xff]  ;;  %6602 = vmatpush2.bf16.msra.mxu0 %v9515_v56  ;;  %6643 = vmatpush2.bf16.msra.mxu1 %v9643_v60 }
 0x15d   : > { %v379_v57 = vld [vmem:[#allocation2 + $0x40] sm:$0xff]  ;;  %v9892_v63 = vcombine.high %v1355_v54, %v1359_v55  ;;  %6653 = vmatprep.subr.bf16.mxu0 %v9764_v62  ;;  %v9891_v9 = vcombine.low %v1355_v54, %v1359_v55 }
 0x15e   : > { %v1219_v0 = vld [vmem:[%s10696_s8 + $0x1980] sm:$0xff]  ;;  %v10939_v2 = vpack.c.bf16 %v379_v57, %v379_v57 }
 0x15f   : > { %v1223_v1 = vld [vmem:[%s10696_s8 + $0x19a0] sm:$0xff]  ;;  %6694 = vmatprep.subr.bf16.mxu1 %v9892_v63  ;;  %6645 = vmatmul.mubr.bf16.vlgmr.msra.gmra.mxu1 %v10943_v6 }
 0x160   : > { %v1347_v3 = vld [vmem:[%s10696_s8 + $0x1d80] sm:$0xff]  ;;  %v9756_v10 = vcombine.high %v1219_v0, %v1223_v1  ;;  %6604 = vmatmul.mubr.bf16.vlgmr.msra.gmra.mxu0 %v10939_v2  ;;  %v9755_v19 = vcombine.low %v1219_v0, %v1223_v1  ;;  %6695 = vmatpush1.bf16.msra.mxu1 %v9891_v9 }
 0x161   : > { %v1351_v4 = vld [vmem:[%s10696_s8 + $0x1da0] sm:$0xff]  ;;  %6654 = vmatpush1.bf16.msra.mxu0 %v9763_v7  ;;  %9939 = vmatprep.mubr.msk.bf16.mxu1 %vm6403_vm0, %v10947_v14 }
 0x162   : > { %v9884_v11 = vcombine.high %v1347_v3, %v1351_v4  ;;  %v1211_v12 = vld [vmem:[%s10696_s8 + $0x1940] sm:$0xff]  ;;  %6655 = vmatprep.subr.bf16.mxu0 %v9756_v10  ;;  %v9883_v21 = vcombine.low %v1347_v3, %v1351_v4  ;;  %6685 = vmatprep.mubr.bf16.mxu0 %v10952_v18 }
 0x163   : > { %v1215_v13 = vld [vmem:[%s10696_s8 + $0x1960] sm:$0xff] }
 0x164   : > { %v1339_v15 = vld [vmem:[%s10696_s8 + $0x1d40] sm:$0xff]  ;;  %v9748_v22 = vcombine.high %v1211_v12, %v1215_v13  ;;  %6696 = vmatprep.subr.bf16.mxu1 %v9884_v11  ;;  %v9747_v29 = vcombine.low %v1211_v12, %v1215_v13 }
 0x165   : > { %v1343_v17 = vld [vmem:[%s10696_s8 + $0x1d60] sm:$0xff]  ;;  %6656 = vmatpush1.bf16.msra.mxu0 %v9755_v19  ;;  %6697 = vmatpush1.bf16.msra.mxu1 %v9883_v21 }
 0x166   : > { %v9876_v23 = vcombine.high %v1339_v15, %v1343_v17  ;;  %v1203_v24 = vld [vmem:[%s10696_s8 + $0x1900] sm:$0xff]  ;;  %6657 = vmatprep.subr.bf16.mxu0 %v9748_v22  ;;  %v9875_v30 = vcombine.low %v1339_v15, %v1343_v17 }
 0x167   : > { %v1207_v25 = vld [vmem:[%s10696_s8 + $0x1920] sm:$0xff] }
 0x168   : > { %v1331_v26 = vld [vmem:[%s10696_s8 + $0x1d00] sm:$0xff]  ;;  %v9740_v32 = vcombine.high %v1203_v24, %v1207_v25  ;;  %6698 = vmatprep.subr.bf16.mxu1 %v9876_v23  ;;  %v9739_v39 = vcombine.low %v1203_v24, %v1207_v25 }
 0x169   : > { %v1335_v27 = vld [vmem:[%s10696_s8 + $0x1d20] sm:$0xff]  ;;  %6658 = vmatpush1.bf16.msra.mxu0 %v9747_v29  ;;  %6699 = vmatpush1.bf16.msra.mxu1 %v9875_v30 }
 0x16a   : > { %v9868_v33 = vcombine.high %v1331_v26, %v1335_v27  ;;  %v1195_v34 = vld [vmem:[%s10696_s8 + $0x18c0] sm:$0xff]  ;;  %6659 = vmatprep.subr.bf16.mxu0 %v9740_v32  ;;  %v9867_v41 = vcombine.low %v1331_v26, %v1335_v27 }
 0x16b   : > { %v1199_v35 = vld [vmem:[%s10696_s8 + $0x18e0] sm:$0xff] }
 0x16c   : > { %v1323_v37 = vld [vmem:[%s10696_s8 + $0x1cc0] sm:$0xff]  ;;  %v9732_v42 = vcombine.high %v1195_v34, %v1199_v35  ;;  %6700 = vmatprep.subr.bf16.mxu1 %v9868_v33  ;;  %v9731_v49 = vcombine.low %v1195_v34, %v1199_v35 }
 0x16d   : > { %v1327_v38 = vld [vmem:[%s10696_s8 + $0x1ce0] sm:$0xff]  ;;  %6660 = vmatpush1.bf16.msra.mxu0 %v9739_v39  ;;  %6701 = vmatpush1.bf16.msra.mxu1 %v9867_v41 }
 0x16e   : > { %v9860_v43 = vcombine.high %v1323_v37, %v1327_v38  ;;  %v1187_v44 = vld [vmem:[%s10696_s8 + $0x1880] sm:$0xff]  ;;  %6661 = vmatprep.subr.bf16.mxu0 %v9732_v42  ;;  %v9859_v50 = vcombine.low %v1323_v37, %v1327_v38 }
 0x16f   : > { %v1191_v45 = vld [vmem:[%s10696_s8 + $0x18a0] sm:$0xff] }
 0x170   : > { %v1315_v46 = vld [vmem:[%s10696_s8 + $0x1c80] sm:$0xff]  ;;  %v9724_v52 = vcombine.high %v1187_v44, %v1191_v45  ;;  %6702 = vmatprep.subr.bf16.mxu1 %v9860_v43  ;;  %v9723_v60 = vcombine.low %v1187_v44, %v1191_v45 }
 0x171   : > { %v1319_v47 = vld [vmem:[%s10696_s8 + $0x1ca0] sm:$0xff]  ;;  %6662 = vmatpush1.bf16.msra.mxu0 %v9731_v49  ;;  %6703 = vmatpush1.bf16.msra.mxu1 %v9859_v50 }
 0x172   : > { %v9852_v53 = vcombine.high %v1315_v46, %v1319_v47  ;;  %v1179_v54 = vld [vmem:[%s10696_s8 + $0x1840] sm:$0xff]  ;;  %6663 = vmatprep.subr.bf16.mxu0 %v9724_v52  ;;  %v9851_v61 = vcombine.low %v1315_v46, %v1319_v47 }
 0x173   : > { %v1183_v55 = vld [vmem:[%s10696_s8 + $0x1860] sm:$0xff] }
 0x174   : > { %v1307_v56 = vld [vmem:[%s10696_s8 + $0x1c40] sm:$0xff]  ;;  %v9716_v62 = vcombine.high %v1179_v54, %v1183_v55  ;;  %6704 = vmatprep.subr.bf16.mxu1 %v9852_v53  ;;  %v9715_v5 = vcombine.low %v1179_v54, %v1183_v55 }
 0x175   : > { %v1311_v57 = vld [vmem:[%s10696_s8 + $0x1c60] sm:$0xff]  ;;  %6664 = vmatpush1.bf16.msra.mxu0 %v9723_v60  ;;  %6705 = vmatpush1.bf16.msra.mxu1 %v9851_v61 }
 0x176   : > { %v9844_v63 = vcombine.high %v1307_v56, %v1311_v57  ;;  %v1171_v0 = vld [vmem:[%s10696_s8 + $0x1800] sm:$0xff]  ;;  %6665 = vmatprep.subr.bf16.mxu0 %v9716_v62  ;;  %v9843_v7 = vcombine.low %v1307_v56, %v1311_v57 }
 0x177   : > { %v1175_v1 = vld [vmem:[%s10696_s8 + $0x1820] sm:$0xff] }
 0x178   : > { %v1299_v3 = vld [vmem:[%s10696_s8 + $0x1c00] sm:$0xff]  ;;  %v9708_v8 = vcombine.high %v1171_v0, %v1175_v1  ;;  %6706 = vmatprep.subr.bf16.mxu1 %v9844_v63  ;;  %v9707_v15 = vcombine.low %v1171_v0, %v1175_v1  ;;  %v460_v0 = vld [vmem:[%s10696_s8 + $0x1c8] sm:$0xff] }
 0x179   : > { %v1303_v4 = vld [vmem:[%s10696_s8 + $0x1c20] sm:$0xff]  ;;  %6666 = vmatpush1.bf16.msra.mxu0 %v9715_v5  ;;  %6707 = vmatpush1.bf16.msra.mxu1 %v9843_v7  ;;  %v464_v1 = vld [vmem:[%s10696_s8 + $0x1e8] sm:$0xff]  ;;  %v385_v7 = vld [vmem:[#allocation2 + $0x70] sm:$0xff] }
 0x17a   : > { %v9836_v9 = vcombine.high %v1299_v3, %v1303_v4  ;;  %v1291_v10 = vld [vmem:[%s10696_s8 + $0x1bc0] sm:$0xff]  ;;  %6667 = vmatprep.subr.bf16.mxu0 %v9708_v8  ;;  %v9835_v17 = vcombine.low %v1299_v3, %v1303_v4  ;;  %v8998_v8 = vcombine.high %v460_v0, %v464_v1 }
 0x17b   : > { %v1295_v11 = vld [vmem:[%s10696_s8 + $0x1be0] sm:$0xff] }
 0x17c   : > { %v1395_v12 = vld [vmem:[%s10696_s8 + $0x1f00] sm:$0xff]  ;;  %v9828_v19 = vcombine.high %v1291_v10, %v1295_v11  ;;  %6708 = vmatprep.subr.bf16.mxu1 %v9836_v9  ;;  %v9827_v26 = vcombine.low %v1291_v10, %v1295_v11  ;;  %v452_v11 = vld [vmem:[%s10696_s8 + $0x188] sm:$0xff] }
 0x17d   : > { %v1399_v13 = vld [vmem:[%s10696_s8 + $0x1f20] sm:$0xff]  ;;  %6668 = vmatpush1.bf16.msra.mxu0 %v9707_v15  ;;  %6709 = vmatpush1.bf16.msra.mxu1 %v9835_v17  ;;  %v11006_v15 = vpack.c.bf16 %v385_v7, %v385_v7  ;;  %v8997_v17 = vcombine.low %v460_v0, %v464_v1  ;;  %v564_v7 = vld [vmem:[%s10696_s8 + $0x508] sm:$0xff] }
 0x17e   : > { %v9932_v21 = vcombine.high %v1395_v12, %v1399_v13  ;;  %v1283_v22 = vld [vmem:[%s10696_s8 + $0x1b80] sm:$0xff]  ;;  %6669 = vmatprep.subr.bf16.mxu0 %v9828_v19  ;;  %v9931_v27 = vcombine.low %v1395_v12, %v1399_v13  ;;  %v456_v12 = vld [vmem:[%s10696_s8 + $0x1a8] sm:$0xff] }
 0x17f   : > { %v1287_v23 = vld [vmem:[%s10696_s8 + $0x1ba0] sm:$0xff] }
 0x180   : > { %v1387_v24 = vld [vmem:[%s10696_s8 + $0x1ec0] sm:$0xff]  ;;  %v9820_v29 = vcombine.high %v1283_v22, %v1287_v23  ;;  %6716 = vmatprep.subr.bf16.mxu1 %v9932_v21  ;;  %v9819_v37 = vcombine.low %v1283_v22, %v1287_v23  ;;  %v8990_v21 = vcombine.high %v452_v11, %v456_v12 }
 0x181   : > { %v1391_v25 = vld [vmem:[%s10696_s8 + $0x1ee0] sm:$0xff]  ;;  %6670 = vmatpush2.bf16.msra.mxu0 %v9827_v26  ;;  %6717 = vmatpush2.bf16.msra.mxu1 %v9931_v27  ;;  %v8989_v27 = vcombine.low %v452_v11, %v456_v12  ;;  %v412_v11 = vld [vmem:[%s10696_s8 + $0x48] sm:$0xff] }
 0x182   : > { %v9924_v30 = vcombine.high %v1387_v24, %v1391_v25  ;;  %v1275_v32 = vld [vmem:[%s10696_s8 + $0x1b40] sm:$0xff]  ;;  %6671 = vmatprep.subr.bf16.mxu0 %v9820_v29  ;;  %v9923_v38 = vcombine.low %v1387_v24, %v1391_v25  ;;  %v444_v24 = vld [vmem:[%s10696_s8 + $0x148] sm:$0xff] }
 0x183   : > { %v1279_v33 = vld [vmem:[%s10696_s8 + $0x1b60] sm:$0xff]  ;;  %v448_v25 = vld [vmem:[%s10696_s8 + $0x168] sm:$0xff] }
 0x184   : > { %v1379_v34 = vld [vmem:[%s10696_s8 + $0x1e80] sm:$0xff]  ;;  %v9812_v39 = vcombine.high %v1275_v32, %v1279_v33  ;;  %6718 = vmatprep.subr.bf16.mxu1 %v9924_v30  ;;  %v9811_v46 = vcombine.low %v1275_v32, %v1279_v33  ;;  %v8982_v30 = vcombine.high %v444_v24, %v448_v25  ;;  %v588_v32 = vld [vmem:[%s10696_s8 + $0x5c8] sm:$0xff] }
 0x185   : > { %v1383_v35 = vld [vmem:[%s10696_s8 + $0x1ea0] sm:$0xff]  ;;  %6672 = vmatpush2.bf16.msra.mxu0 %v9819_v37  ;;  %6719 = vmatpush2.bf16.msra.mxu1 %v9923_v38  ;;  %v592_v33 = vld [vmem:[%s10696_s8 + $0x5e8] sm:$0xff] }
 0x186   : > { %v9916_v41 = vcombine.high %v1379_v34, %v1383_v35  ;;  %v1267_v42 = vld [vmem:[%s10696_s8 + $0x1b00] sm:$0xff]  ;;  %6673 = vmatprep.subr.bf16.mxu0 %v9812_v39  ;;  %v9915_v47 = vcombine.low %v1379_v34, %v1383_v35  ;;  %v436_v34 = vld [vmem:[%s10696_s8 + $0x108] sm:$0xff]  ;;  %v8981_v39 = vcombine.low %v444_v24, %v448_v25 }
 0x187   : > { %v1271_v43 = vld [vmem:[%s10696_s8 + $0x1b20] sm:$0xff]  ;;  %v440_v35 = vld [vmem:[%s10696_s8 + $0x128] sm:$0xff] }
 0x188   : > { %v1371_v44 = vld [vmem:[%s10696_s8 + $0x1e40] sm:$0xff]  ;;  %v9804_v49 = vcombine.high %v1267_v42, %v1271_v43  ;;  %6720 = vmatprep.subr.bf16.mxu1 %v9916_v41  ;;  %v9803_v56 = vcombine.low %v1267_v42, %v1271_v43  ;;  %v9126_v41 = vcombine.high %v588_v32, %v592_v33  ;;  %v8974_v42 = vcombine.high %v436_v34, %v440_v35  ;;  %v580_v43 = vld [vmem:[%s10696_s8 + $0x588] sm:$0xff] }
 0x189   : > { %v1375_v45 = vld [vmem:[%s10696_s8 + $0x1e60] sm:$0xff]  ;;  %6674 = vmatpush2.bf16.msra.mxu0 %v9811_v46  ;;  %6721 = vmatpush2.bf16.msra.mxu1 %v9915_v47  ;;  %v428_v46 = vld [vmem:[%s10696_s8 + $0xc8] sm:$0xff] }
 0x18a   : > { %v9908_v50 = vcombine.high %v1371_v44, %v1375_v45  ;;  %v1259_v52 = vld [vmem:[%s10696_s8 + $0x1ac0] sm:$0xff]  ;;  %6675 = vmatprep.subr.bf16.mxu0 %v9804_v49  ;;  %v9907_v57 = vcombine.low %v1371_v44, %v1375_v45  ;;  %v584_v44 = vld [vmem:[%s10696_s8 + $0x5a8] sm:$0xff]  ;;  %v9125_v49 = vcombine.low %v588_v32, %v592_v33 }
 0x18b   : > { %v1263_v53 = vld [vmem:[%s10696_s8 + $0x1ae0] sm:$0xff]  ;;  %v432_v47 = vld [vmem:[%s10696_s8 + $0xe8] sm:$0xff] }
 0x18c   : > { %v1363_v54 = vld [vmem:[%s10696_s8 + $0x1e00] sm:$0xff]  ;;  %v9796_v60 = vcombine.high %v1259_v52, %v1263_v53  ;;  %6722 = vmatprep.subr.bf16.mxu1 %v9908_v50  ;;  %v9795_v3 = vcombine.low %v1259_v52, %v1263_v53  ;;  %v8973_v50 = vcombine.low %v436_v34, %v440_v35  ;;  %v9118_v52 = vcombine.high %v580_v43, %v584_v44  ;;  %v416_v12 = vld [vmem:[%s10696_s8 + $0x68] sm:$0xff] }
 0x18d   : > { %v1367_v55 = vld [vmem:[%s10696_s8 + $0x1e20] sm:$0xff]  ;;  %6676 = vmatpush2.bf16.msra.mxu0 %v9803_v56  ;;  %6723 = vmatpush2.bf16.msra.mxu1 %v9907_v57  ;;  %v8966_v53 = vcombine.high %v428_v46, %v432_v47  ;;  %v420_v57 = vld [vmem:[%s10696_s8 + $0x88] sm:$0xff]  ;;  %v8965_v1 = vcombine.low %v428_v46, %v432_v47  ;;  %v8950_v24 = vcombine.high %v412_v11, %v416_v12 }
 0x18e   : > { %v9900_v61 = vcombine.high %v1363_v54, %v1367_v55  ;;  %v1251_v62 = vld [vmem:[%s10696_s8 + $0x1a80] sm:$0xff]  ;;  %6677 = vmatprep.subr.bf16.mxu0 %v9796_v60  ;;  %v9899_v4 = vcombine.low %v1363_v54, %v1367_v55  ;;  %v572_v54 = vld [vmem:[%s10696_s8 + $0x548] sm:$0xff]  ;;  %v8949_v32 = vcombine.low %v412_v11, %v416_v12 }
 0x18f   : > { %v1255_v63 = vld [vmem:[%s10696_s8 + $0x1aa0] sm:$0xff]  ;;  %v576_v55 = vld [vmem:[%s10696_s8 + $0x568] sm:$0xff] }
 0x190   : > { %v9788_v5 = vcombine.high %v1251_v62, %v1255_v63  ;;  %6724 = vmatprep.subr.bf16.mxu1 %v9900_v61  ;;  %v1243_v9 = vld [vmem:[%s10696_s8 + $0x1a40] sm:$0xff]  ;;  %v9787_v13 = vcombine.low %v1251_v62, %v1255_v63  ;;  %v424_v60 = vld [vmem:[%s10696_s8 + $0xa8] sm:$0xff]  ;;  %v9117_v62 = vcombine.low %v580_v43, %v584_v44 }
 0x191   : > { %v1247_v10 = vld [vmem:[%s10696_s8 + $0x1a60] sm:$0xff]  ;;  %6678 = vmatpush2.bf16.msra.mxu0 %v9795_v3  ;;  %6725 = vmatpush2.bf16.msra.mxu1 %v9899_v4  ;;  %v9110_v3 = vcombine.high %v572_v54, %v576_v55  ;;  %v556_v25 = vld [vmem:[%s10696_s8 + $0x4c8] sm:$0xff] }
 0x192   : > { %6679 = vmatprep.subr.bf16.mxu0 %v9788_v5  ;;  %v9780_v19 = vcombine.high %v1243_v9, %v1247_v10  ;;  %6735 = vmatprep.subr.bf16.mxu1 %v8998_v8  ;;  %v1235_v22 = vld [vmem:[%s10696_s8 + $0x1a00] sm:$0xff]  ;;  %v9779_v26 = vcombine.low %v1243_v9, %v1247_v10  ;;  %v8958_v5 = vcombine.high %v420_v57, %v424_v60  ;;  %v568_v8 = vld [vmem:[%s10696_s8 + $0x528] sm:$0xff] }
 0x193   : > { %v1239_v23 = vld [vmem:[%s10696_s8 + $0x1a20] sm:$0xff]  ;;  %v548_v35 = vld [vmem:[%s10696_s8 + $0x488] sm:$0xff] }
 0x194   : > { %6727 = vmatmul.mubr.bf16.vlgmr.msra.gmra.mxu1 %v11006_v15  ;;  %v9772_v29 = vcombine.high %v1235_v22, %v1239_v23  ;;  %v9771_v37 = vcombine.low %v1235_v22, %v1239_v23  ;;  %v383_v38 = vld [vmem:[#allocation2 + $0x60] sm:$0xff]  ;;  %v9102_v22 = vcombine.high %v564_v7, %v568_v8  ;;  %v540_v46 = vld [vmem:[%s10696_s8 + $0x448] sm:$0xff] }
 0x195   : > { %6680 = vmatpush2.bf16.msra.mxu0 %v9787_v13  ;;  %6736 = vmatpush1.bf16.msra.mxu1 %v8997_v17  ;;  %v11020_v45 = vpack.c.bf16 %v383_v38, %v383_v38  ;;  %v9109_v17 = vcombine.low %v572_v54, %v576_v55  ;;  %v524_v38 = vld [vmem:[%s10696_s8 + $0x3c8] sm:$0xff] }
 0x196   : > { %6681 = vmatprep.subr.bf16.mxu0 %v9780_v19  ;;  %6737 = vmatprep.subr.bf16.mxu1 %v8990_v21  ;;  %v8957_v21 = vcombine.low %v420_v57, %v424_v60  ;;  %v544_v47 = vld [vmem:[%s10696_s8 + $0x468] sm:$0xff] }
 0x197   : > { %6767 = vmatprep.mubr.bf16.mxu1 %v10741_v58  ;;  %v9078_v54 = vcombine.high %v540_v46, %v544_v47  ;;  %v536_v57 = vld [vmem:[%s10696_s8 + $0x428] sm:$0xff] }
 0x198   : > { %v508_v60 = vld [vmem:[%s10696_s8 + $0x348] sm:$0xff] }
 0x199   : > { %6682 = vmatpush2.bf16.msra.mxu0 %v9779_v26  ;;  %6738 = vmatpush1.bf16.msra.mxu1 %v8989_v27  ;;  %v560_v26 = vld [vmem:[%s10696_s8 + $0x4e8] sm:$0xff] }
 0x19a   : > { %6683 = vmatprep.subr.bf16.mxu0 %v9772_v29  ;;  %6739 = vmatprep.subr.bf16.mxu1 %v8982_v30  ;;  %v404_v27 = vld [vmem:[%s10696_s8 + $0x8] sm:$0xff]  ;;  %v9101_v30 = vcombine.low %v564_v7, %v568_v8  ;;  %v9094_v33 = vcombine.high %v556_v25, %v560_v26 }
 0x19b   : > { %v408_v29 = vld [vmem:[%s10696_s8 + $0x28] sm:$0xff] }
 0x19c   : > { %v8942_v34 = vcombine.high %v404_v27, %v408_v29  ;;  %v500_v7 = vld [vmem:[%s10696_s8 + $0x308] sm:$0xff] }
 0x19d   : > { %6684 = vmatpush2.bf16.msra.mxu0 %v9771_v37  ;;  %6740 = vmatpush1.bf16.msra.mxu1 %v8981_v39  ;;  %v6482_v61 = vpop.f32.mrf.mxu1  ;;  %v552_v37 = vld [vmem:[%s10696_s8 + $0x4a8] sm:$0xff] }
 0x19e   : > { %6776 = vmatprep.subr.bf16.mxu0 %v9126_v41  ;;  %6741 = vmatprep.subr.bf16.mxu1 %v8974_v42  ;;  %v6441_v56 = vpop.f32.mrf.mxu0  ;;  %v528_v39 = vld [vmem:[%s10696_s8 + $0x3e8] sm:$0xff]  ;;  %v9093_v41 = vcombine.low %v556_v25, %v560_v26  ;;  %v8941_v42 = vcombine.low %v404_v27, %v408_v29  ;;  %v9086_v43 = vcombine.high %v548_v35, %v552_v37 }
 0x19f   : > { %v11030_v63 = vadd.f32 %v6482_v61, %v6441_v56  ;;  %v6484_v4 = vpop.f32.mrf.mxu1  ;;  %v9062_v44 = vcombine.high %v524_v38, %v528_v39  ;;  %v532_v56 = vld [vmem:[%s10696_s8 + $0x408] sm:$0xff] }
 0x1a0   : > { %6686 = vmatmul.mubr.bf16.vlgmr.msra.gmra.mxu0 %v11020_v45  ;;  %v6443_v0 = vpop.f32.mrf.mxu0  ;;  %v512_v61 = vld [vmem:[%s10696_s8 + $0x368] sm:$0xff] }
 0x1a1   : > { %6777 = vmatpush1.bf16.msra.mxu0 %v9125_v49  ;;  %6808 = vmatprep.mubr.bf16.mxu0 %v10743_v59  ;;  %v11034_v9 = vadd.f32 %v6484_v4, %v6443_v0  ;;  %v6486_v13 = vpop.f32.mrf.mxu1  ;;  %v516_v49 = vld [vmem:[%s10696_s8 + $0x388] sm:$0xff]  ;;  %v9045_v11 = vcombine.low %v508_v60, %v512_v61 }
 0x1a2   : > { %6742 = vmatpush1.bf16.msra.mxu1 %v8973_v50  ;;  %6778 = vmatprep.subr.bf16.mxu0 %v9118_v52  ;;  %v6445_v10 = vpop.f32.mrf.mxu0  ;;  %v520_v50 = vld [vmem:[%s10696_s8 + $0x3a8] sm:$0xff]  ;;  %v9085_v52 = vcombine.low %v548_v35, %v552_v37 }
 0x1a3   : > { %6743 = vmatprep.subr.bf16.mxu1 %v8966_v53  ;;  %v6487_v23 = vpop.f32.mrf.mxu1  ;;  %v9061_v53 = vcombine.low %v524_v38, %v528_v39  ;;  %v9054_v55 = vcombine.high %v516_v49, %v520_v50  ;;  %v9053_v0 = vcombine.low %v516_v49, %v520_v50  ;;  %v652_v4 = vld [vmem:[%s10696_s8 + $0x7c8] sm:$0xff]  ;;  %v9069_v10 = vcombine.low %v532_v56, %v536_v57 }
 0x1a4   : > { %v6446_v19 = vpop.f32.mrf.mxu0  ;;  %v504_v8 = vld [vmem:[%s10696_s8 + $0x328] sm:$0xff] }
 0x1a5   : > { %6779 = vmatpush1.bf16.msra.mxu0 %v9117_v62  ;;  %v9077_v62 = vcombine.low %v540_v46, %v544_v47  ;;  %v9038_v13 = vcombine.high %v500_v7, %v504_v8  ;;  %v648_v19 = vld [vmem:[%s10696_s8 + $0x7a8] sm:$0xff] }
 0x1a6   : > { %6744 = vmatpush1.bf16.msra.mxu1 %v8965_v1  ;;  %6780 = vmatprep.subr.bf16.mxu0 %v9110_v3  ;;  %v9070_v1 = vcombine.high %v532_v56, %v536_v57  ;;  %v9046_v3 = vcombine.high %v508_v60, %v512_v61  ;;  %v636_v27 = vld [vmem:[%s10696_s8 + $0x748] sm:$0xff] }
 0x1a7   : > { %6745 = vmatprep.subr.bf16.mxu1 %v8958_v5  ;;  %v656_v5 = vld [vmem:[%s10696_s8 + $0x7e8] sm:$0xff] }
 0x1a8   : > { %v9190_v12 = vcombine.high %v652_v4, %v656_v5  ;;  %v9189_v23 = vcombine.low %v652_v4, %v656_v5  ;;  %v640_v29 = vld [vmem:[%s10696_s8 + $0x768] sm:$0xff] }
 0x1a9   : > { %6781 = vmatpush1.bf16.msra.mxu0 %v9109_v17  ;;  %v644_v17 = vld [vmem:[%s10696_s8 + $0x788] sm:$0xff]  ;;  %v9174_v35 = vcombine.high %v636_v27, %v640_v29 }
 0x1aa   : > { %6746 = vmatpush1.bf16.msra.mxu1 %v8957_v21  ;;  %6782 = vmatprep.subr.bf16.mxu0 %v9102_v22  ;;  %v492_v21 = vld [vmem:[%s10696_s8 + $0x2c8] sm:$0xff]  ;;  %v9182_v25 = vcombine.high %v644_v17, %v648_v19 }
 0x1ab   : > { %6747 = vmatprep.subr.bf16.mxu1 %v8950_v24  ;;  %v496_v22 = vld [vmem:[%s10696_s8 + $0x2e8] sm:$0xff]  ;;  %v9037_v24 = vcombine.low %v500_v7, %v504_v8 }
 0x1ac   : > { %v9030_v26 = vcombine.high %v492_v21, %v496_v22  ;;  %v628_v38 = vld [vmem:[%s10696_s8 + $0x708] sm:$0xff] }
 0x1ad   : > { %6783 = vmatpush1.bf16.msra.mxu0 %v9101_v30  ;;  %v484_v30 = vld [vmem:[%s10696_s8 + $0x288] sm:$0xff] }
 0x1ae   : > { %6748 = vmatpush1.bf16.msra.mxu1 %v8949_v32  ;;  %6784 = vmatprep.subr.bf16.mxu0 %v9094_v33  ;;  %v488_v32 = vld [vmem:[%s10696_s8 + $0x2a8] sm:$0xff]  ;;  %v9181_v33 = vcombine.low %v644_v17, %v648_v19 }
 0x1af   : > { %6749 = vmatprep.subr.bf16.mxu1 %v8942_v34  ;;  %v9029_v34 = vcombine.low %v492_v21, %v496_v22  ;;  %v9022_v37 = vcombine.high %v484_v30, %v488_v32  ;;  %v632_v39 = vld [vmem:[%s10696_s8 + $0x728] sm:$0xff] }
 0x1b0   : > { %v9166_v46 = vcombine.high %v628_v38, %v632_v39  ;;  %v620_v49 = vld [vmem:[%s10696_s8 + $0x6c8] sm:$0xff] }
 0x1b1   : > { %6785 = vmatpush1.bf16.msra.mxu0 %v9093_v41  ;;  %v476_v41 = vld [vmem:[%s10696_s8 + $0x248] sm:$0xff] }
 0x1b2   : > { %6750 = vmatpush1.bf16.msra.mxu1 %v8941_v42  ;;  %6786 = vmatprep.subr.bf16.mxu0 %v9086_v43  ;;  %v480_v42 = vld [vmem:[%s10696_s8 + $0x268] sm:$0xff]  ;;  %v9173_v43 = vcombine.low %v636_v27, %v640_v29 }
 0x1b3   : > { %6751 = vmatprep.subr.bf16.mxu1 %v9062_v44  ;;  %v9021_v44 = vcombine.low %v484_v30, %v488_v32  ;;  %v9014_v47 = vcombine.high %v476_v41, %v480_v42  ;;  %v624_v50 = vld [vmem:[%s10696_s8 + $0x6e8] sm:$0xff] }
 0x1b4   : > { %v9158_v56 = vcombine.high %v620_v49, %v624_v50  ;;  %v612_v60 = vld [vmem:[%s10696_s8 + $0x688] sm:$0xff] }
 0x1b5   : > { %6787 = vmatpush1.bf16.msra.mxu0 %v9085_v52  ;;  %v468_v52 = vld [vmem:[%s10696_s8 + $0x208] sm:$0xff] }
 0x1b6   : > { %6752 = vmatpush2.bf16.msra.mxu1 %v9061_v53  ;;  %6788 = vmatprep.subr.bf16.mxu0 %v9078_v54  ;;  %v472_v53 = vld [vmem:[%s10696_s8 + $0x228] sm:$0xff]  ;;  %v9165_v54 = vcombine.low %v628_v38, %v632_v39 }
 0x1b7   : > { %6753 = vmatprep.subr.bf16.mxu1 %v9054_v55  ;;  %v9013_v55 = vcombine.low %v476_v41, %v480_v42  ;;  %v9006_v57 = vcombine.high %v468_v52, %v472_v53  ;;  %v616_v61 = vld [vmem:[%s10696_s8 + $0x6a8] sm:$0xff] }
 0x1b8   : > { %v9150_v4 = vcombine.high %v612_v60, %v616_v61  ;;  %v604_v7 = vld [vmem:[%s10696_s8 + $0x648] sm:$0xff] }
 0x1b9   : > { %6789 = vmatpush1.bf16.msra.mxu0 %v9077_v62  ;;  %v716_v62 = vld [vmem:[%s10696_s8 + $0x9c8] sm:$0xff] }
 0x1ba   : > { %6754 = vmatpush2.bf16.msra.mxu1 %v9053_v0  ;;  %6790 = vmatprep.subr.bf16.mxu0 %v9070_v1  ;;  %v720_v0 = vld [vmem:[%s10696_s8 + $0x9e8] sm:$0xff]  ;;  %v9157_v1 = vcombine.low %v620_v49, %v624_v50 }
 0x1bb   : > { %6755 = vmatprep.subr.bf16.mxu1 %v9046_v3  ;;  %v9005_v3 = vcombine.low %v468_v52, %v472_v53  ;;  %v9254_v5 = vcombine.high %v716_v62, %v720_v0  ;;  %v608_v8 = vld [vmem:[%s10696_s8 + $0x668] sm:$0xff] }
 0x1bc   : > { %v9142_v17 = vcombine.high %v604_v7, %v608_v8  ;;  %v596_v21 = vld [vmem:[%s10696_s8 + $0x608] sm:$0xff] }
 0x1bd   : > { %6791 = vmatpush1.bf16.msra.mxu0 %v9069_v10  ;;  %v708_v10 = vld [vmem:[%s10696_s8 + $0x988] sm:$0xff] }
 0x1be   : > { %6756 = vmatpush2.bf16.msra.mxu1 %v9045_v11  ;;  %6792 = vmatprep.subr.bf16.mxu0 %v9190_v12  ;;  %v712_v11 = vld [vmem:[%s10696_s8 + $0x9a8] sm:$0xff]  ;;  %v9149_v12 = vcombine.low %v612_v60, %v616_v61 }
 0x1bf   : > { %6757 = vmatprep.subr.bf16.mxu1 %v9038_v13  ;;  %v9253_v13 = vcombine.low %v716_v62, %v720_v0  ;;  %v9246_v19 = vcombine.high %v708_v10, %v712_v11  ;;  %v600_v22 = vld [vmem:[%s10696_s8 + $0x628] sm:$0xff] }
 0x1c0   : > { %v9134_v27 = vcombine.high %v596_v21, %v600_v22  ;;  %v844_v30 = vld [vmem:[%s10696_s8 + $0xdc8] sm:$0xff] }
 0x1c1   : > { %6793 = vmatpush2.bf16.msra.mxu0 %v9189_v23  ;;  %v700_v23 = vld [vmem:[%s10696_s8 + $0x948] sm:$0xff] }
 0x1c2   : > { %6758 = vmatpush2.bf16.msra.mxu1 %v9037_v24  ;;  %6794 = vmatprep.subr.bf16.mxu0 %v9182_v25  ;;  %v704_v24 = vld [vmem:[%s10696_s8 + $0x968] sm:$0xff]  ;;  %v9141_v25 = vcombine.low %v604_v7, %v608_v8 }
 0x1c3   : > { %6759 = vmatprep.subr.bf16.mxu1 %v9030_v26  ;;  %v9245_v26 = vcombine.low %v708_v10, %v712_v11  ;;  %v9238_v29 = vcombine.high %v700_v23, %v704_v24  ;;  %v848_v32 = vld [vmem:[%s10696_s8 + $0xde8] sm:$0xff] }
 0x1c4   : > { %v9382_v38 = vcombine.high %v844_v30, %v848_v32  ;;  %v836_v41 = vld [vmem:[%s10696_s8 + $0xd88] sm:$0xff] }
 0x1c5   : > { %6795 = vmatpush2.bf16.msra.mxu0 %v9181_v33  ;;  %v692_v33 = vld [vmem:[%s10696_s8 + $0x908] sm:$0xff] }
 0x1c6   : > { %6760 = vmatpush2.bf16.msra.mxu1 %v9029_v34  ;;  %6796 = vmatprep.subr.bf16.mxu0 %v9174_v35  ;;  %v696_v34 = vld [vmem:[%s10696_s8 + $0x928] sm:$0xff]  ;;  %v9133_v35 = vcombine.low %v596_v21, %v600_v22 }
 0x1c7   : > { %6761 = vmatprep.subr.bf16.mxu1 %v9022_v37  ;;  %v9237_v37 = vcombine.low %v700_v23, %v704_v24  ;;  %v9230_v39 = vcombine.high %v692_v33, %v696_v34  ;;  %v840_v42 = vld [vmem:[%s10696_s8 + $0xda8] sm:$0xff] }
 0x1c8   : > { %v9374_v49 = vcombine.high %v836_v41, %v840_v42  ;;  %v828_v52 = vld [vmem:[%s10696_s8 + $0xd48] sm:$0xff]  ;;  %v9373_v61 = vcombine.low %v836_v41, %v840_v42 }
 0x1c9   : > { %6797 = vmatpush2.bf16.msra.mxu0 %v9173_v43  ;;  %v684_v43 = vld [vmem:[%s10696_s8 + $0x8c8] sm:$0xff] }
 0x1ca   : > { %6762 = vmatpush2.bf16.msra.mxu1 %v9021_v44  ;;  %6798 = vmatprep.subr.bf16.mxu0 %v9166_v46  ;;  %v688_v44 = vld [vmem:[%s10696_s8 + $0x8e8] sm:$0xff]  ;;  %v9381_v46 = vcombine.low %v844_v30, %v848_v32 }
 0x1cb   : > { %6763 = vmatprep.subr.bf16.mxu1 %v9014_v47  ;;  %v9229_v47 = vcombine.low %v692_v33, %v696_v34  ;;  %v9222_v50 = vcombine.high %v684_v43, %v688_v44  ;;  %v832_v53 = vld [vmem:[%s10696_s8 + $0xd68] sm:$0xff]  ;;  %v9221_v0 = vcombine.low %v684_v43, %v688_v44 }
 0x1cc   : > { %v820_v7 = vld [vmem:[%s10696_s8 + $0xd08] sm:$0xff] }
 0x1cd   : > { %6799 = vmatpush2.bf16.msra.mxu0 %v9165_v54  ;;  %v824_v8 = vld [vmem:[%s10696_s8 + $0xd28] sm:$0xff] }
 0x1ce   : > { %6764 = vmatpush2.bf16.msra.mxu1 %v9013_v55  ;;  %6800 = vmatprep.subr.bf16.mxu0 %v9158_v56  ;;  %v676_v55 = vld [vmem:[%s10696_s8 + $0x888] sm:$0xff]  ;;  %v9358_v22 = vcombine.high %v820_v7, %v824_v8  ;;  %v9357_v30 = vcombine.low %v820_v7, %v824_v8 }
 0x1cf   : > { %6765 = vmatprep.subr.bf16.mxu1 %v9006_v57  ;;  %v680_v56 = vld [vmem:[%s10696_s8 + $0x8a8] sm:$0xff] }
 0x1d0   : > { %v668_v11 = vld [vmem:[%s10696_s8 + $0x848] sm:$0xff] }
 0x1d1   : > { %6801 = vmatpush2.bf16.msra.mxu0 %v9157_v1  ;;  %v9366_v1 = vcombine.high %v828_v52, %v832_v53  ;;  %v756_v7 = vld [vmem:[%s10696_s8 + $0xb08] sm:$0xff] }
 0x1d2   : > { %6766 = vmatpush2.bf16.msra.mxu1 %v9005_v3  ;;  %6802 = vmatprep.subr.bf16.mxu0 %v9150_v4  ;;  %v760_v8 = vld [vmem:[%s10696_s8 + $0xb28] sm:$0xff] }
 0x1d3   : > { %6817 = vmatprep.subr.bf16.mxu1 %v9254_v5 }
 0x1d5   : > { %6768 = vmatmul.mubr.bf16.vlgmr.msra.gmra.mxu1 %v10787_v16  ;;  %6803 = vmatpush2.bf16.msra.mxu0 %v9149_v12  ;;  %v672_v12 = vld [vmem:[%s10696_s8 + $0x868] sm:$0xff] }
 0x1d6   : > { %6818 = vmatpush1.bf16.msra.mxu1 %v9253_v13  ;;  %6804 = vmatprep.subr.bf16.mxu0 %v9142_v17  ;;  %v9206_v24 = vcombine.high %v668_v11, %v672_v12  ;;  %v9205_v32 = vcombine.low %v668_v11, %v672_v12 }
 0x1d7   : > { %6819 = vmatprep.subr.bf16.mxu1 %v9246_v19  ;;  %6849 = vmatprep.mubr.bf16.mxu1 %v10795_v28  ;;  %v9365_v19 = vcombine.low %v828_v52, %v832_v53 }
 0x1d9   : > { %6805 = vmatpush2.bf16.msra.mxu0 %v9141_v25  ;;  %v812_v25 = vld [vmem:[%s10696_s8 + $0xcc8] sm:$0xff] }
 0x1da   : > { %6820 = vmatpush1.bf16.msra.mxu1 %v9245_v26  ;;  %6806 = vmatprep.subr.bf16.mxu0 %v9134_v27  ;;  %v816_v26 = vld [vmem:[%s10696_s8 + $0xce8] sm:$0xff] }
 0x1db   : > { %6821 = vmatprep.subr.bf16.mxu1 %v9238_v29  ;;  %v660_v27 = vld [vmem:[%s10696_s8 + $0x808] sm:$0xff]  ;;  %v9350_v33 = vcombine.high %v812_v25, %v816_v26  ;;  %v9349_v41 = vcombine.low %v812_v25, %v816_v26 }
 0x1dc   : > { %v664_v29 = vld [vmem:[%s10696_s8 + $0x828] sm:$0xff] }
 0x1dd   : > { %6807 = vmatpush2.bf16.msra.mxu0 %v9133_v35  ;;  %v9198_v34 = vcombine.high %v660_v27, %v664_v29  ;;  %v804_v35 = vld [vmem:[%s10696_s8 + $0xc88] sm:$0xff]  ;;  %v9197_v42 = vcombine.low %v660_v27, %v664_v29 }
 0x1de   : > { %6822 = vmatpush1.bf16.msra.mxu1 %v9237_v37  ;;  %6858 = vmatprep.subr.bf16.mxu0 %v9382_v38  ;;  %v6564_v60 = vpop.f32.mrf.mxu1  ;;  %v808_v37 = vld [vmem:[%s10696_s8 + $0xca8] sm:$0xff] }
 0x1df   : > { %6823 = vmatprep.subr.bf16.mxu1 %v9230_v39  ;;  %v6523_v54 = vpop.f32.mrf.mxu0  ;;  %v780_v38 = vld [vmem:[%s10696_s8 + $0xbc8] sm:$0xff]  ;;  %v9342_v43 = vcombine.high %v804_v35, %v808_v37  ;;  %v9341_v52 = vcombine.low %v804_v35, %v808_v37 }
 0x1e0   : > { %6809 = vmatmul.mubr.bf16.vlgmr.msra.gmra.mxu0 %v10791_v20  ;;  %v6524_v57 = vadd.f32 %v6523_v54, %v11030_v63  ;;  %v6566_v5 = vpop.f32.mrf.mxu1  ;;  %v9214_v63 = vcombine.high %v676_v55, %v680_v56  ;;  %v784_v39 = vld [vmem:[%s10696_s8 + $0xbe8] sm:$0xff] }
 0x1e1   : > { %6859 = vmatpush1.bf16.msra.mxu0 %v9381_v46  ;;  %6890 = vmatprep.mubr.bf16.mxu0 %v10800_v31  ;;  %v6525_v62 = vpop.f32.mrf.mxu0  ;;  %v9318_v44 = vcombine.high %v780_v38, %v784_v39  ;;  %v796_v46 = vld [vmem:[%s10696_s8 + $0xc48] sm:$0xff]  ;;  %v9317_v53 = vcombine.low %v780_v38, %v784_v39 }
 0x1e2   : > { %6824 = vmatpush1.bf16.msra.mxu1 %v9229_v47  ;;  %6860 = vmatprep.subr.bf16.mxu0 %v9374_v49  ;;  %v11103_v3 = vadd.f32 %v6564_v60, %v6524_v57  ;;  %v6526_v4 = vadd.f32 %v6525_v62, %v11034_v9  ;;  %v6568_v17 = vpop.f32.mrf.mxu1  ;;  %v9213_v9 = vcombine.low %v676_v55, %v680_v56  ;;  %v800_v47 = vld [vmem:[%s10696_s8 + $0xc68] sm:$0xff] }
 0x1e3   : > { %6825 = vmatprep.subr.bf16.mxu1 %v9222_v50  ;;  %v6527_v10 = vpop.f32.mrf.mxu0  ;;  %v772_v49 = vld [vmem:[%s10696_s8 + $0xb88] sm:$0xff]  ;;  %v9334_v54 = vcombine.high %v796_v46, %v800_v47  ;;  %v9333_v62 = vcombine.low %v796_v46, %v800_v47  ;;  %v9294_v17 = vcombine.high %v756_v7, %v760_v8 }
 0x1e4   : > { %v11110_v13 = vadd.f32 %v6566_v5, %v6526_v4  ;;  %v6569_v23 = vpop.f32.mrf.mxu1  ;;  %v776_v50 = vld [vmem:[%s10696_s8 + $0xba8] sm:$0xff] }
 0x1e5   : > { %6861 = vmatpush1.bf16.msra.mxu0 %v9373_v61  ;;  %v6528_v21 = vpop.f32.mrf.mxu0  ;;  %v9310_v55 = vcombine.high %v772_v49, %v776_v50  ;;  %v788_v56 = vld [vmem:[%s10696_s8 + $0xc08] sm:$0xff] }
 0x1e6   : > { %6826 = vmatpush1.bf16.msra.mxu1 %v9221_v0  ;;  %6862 = vmatprep.subr.bf16.mxu0 %v9366_v1  ;;  %v792_v57 = vld [vmem:[%s10696_s8 + $0xc28] sm:$0xff]  ;;  %v9309_v0 = vcombine.low %v772_v49, %v776_v50 }
 0x1e7   : > { %6827 = vmatprep.subr.bf16.mxu1 %v9214_v63  ;;  %v764_v60 = vld [vmem:[%s10696_s8 + $0xb48] sm:$0xff]  ;;  %v9326_v1 = vcombine.high %v788_v56, %v792_v57  ;;  %v9325_v10 = vcombine.low %v788_v56, %v792_v57 }
 0x1e8   : > { %v768_v61 = vld [vmem:[%s10696_s8 + $0xb68] sm:$0xff] }
 0x1e9   : > { %6863 = vmatpush1.bf16.msra.mxu0 %v9365_v19  ;;  %v9302_v4 = vcombine.high %v764_v60, %v768_v61  ;;  %v908_v5 = vld [vmem:[%s10696_s8 + $0xfc8] sm:$0xff]  ;;  %v9301_v11 = vcombine.low %v764_v60, %v768_v61 }
 0x1ea   : > { %6828 = vmatpush1.bf16.msra.mxu1 %v9213_v9  ;;  %6864 = vmatprep.subr.bf16.mxu0 %v9358_v22  ;;  %v912_v63 = vld [vmem:[%s10696_s8 + $0xfe8] sm:$0xff] }
 0x1eb   : > { %6829 = vmatprep.subr.bf16.mxu1 %v9206_v24  ;;  %v9446_v12 = vcombine.high %v908_v5, %v912_v63  ;;  %v900_v19 = vld [vmem:[%s10696_s8 + $0xf88] sm:$0xff]  ;;  %v9445_v23 = vcombine.low %v908_v5, %v912_v63  ;;  %v9293_v24 = vcombine.low %v756_v7, %v760_v8 }
 0x1ec   : > { %v904_v21 = vld [vmem:[%s10696_s8 + $0xfa8] sm:$0xff] }
 0x1ed   : > { %6865 = vmatpush1.bf16.msra.mxu0 %v9357_v30  ;;  %v748_v9 = vld [vmem:[%s10696_s8 + $0xac8] sm:$0xff]  ;;  %v9438_v25 = vcombine.high %v900_v19, %v904_v21 }
 0x1ee   : > { %6830 = vmatpush1.bf16.msra.mxu1 %v9205_v32  ;;  %6866 = vmatprep.subr.bf16.mxu0 %v9350_v33  ;;  %v752_v22 = vld [vmem:[%s10696_s8 + $0xae8] sm:$0xff]  ;;  %v9437_v33 = vcombine.low %v900_v19, %v904_v21 }
 0x1ef   : > { %6831 = vmatprep.subr.bf16.mxu1 %v9198_v34  ;;  %v9286_v26 = vcombine.high %v748_v9, %v752_v22  ;;  %v892_v27 = vld [vmem:[%s10696_s8 + $0xf48] sm:$0xff]  ;;  %v9285_v34 = vcombine.low %v748_v9, %v752_v22 }
 0x1f0   : > { %v896_v29 = vld [vmem:[%s10696_s8 + $0xf68] sm:$0xff] }
 0x1f1   : > { %6867 = vmatpush1.bf16.msra.mxu0 %v9349_v41  ;;  %v740_v30 = vld [vmem:[%s10696_s8 + $0xa88] sm:$0xff]  ;;  %v9430_v35 = vcombine.high %v892_v27, %v896_v29 }
 0x1f2   : > { %6832 = vmatpush1.bf16.msra.mxu1 %v9197_v42  ;;  %6868 = vmatprep.subr.bf16.mxu0 %v9342_v43  ;;  %v744_v32 = vld [vmem:[%s10696_s8 + $0xaa8] sm:$0xff]  ;;  %v9429_v43 = vcombine.low %v892_v27, %v896_v29 }
 0x1f3   : > { %6833 = vmatprep.subr.bf16.mxu1 %v9318_v44  ;;  %v9278_v37 = vcombine.high %v740_v30, %v744_v32  ;;  %v884_v38 = vld [vmem:[%s10696_s8 + $0xf08] sm:$0xff]  ;;  %v9277_v44 = vcombine.low %v740_v30, %v744_v32 }
 0x1f4   : > { %v888_v39 = vld [vmem:[%s10696_s8 + $0xf28] sm:$0xff] }
 0x1f5   : > { %6869 = vmatpush1.bf16.msra.mxu0 %v9341_v52  ;;  %v732_v41 = vld [vmem:[%s10696_s8 + $0xa48] sm:$0xff]  ;;  %v9422_v46 = vcombine.high %v884_v38, %v888_v39 }
 0x1f6   : > { %6834 = vmatpush2.bf16.msra.mxu1 %v9317_v53  ;;  %6870 = vmatprep.subr.bf16.mxu0 %v9334_v54  ;;  %v736_v42 = vld [vmem:[%s10696_s8 + $0xa68] sm:$0xff]  ;;  %v9421_v54 = vcombine.low %v884_v38, %v888_v39 }
 0x1f7   : > { %6835 = vmatprep.subr.bf16.mxu1 %v9310_v55  ;;  %v9270_v47 = vcombine.high %v732_v41, %v736_v42  ;;  %v876_v49 = vld [vmem:[%s10696_s8 + $0xec8] sm:$0xff]  ;;  %v9269_v55 = vcombine.low %v732_v41, %v736_v42 }
 0x1f8   : > { %v880_v50 = vld [vmem:[%s10696_s8 + $0xee8] sm:$0xff] }
 0x1f9   : > { %6871 = vmatpush1.bf16.msra.mxu0 %v9333_v62  ;;  %v724_v52 = vld [vmem:[%s10696_s8 + $0xa08] sm:$0xff]  ;;  %v9414_v56 = vcombine.high %v876_v49, %v880_v50 }
 0x1fa   : > { %6836 = vmatpush2.bf16.msra.mxu1 %v9309_v0  ;;  %6872 = vmatprep.subr.bf16.mxu0 %v9326_v1  ;;  %v728_v53 = vld [vmem:[%s10696_s8 + $0xa28] sm:$0xff]  ;;  %v9413_v1 = vcombine.low %v876_v49, %v880_v50 }
 0x1fb   : > { %6837 = vmatprep.subr.bf16.mxu1 %v9302_v4  ;;  %v9262_v57 = vcombine.high %v724_v52, %v728_v53  ;;  %v868_v60 = vld [vmem:[%s10696_s8 + $0xe88] sm:$0xff]  ;;  %v9261_v4 = vcombine.low %v724_v52, %v728_v53 }
 0x1fc   : > { %v872_v61 = vld [vmem:[%s10696_s8 + $0xea8] sm:$0xff] }
 0x1fd   : > { %6873 = vmatpush1.bf16.msra.mxu0 %v9325_v10  ;;  %v972_v62 = vld [vmem:[%s10696_s8 + $0x11c8] sm:$0xff]  ;;  %v9406_v5 = vcombine.high %v868_v60, %v872_v61 }
 0x1fe   : > { %6838 = vmatpush2.bf16.msra.mxu1 %v9301_v11  ;;  %6874 = vmatprep.subr.bf16.mxu0 %v9446_v12  ;;  %v976_v0 = vld [vmem:[%s10696_s8 + $0x11e8] sm:$0xff]  ;;  %v9405_v12 = vcombine.low %v868_v60, %v872_v61 }
 0x1ff   : > { %6839 = vmatprep.subr.bf16.mxu1 %v9294_v17  ;;  %v9510_v63 = vcombine.high %v972_v62, %v976_v0  ;;  %v860_v7 = vld [vmem:[%s10696_s8 + $0xe48] sm:$0xff]  ;;  %v9509_v17 = vcombine.low %v972_v62, %v976_v0 }
 0x200   : > { %v864_v8 = vld [vmem:[%s10696_s8 + $0xe68] sm:$0xff] }
 0x201   : > { %6875 = vmatpush2.bf16.msra.mxu0 %v9445_v23  ;;  %v964_v10 = vld [vmem:[%s10696_s8 + $0x1188] sm:$0xff]  ;;  %v9398_v19 = vcombine.high %v860_v7, %v864_v8 }
 0x202   : > { %6840 = vmatpush2.bf16.msra.mxu1 %v9293_v24  ;;  %6876 = vmatprep.subr.bf16.mxu0 %v9438_v25  ;;  %v968_v11 = vld [vmem:[%s10696_s8 + $0x11a8] sm:$0xff]  ;;  %v9397_v25 = vcombine.low %v860_v7, %v864_v8 }
 0x203   : > { %6841 = vmatprep.subr.bf16.mxu1 %v9286_v26  ;;  %v9502_v21 = vcombine.high %v964_v10, %v968_v11  ;;  %v852_v9 = vld [vmem:[%s10696_s8 + $0xe08] sm:$0xff]  ;;  %v9501_v26 = vcombine.low %v964_v10, %v968_v11 }
 0x204   : > { %v856_v22 = vld [vmem:[%s10696_s8 + $0xe28] sm:$0xff] }
 0x205   : > { %6877 = vmatpush2.bf16.msra.mxu0 %v9437_v33  ;;  %v956_v23 = vld [vmem:[%s10696_s8 + $0x1148] sm:$0xff]  ;;  %v9390_v27 = vcombine.high %v852_v9, %v856_v22 }
 0x206   : > { %6842 = vmatpush2.bf16.msra.mxu1 %v9285_v34  ;;  %6878 = vmatprep.subr.bf16.mxu0 %v9430_v35  ;;  %v960_v24 = vld [vmem:[%s10696_s8 + $0x1168] sm:$0xff]  ;;  %v9389_v35 = vcombine.low %v852_v9, %v856_v22 }
 0x207   : > { %6843 = vmatprep.subr.bf16.mxu1 %v9278_v37  ;;  %v9494_v29 = vcombine.high %v956_v23, %v960_v24  ;;  %v1100_v30 = vld [vmem:[%s10696_s8 + $0x15c8] sm:$0xff]  ;;  %v9493_v37 = vcombine.low %v956_v23, %v960_v24 }
 0x208   : > { %v1104_v32 = vld [vmem:[%s10696_s8 + $0x15e8] sm:$0xff] }
 0x209   : > { %6879 = vmatpush2.bf16.msra.mxu0 %v9429_v43  ;;  %v948_v33 = vld [vmem:[%s10696_s8 + $0x1108] sm:$0xff]  ;;  %v9638_v38 = vcombine.high %v1100_v30, %v1104_v32 }
 0x20a   : > { %6844 = vmatpush2.bf16.msra.mxu1 %v9277_v44  ;;  %6880 = vmatprep.subr.bf16.mxu0 %v9422_v46  ;;  %v952_v34 = vld [vmem:[%s10696_s8 + $0x1128] sm:$0xff]  ;;  %v9637_v46 = vcombine.low %v1100_v30, %v1104_v32 }
 0x20b   : > { %6845 = vmatprep.subr.bf16.mxu1 %v9270_v47  ;;  %v9486_v39 = vcombine.high %v948_v33, %v952_v34  ;;  %v1092_v41 = vld [vmem:[%s10696_s8 + $0x1588] sm:$0xff]  ;;  %v9485_v47 = vcombine.low %v948_v33, %v952_v34 }
 0x20c   : > { %v1096_v42 = vld [vmem:[%s10696_s8 + $0x15a8] sm:$0xff] }
 0x20d   : > { %6881 = vmatpush2.bf16.msra.mxu0 %v9421_v54  ;;  %v940_v43 = vld [vmem:[%s10696_s8 + $0x10c8] sm:$0xff]  ;;  %v9630_v49 = vcombine.high %v1092_v41, %v1096_v42  ;;  %v9629_v61 = vcombine.low %v1092_v41, %v1096_v42 }
 0x20e   : > { %6846 = vmatpush2.bf16.msra.mxu1 %v9269_v55  ;;  %6882 = vmatprep.subr.bf16.mxu0 %v9414_v56  ;;  %v944_v44 = vld [vmem:[%s10696_s8 + $0x10e8] sm:$0xff] }
 0x20f   : > { %6847 = vmatprep.subr.bf16.mxu1 %v9262_v57  ;;  %v9478_v50 = vcombine.high %v940_v43, %v944_v44  ;;  %v1084_v52 = vld [vmem:[%s10696_s8 + $0x1548] sm:$0xff]  ;;  %v9477_v0 = vcombine.low %v940_v43, %v944_v44 }
 0x210   : > { %v1088_v53 = vld [vmem:[%s10696_s8 + $0x1568] sm:$0xff] }
 0x211   : > { %6883 = vmatpush2.bf16.msra.mxu0 %v9413_v1  ;;  %v932_v55 = vld [vmem:[%s10696_s8 + $0x1088] sm:$0xff]  ;;  %v9622_v1 = vcombine.high %v1084_v52, %v1088_v53 }
 0x212   : > { %6848 = vmatpush2.bf16.msra.mxu1 %v9261_v4  ;;  %6884 = vmatprep.subr.bf16.mxu0 %v9406_v5  ;;  %v936_v56 = vld [vmem:[%s10696_s8 + $0x10a8] sm:$0xff] }
 0x213   : > { %6899 = vmatprep.subr.bf16.mxu1 %v9510_v63  ;;  %v1076_v7 = vld [vmem:[%s10696_s8 + $0x1508] sm:$0xff] }
 0x214   : > { %v1080_v8 = vld [vmem:[%s10696_s8 + $0x1528] sm:$0xff] }
 0x215   : > { %6850 = vmatmul.mubr.bf16.vlgmr.msra.gmra.mxu1 %v10863_v36  ;;  %6885 = vmatpush2.bf16.msra.mxu0 %v9405_v12  ;;  %v924_v11 = vld [vmem:[%s10696_s8 + $0x1048] sm:$0xff]  ;;  %v9614_v22 = vcombine.high %v1076_v7, %v1080_v8  ;;  %v9613_v30 = vcombine.low %v1076_v7, %v1080_v8 }
 0x216   : > { %6900 = vmatpush1.bf16.msra.mxu1 %v9509_v17  ;;  %6886 = vmatprep.subr.bf16.mxu0 %v9398_v19  ;;  %v928_v12 = vld [vmem:[%s10696_s8 + $0x1068] sm:$0xff] }
 0x217   : > { %6901 = vmatprep.subr.bf16.mxu1 %v9502_v21  ;;  %6931 = vmatprep.mubr.bf16.mxu1 %v10871_v48  ;;  %v9621_v21 = vcombine.low %v1084_v52, %v1088_v53  ;;  %v9462_v24 = vcombine.high %v924_v11, %v928_v12  ;;  %v9461_v32 = vcombine.low %v924_v11, %v928_v12  ;;  %v1012_v7 = vld [vmem:[%s10696_s8 + $0x1308] sm:$0xff] }
 0x218   : > { %v1016_v8 = vld [vmem:[%s10696_s8 + $0x1328] sm:$0xff] }
 0x219   : > { %6887 = vmatpush2.bf16.msra.mxu0 %v9397_v25  ;;  %v1068_v25 = vld [vmem:[%s10696_s8 + $0x14c8] sm:$0xff] }
 0x21a   : > { %6902 = vmatpush1.bf16.msra.mxu1 %v9501_v26  ;;  %6888 = vmatprep.subr.bf16.mxu0 %v9390_v27  ;;  %v1072_v26 = vld [vmem:[%s10696_s8 + $0x14e8] sm:$0xff] }
 0x21b   : > { %6903 = vmatprep.subr.bf16.mxu1 %v9494_v29  ;;  %v916_v27 = vld [vmem:[%s10696_s8 + $0x1008] sm:$0xff]  ;;  %v9606_v33 = vcombine.high %v1068_v25, %v1072_v26  ;;  %v9605_v41 = vcombine.low %v1068_v25, %v1072_v26 }
 0x21c   : > { %v920_v29 = vld [vmem:[%s10696_s8 + $0x1028] sm:$0xff] }
 0x21d   : > { %6889 = vmatpush2.bf16.msra.mxu0 %v9389_v35  ;;  %v9454_v34 = vcombine.high %v916_v27, %v920_v29  ;;  %v1060_v35 = vld [vmem:[%s10696_s8 + $0x1488] sm:$0xff]  ;;  %v9453_v42 = vcombine.low %v916_v27, %v920_v29 }
 0x21e   : > { %6904 = vmatpush1.bf16.msra.mxu1 %v9493_v37  ;;  %6940 = vmatprep.subr.bf16.mxu0 %v9638_v38  ;;  %v1064_v37 = vld [vmem:[%s10696_s8 + $0x14a8] sm:$0xff] }
 0x21f   : > { %6905 = vmatprep.subr.bf16.mxu1 %v9486_v39  ;;  %v6646_v60 = vpop.f32.mrf.mxu1  ;;  %v1036_v38 = vld [vmem:[%s10696_s8 + $0x13c8] sm:$0xff]  ;;  %v9598_v43 = vcombine.high %v1060_v35, %v1064_v37  ;;  %v9597_v52 = vcombine.low %v1060_v35, %v1064_v37 }
 0x220   : > { %v6605_v54 = vpop.f32.mrf.mxu0  ;;  %6891 = vmatmul.mubr.bf16.vlgmr.msra.gmra.mxu0 %v10867_v40  ;;  %v1040_v39 = vld [vmem:[%s10696_s8 + $0x13e8] sm:$0xff] }
 0x221   : > { %v6606_v57 = vadd.f32 %v6605_v54, %v11103_v3  ;;  %6941 = vmatpush1.bf16.msra.mxu0 %v9637_v46  ;;  %6972 = vmatprep.mubr.bf16.mxu0 %v10876_v51  ;;  %v6648_v63 = vpop.f32.mrf.mxu1  ;;  %v9470_v3 = vcombine.high %v932_v55, %v936_v56  ;;  %v9574_v44 = vcombine.high %v1036_v38, %v1040_v39  ;;  %v1052_v46 = vld [vmem:[%s10696_s8 + $0x1448] sm:$0xff] }
 0x222   : > { %6906 = vmatpush1.bf16.msra.mxu1 %v9485_v47  ;;  %v6607_v62 = vpop.f32.mrf.mxu0  ;;  %6942 = vmatprep.subr.bf16.mxu0 %v9630_v49  ;;  %v1056_v47 = vld [vmem:[%s10696_s8 + $0x1468] sm:$0xff]  ;;  %v9573_v53 = vcombine.low %v1036_v38, %v1040_v39 }
 0x223   : > { %v11177_v4 = vadd.f32 %v6646_v60, %v6606_v57  ;;  %v6608_v5 = vadd.f32 %v6607_v62, %v11110_v13  ;;  %6907 = vmatprep.subr.bf16.mxu1 %v9478_v50  ;;  %v6650_v19 = vpop.f32.mrf.mxu1  ;;  %v9469_v13 = vcombine.low %v932_v55, %v936_v56  ;;  %v1028_v49 = vld [vmem:[%s10696_s8 + $0x1388] sm:$0xff]  ;;  %v9590_v54 = vcombine.high %v1052_v46, %v1056_v47 }
 0x224   : > { %v6609_v10 = vpop.f32.mrf.mxu0  ;;  %v1032_v50 = vld [vmem:[%s10696_s8 + $0x13a8] sm:$0xff]  ;;  %v9589_v62 = vcombine.low %v1052_v46, %v1056_v47  ;;  %v9550_v19 = vcombine.high %v1012_v7, %v1016_v8 }
 0x225   : > { %v11184_v17 = vadd.f32 %v6648_v63, %v6608_v5  ;;  %6943 = vmatpush1.bf16.msra.mxu0 %v9629_v61  ;;  %v6651_v23 = vpop.f32.mrf.mxu1  ;;  %v9566_v55 = vcombine.high %v1028_v49, %v1032_v50  ;;  %v1044_v56 = vld [vmem:[%s10696_s8 + $0x1408] sm:$0xff] }
 0x226   : > { %6908 = vmatpush1.bf16.msra.mxu1 %v9477_v0  ;;  %v6610_v9 = vpop.f32.mrf.mxu0  ;;  %6944 = vmatprep.subr.bf16.mxu0 %v9622_v1  ;;  %v1048_v57 = vld [vmem:[%s10696_s8 + $0x1428] sm:$0xff]  ;;  %v9565_v0 = vcombine.low %v1028_v49, %v1032_v50 }
 0x227   : > { %6909 = vmatprep.subr.bf16.mxu1 %v9470_v3  ;;  %v1020_v60 = vld [vmem:[%s10696_s8 + $0x1348] sm:$0xff]  ;;  %v9582_v1 = vcombine.high %v1044_v56, %v1048_v57  ;;  %v9581_v10 = vcombine.low %v1044_v56, %v1048_v57 }
 0x228   : > { %v1024_v61 = vld [vmem:[%s10696_s8 + $0x1368] sm:$0xff] }
 0x229   : > { %6945 = vmatpush1.bf16.msra.mxu0 %v9621_v21  ;;  %v9558_v5 = vcombine.high %v1020_v60, %v1024_v61  ;;  %v1164_v63 = vld [vmem:[%s10696_s8 + $0x17c8] sm:$0xff]  ;;  %v9557_v11 = vcombine.low %v1020_v60, %v1024_v61 }
 0x22a   : > { %6910 = vmatpush1.bf16.msra.mxu1 %v9469_v13  ;;  %6946 = vmatprep.subr.bf16.mxu0 %v9614_v22  ;;  %v1168_v3 = vld [vmem:[%s10696_s8 + $0x17e8] sm:$0xff] }
 0x22b   : > { %6911 = vmatprep.subr.bf16.mxu1 %v9462_v24  ;;  %v9702_v12 = vcombine.high %v1164_v63, %v1168_v3  ;;  %v1156_v21 = vld [vmem:[%s10696_s8 + $0x1788] sm:$0xff]  ;;  %v9701_v23 = vcombine.low %v1164_v63, %v1168_v3  ;;  %v9549_v24 = vcombine.low %v1012_v7, %v1016_v8 }
 0x22c   : > { %v1160_v9 = vld [vmem:[%s10696_s8 + $0x17a8] sm:$0xff] }
 0x22d   : > { %6947 = vmatpush1.bf16.msra.mxu0 %v9613_v30  ;;  %v1004_v13 = vld [vmem:[%s10696_s8 + $0x12c8] sm:$0xff]  ;;  %v9694_v25 = vcombine.high %v1156_v21, %v1160_v9 }
 0x22e   : > { %6912 = vmatpush1.bf16.msra.mxu1 %v9461_v32  ;;  %6948 = vmatprep.subr.bf16.mxu0 %v9606_v33  ;;  %v1008_v22 = vld [vmem:[%s10696_s8 + $0x12e8] sm:$0xff]  ;;  %v9693_v33 = vcombine.low %v1156_v21, %v1160_v9 }
 0x22f   : > { %6913 = vmatprep.subr.bf16.mxu1 %v9454_v34  ;;  %v9542_v26 = vcombine.high %v1004_v13, %v1008_v22  ;;  %v1148_v27 = vld [vmem:[%s10696_s8 + $0x1748] sm:$0xff]  ;;  %v9541_v34 = vcombine.low %v1004_v13, %v1008_v22 }
 0x230   : > { %v1152_v29 = vld [vmem:[%s10696_s8 + $0x1768] sm:$0xff] }
 0x231   : > { %6949 = vmatpush1.bf16.msra.mxu0 %v9605_v41  ;;  %v996_v30 = vld [vmem:[%s10696_s8 + $0x1288] sm:$0xff]  ;;  %v9686_v35 = vcombine.high %v1148_v27, %v1152_v29 }
 0x232   : > { %6914 = vmatpush1.bf16.msra.mxu1 %v9453_v42  ;;  %6950 = vmatprep.subr.bf16.mxu0 %v9598_v43  ;;  %v1000_v32 = vld [vmem:[%s10696_s8 + $0x12a8] sm:$0xff]  ;;  %v9685_v43 = vcombine.low %v1148_v27, %v1152_v29 }
 0x233   : > { %6915 = vmatprep.subr.bf16.mxu1 %v9574_v44  ;;  %v9534_v37 = vcombine.high %v996_v30, %v1000_v32  ;;  %v1140_v38 = vld [vmem:[%s10696_s8 + $0x1708] sm:$0xff]  ;;  %v9533_v44 = vcombine.low %v996_v30, %v1000_v32 }
 0x234   : > { %v1144_v39 = vld [vmem:[%s10696_s8 + $0x1728] sm:$0xff] }
 0x235   : > { %6951 = vmatpush1.bf16.msra.mxu0 %v9597_v52  ;;  %v988_v41 = vld [vmem:[%s10696_s8 + $0x1248] sm:$0xff]  ;;  %v9678_v46 = vcombine.high %v1140_v38, %v1144_v39 }
 0x236   : > { %6916 = vmatpush2.bf16.msra.mxu1 %v9573_v53  ;;  %6952 = vmatprep.subr.bf16.mxu0 %v9590_v54  ;;  %v992_v42 = vld [vmem:[%s10696_s8 + $0x1268] sm:$0xff]  ;;  %v9677_v54 = vcombine.low %v1140_v38, %v1144_v39 }
 0x237   : > { %6917 = vmatprep.subr.bf16.mxu1 %v9566_v55  ;;  %v9526_v47 = vcombine.high %v988_v41, %v992_v42  ;;  %v1132_v49 = vld [vmem:[%s10696_s8 + $0x16c8] sm:$0xff]  ;;  %v9525_v55 = vcombine.low %v988_v41, %v992_v42 }
 0x238   : > { %v1136_v50 = vld [vmem:[%s10696_s8 + $0x16e8] sm:$0xff] }
 0x239   : > { %6953 = vmatpush1.bf16.msra.mxu0 %v9589_v62  ;;  %v980_v52 = vld [vmem:[%s10696_s8 + $0x1208] sm:$0xff]  ;;  %v9670_v56 = vcombine.high %v1132_v49, %v1136_v50 }
 0x23a   : > { %6918 = vmatpush2.bf16.msra.mxu1 %v9565_v0  ;;  %6954 = vmatprep.subr.bf16.mxu0 %v9582_v1  ;;  %v984_v53 = vld [vmem:[%s10696_s8 + $0x1228] sm:$0xff]  ;;  %v9669_v1 = vcombine.low %v1132_v49, %v1136_v50 }
 0x23b   : > { %6919 = vmatprep.subr.bf16.mxu1 %v9558_v5  ;;  %v9518_v57 = vcombine.high %v980_v52, %v984_v53  ;;  %v1124_v60 = vld [vmem:[%s10696_s8 + $0x1688] sm:$0xff]  ;;  %v9517_v5 = vcombine.low %v980_v52, %v984_v53 }
 0x23c   : > { %v1128_v61 = vld [vmem:[%s10696_s8 + $0x16a8] sm:$0xff] }
 0x23d   : > { %6955 = vmatpush1.bf16.msra.mxu0 %v9581_v10  ;;  %v1228_v62 = vld [vmem:[%s10696_s8 + $0x19c8] sm:$0xff]  ;;  %v9662_v63 = vcombine.high %v1124_v60, %v1128_v61 }
 0x23e   : > { %6920 = vmatpush2.bf16.msra.mxu1 %v9557_v11  ;;  %6956 = vmatprep.subr.bf16.mxu0 %v9702_v12  ;;  %v1232_v0 = vld [vmem:[%s10696_s8 + $0x19e8] sm:$0xff]  ;;  %v9661_v12 = vcombine.low %v1124_v60, %v1128_v61 }
 0x23f   : > { %6921 = vmatprep.subr.bf16.mxu1 %v9550_v19  ;;  %v9766_v3 = vcombine.high %v1228_v62, %v1232_v0  ;;  %v1116_v7 = vld [vmem:[%s10696_s8 + $0x1648] sm:$0xff]  ;;  %v9765_v19 = vcombine.low %v1228_v62, %v1232_v0 }
 0x240   : > { %v1120_v8 = vld [vmem:[%s10696_s8 + $0x1668] sm:$0xff] }
 0x241   : > { %6957 = vmatpush2.bf16.msra.mxu0 %v9701_v23  ;;  %v1220_v10 = vld [vmem:[%s10696_s8 + $0x1988] sm:$0xff]  ;;  %v9654_v21 = vcombine.high %v1116_v7, %v1120_v8 }
 0x242   : > { %6922 = vmatpush2.bf16.msra.mxu1 %v9549_v24  ;;  %6958 = vmatprep.subr.bf16.mxu0 %v9694_v25  ;;  %v1224_v11 = vld [vmem:[%s10696_s8 + $0x19a8] sm:$0xff] }
 0x243   : > { %6923 = vmatprep.subr.bf16.mxu1 %v9542_v26  ;;  %v9758_v9 = vcombine.high %v1220_v10, %v1224_v11  ;;  %v1108_v13 = vld [vmem:[%s10696_s8 + $0x1608] sm:$0xff]  ;;  %v9653_v26 = vcombine.low %v1116_v7, %v1120_v8  ;;  %v9757_v27 = vcombine.low %v1220_v10, %v1224_v11 }
 0x244   : > { %v1112_v22 = vld [vmem:[%s10696_s8 + $0x1628] sm:$0xff] }
 0x245   : > { %6959 = vmatpush2.bf16.msra.mxu0 %v9693_v33  ;;  %v1212_v23 = vld [vmem:[%s10696_s8 + $0x1948] sm:$0xff]  ;;  %v9646_v29 = vcombine.high %v1108_v13, %v1112_v22  ;;  %v9645_v39 = vcombine.low %v1108_v13, %v1112_v22 }
 0x246   : > { %6924 = vmatpush2.bf16.msra.mxu1 %v9541_v34  ;;  %6960 = vmatprep.subr.bf16.mxu0 %v9686_v35  ;;  %v1216_v24 = vld [vmem:[%s10696_s8 + $0x1968] sm:$0xff] }
 0x247   : > { %6925 = vmatprep.subr.bf16.mxu1 %v9534_v37  ;;  %v9750_v32 = vcombine.high %v1212_v23, %v1216_v24  ;;  %v1356_v33 = vld [vmem:[%s10696_s8 + $0x1dc8] sm:$0xff]  ;;  %v9749_v41 = vcombine.low %v1212_v23, %v1216_v24 }
 0x248   : > { %v1360_v34 = vld [vmem:[%s10696_s8 + $0x1de8] sm:$0xff] }
 0x249   : > { %6961 = vmatpush2.bf16.msra.mxu0 %v9685_v43  ;;  %v1204_v35 = vld [vmem:[%s10696_s8 + $0x1908] sm:$0xff]  ;;  %v9894_v42 = vcombine.high %v1356_v33, %v1360_v34  ;;  %v9893_v52 = vcombine.low %v1356_v33, %v1360_v34 }
 0x24a   : > { %6926 = vmatpush2.bf16.msra.mxu1 %v9533_v44  ;;  %6962 = vmatprep.subr.bf16.mxu0 %v9678_v46  ;;  %v1208_v37 = vld [vmem:[%s10696_s8 + $0x1928] sm:$0xff] }
 0x24b   : > { %6927 = vmatprep.subr.bf16.mxu1 %v9526_v47  ;;  %v9742_v44 = vcombine.high %v1204_v35, %v1208_v37  ;;  %v1348_v46 = vld [vmem:[%s10696_s8 + $0x1d88] sm:$0xff]  ;;  %v9741_v53 = vcombine.low %v1204_v35, %v1208_v37 }
 0x24c   : > { %v1352_v47 = vld [vmem:[%s10696_s8 + $0x1da8] sm:$0xff] }
 0x24d   : > { %6963 = vmatpush2.bf16.msra.mxu0 %v9677_v54  ;;  %v1196_v49 = vld [vmem:[%s10696_s8 + $0x18c8] sm:$0xff]  ;;  %v9886_v54 = vcombine.high %v1348_v46, %v1352_v47 }
 0x24e   : > { %6928 = vmatpush2.bf16.msra.mxu1 %v9525_v55  ;;  %6964 = vmatprep.subr.bf16.mxu0 %v9670_v56  ;;  %v1200_v50 = vld [vmem:[%s10696_s8 + $0x18e8] sm:$0xff] }
 0x24f   : > { %6929 = vmatprep.subr.bf16.mxu1 %v9518_v57  ;;  %v9734_v55 = vcombine.high %v1196_v49, %v1200_v50  ;;  %v1340_v56 = vld [vmem:[%s10696_s8 + $0x1d48] sm:$0xff] }
 0x250   : > { %v1344_v57 = vld [vmem:[%s10696_s8 + $0x1d68] sm:$0xff] }
 0x251   : > { %6965 = vmatpush2.bf16.msra.mxu0 %v9669_v1  ;;  %v1188_v61 = vld [vmem:[%s10696_s8 + $0x1888] sm:$0xff]  ;;  %v9885_v1 = vcombine.low %v1348_v46, %v1352_v47  ;;  %v9877_v13 = vcombine.low %v1340_v56, %v1344_v57 }
 0x252   : > { %6930 = vmatpush2.bf16.msra.mxu1 %v9517_v5  ;;  %6966 = vmatprep.subr.bf16.mxu0 %v9662_v63  ;;  %v1192_v62 = vld [vmem:[%s10696_s8 + $0x18a8] sm:$0xff]  ;;  %v9733_v63 = vcombine.low %v1196_v49, %v1200_v50 }
 0x253   : > { %6981 = vmatprep.subr.bf16.mxu1 %v9766_v3  ;;  %v9878_v3 = vcombine.high %v1340_v56, %v1344_v57  ;;  %v9726_v10 = vcombine.high %v1188_v61, %v1192_v62  ;;  %v1336_v11 = vld [vmem:[%s10696_s8 + $0x1d28] sm:$0xff]  ;;  %v9725_v23 = vcombine.low %v1188_v61, %v1192_v62 }
 0x254   : > { %v6728_v25 = vpop.f32.mrf.mxu1  ;;  %v1316_v35 = vld [vmem:[%s10696_s8 + $0x1c88] sm:$0xff] }
 0x255   : > { %6932 = vmatmul.mubr.bf16.vlgmr.msra.gmra.mxu1 %v10939_v2  ;;  %6967 = vmatpush2.bf16.msra.mxu0 %v9661_v12  ;;  %v1320_v37 = vld [vmem:[%s10696_s8 + $0x1ca8] sm:$0xff] }
 0x256   : > { %6982 = vmatpush1.bf16.msra.mxu1 %v9765_v19  ;;  %6968 = vmatprep.subr.bf16.mxu0 %v9654_v21  ;;  %v6730_v30 = vpop.f32.mrf.mxu1  ;;  %v1180_v19 = vld [vmem:[%s10696_s8 + $0x1848] sm:$0xff] }
 0x257   : > { %6983 = vmatprep.subr.bf16.mxu1 %v9758_v9  ;;  %7013 = vmatprep.mubr.bf16.mxu1 %v10952_v18  ;;  %v1184_v21 = vld [vmem:[%s10696_s8 + $0x1868] sm:$0xff] }
 0x258   : > { %v6732_v38 = vpop.f32.mrf.mxu1  ;;  %v9718_v24 = vcombine.high %v1180_v19, %v1184_v21  ;;  %v1308_v46 = vld [vmem:[%s10696_s8 + $0x1c48] sm:$0xff] }
 0x259   : > { %6969 = vmatpush2.bf16.msra.mxu0 %v9653_v26  ;;  %v1328_v26 = vld [vmem:[%s10696_s8 + $0x1ce8] sm:$0xff] }
 0x25a   : > { %6984 = vmatpush1.bf16.msra.mxu1 %v9757_v27  ;;  %6970 = vmatprep.subr.bf16.mxu0 %v9646_v29  ;;  %v6733_v43 = vpop.f32.mrf.mxu1  ;;  %v1172_v27 = vld [vmem:[%s10696_s8 + $0x1808] sm:$0xff] }
 0x25b   : > { %6985 = vmatprep.subr.bf16.mxu1 %v9750_v32  ;;  %v1176_v29 = vld [vmem:[%s10696_s8 + $0x1828] sm:$0xff]  ;;  %v9717_v32 = vcombine.low %v1180_v19, %v1184_v21  ;;  %v9854_v43 = vcombine.high %v1316_v35, %v1320_v37 }
 0x25c   : > { %v9710_v34 = vcombine.high %v1172_v27, %v1176_v29  ;;  %v1292_v38 = vld [vmem:[%s10696_s8 + $0x1bc8] sm:$0xff] }
 0x25d   : > { %6971 = vmatpush2.bf16.msra.mxu0 %v9645_v39  ;;  %v1296_v39 = vld [vmem:[%s10696_s8 + $0x1be8] sm:$0xff] }
 0x25e   : > { %6986 = vmatpush1.bf16.msra.mxu1 %v9749_v41  ;;  %7022 = vmatprep.subr.bf16.mxu0 %v9894_v42  ;;  %v9709_v42 = vcombine.low %v1172_v27, %v1176_v29  ;;  %v1312_v47 = vld [vmem:[%s10696_s8 + $0x1c68] sm:$0xff] }
 0x25f   : > { %6987 = vmatprep.subr.bf16.mxu1 %v9742_v44  ;;  %v9830_v44 = vcombine.high %v1292_v38, %v1296_v39  ;;  %v1284_v49 = vld [vmem:[%s10696_s8 + $0x1b88] sm:$0xff]  ;;  %v9845_v62 = vcombine.low %v1308_v46, %v1312_v47 }
 0x260   : > { %v6687_v60 = vpop.f32.mrf.mxu0  ;;  %6973 = vmatmul.mubr.bf16.vlgmr.msra.gmra.mxu0 %v10943_v6  ;;  %v1288_v50 = vld [vmem:[%s10696_s8 + $0x1ba8] sm:$0xff] }
 0x261   : > { %v6688_v0 = vadd.f32 %v6687_v60, %v11177_v4  ;;  %7023 = vmatpush1.bf16.msra.mxu0 %v9893_v52  ;;  %9940 = vmatprep.mubr.msk.bf16.mxu0 %vm6403_vm0, %v10947_v14  ;;  %v1332_v4 = vld [vmem:[%s10696_s8 + $0x1d08] sm:$0xff]  ;;  %v9853_v52 = vcombine.low %v1316_v35, %v1320_v37 }
 0x262   : > { %6988 = vmatpush1.bf16.msra.mxu1 %v9741_v53  ;;  %v6689_v5 = vpop.f32.mrf.mxu0  ;;  %7024 = vmatprep.subr.bf16.mxu0 %v9886_v54  ;;  %v9829_v53 = vcombine.low %v1292_v38, %v1296_v39  ;;  %v9846_v54 = vcombine.high %v1308_v46, %v1312_v47  ;;  %v1300_v56 = vld [vmem:[%s10696_s8 + $0x1c08] sm:$0xff] }
 0x263   : > { %v11252_v7 = vadd.f32 %v6728_v25, %v6688_v0  ;;  %v6690_v8 = vadd.f32 %v6689_v5, %v11184_v17  ;;  %6989 = vmatprep.subr.bf16.mxu1 %v9734_v55  ;;  %v9870_v17 = vcombine.high %v1332_v4, %v1336_v11  ;;  %v1324_v25 = vld [vmem:[%s10696_s8 + $0x1cc8] sm:$0xff]  ;;  %v9822_v55 = vcombine.high %v1284_v49, %v1288_v50 }
 0x264   : > { %v6691_v12 = vpop.f32.mrf.mxu0  ;;  %v9862_v33 = vcombine.high %v1324_v25, %v1328_v26  ;;  %v9861_v41 = vcombine.low %v1324_v25, %v1328_v26  ;;  %v1304_v57 = vld [vmem:[%s10696_s8 + $0x1c28] sm:$0xff]  ;;  %v9821_v0 = vcombine.low %v1284_v49, %v1288_v50 }
 0x265   : > { %v11259_v9 = vadd.f32 %v6730_v30, %v6690_v8  ;;  %7025 = vmatpush1.bf16.msra.mxu0 %v9885_v1  ;;  %v9869_v30 = vcombine.low %v1332_v4, %v1336_v11  ;;  %v1276_v60 = vld [vmem:[%s10696_s8 + $0x1b48] sm:$0xff]  ;;  %v9838_v1 = vcombine.high %v1300_v56, %v1304_v57  ;;  %v9837_v4 = vcombine.low %v1300_v56, %v1304_v57 }
 0x266   : > { %6990 = vmatpush1.bf16.msra.mxu1 %v9733_v63  ;;  %v6692_v22 = vpop.f32.mrf.mxu0  ;;  %7026 = vmatprep.subr.bf16.mxu0 %v9878_v3  ;;  %v1280_v61 = vld [vmem:[%s10696_s8 + $0x1b68] sm:$0xff] }
 0x267   : > { %6991 = vmatprep.subr.bf16.mxu1 %v9726_v10  ;;  %v9814_v5 = vcombine.high %v1276_v60, %v1280_v61  ;;  %v1396_v63 = vld [vmem:[%s10696_s8 + $0x1f08] sm:$0xff]  ;;  %v9813_v11 = vcombine.low %v1276_v60, %v1280_v61  ;;  %v461_v60 = vld [vmem:[%s10696_s8 + $0x1d0] sm:$0xff] }
 0x268   : > { %v1400_v3 = vld [vmem:[%s10696_s8 + $0x1f28] sm:$0xff]  ;;  %v465_v61 = vld [vmem:[%s10696_s8 + $0x1f0] sm:$0xff] }
 0x269   : > { %7027 = vmatpush1.bf16.msra.mxu0 %v9877_v13  ;;  %v1268_v8 = vld [vmem:[%s10696_s8 + $0x1b08] sm:$0xff]  ;;  %v9934_v12 = vcombine.high %v1396_v63, %v1400_v3 }
 0x26a   : > { %6992 = vmatpush1.bf16.msra.mxu1 %v9725_v23  ;;  %7028 = vmatprep.subr.bf16.mxu0 %v9870_v17  ;;  %v1272_v10 = vld [vmem:[%s10696_s8 + $0x1b28] sm:$0xff]  ;;  %v9933_v17 = vcombine.low %v1396_v63, %v1400_v3  ;;  %v9000_v63 = vcombine.high %v461_v60, %v465_v61 }
 0x26b   : > { %6993 = vmatprep.subr.bf16.mxu1 %v9718_v24  ;;  %v9806_v19 = vcombine.high %v1268_v8, %v1272_v10  ;;  %v1388_v21 = vld [vmem:[%s10696_s8 + $0x1ec8] sm:$0xff]  ;;  %v9805_v24 = vcombine.low %v1268_v8, %v1272_v10  ;;  %v453_v8 = vld [vmem:[%s10696_s8 + $0x190] sm:$0xff] }
 0x26c   : > { %v1392_v13 = vld [vmem:[%s10696_s8 + $0x1ee8] sm:$0xff]  ;;  %v457_v10 = vld [vmem:[%s10696_s8 + $0x1b0] sm:$0xff] }
 0x26d   : > { %7029 = vmatpush1.bf16.msra.mxu0 %v9869_v30  ;;  %v1260_v22 = vld [vmem:[%s10696_s8 + $0x1ac8] sm:$0xff]  ;;  %v9926_v25 = vcombine.high %v1388_v21, %v1392_v13 }
 0x26e   : > { %6994 = vmatpush1.bf16.msra.mxu1 %v9717_v32  ;;  %7030 = vmatprep.subr.bf16.mxu0 %v9862_v33  ;;  %v1264_v23 = vld [vmem:[%s10696_s8 + $0x1ae8] sm:$0xff]  ;;  %v9925_v33 = vcombine.low %v1388_v21, %v1392_v13  ;;  %v8992_v21 = vcombine.high %v453_v8, %v457_v10 }
 0x26f   : > { %6995 = vmatprep.subr.bf16.mxu1 %v9710_v34  ;;  %v9798_v26 = vcombine.high %v1260_v22, %v1264_v23  ;;  %v1380_v27 = vld [vmem:[%s10696_s8 + $0x1e88] sm:$0xff]  ;;  %v9797_v34 = vcombine.low %v1260_v22, %v1264_v23  ;;  %v445_v22 = vld [vmem:[%s10696_s8 + $0x150] sm:$0xff] }
 0x270   : > { %v1384_v29 = vld [vmem:[%s10696_s8 + $0x1ea8] sm:$0xff]  ;;  %v449_v23 = vld [vmem:[%s10696_s8 + $0x170] sm:$0xff] }
 0x271   : > { %7031 = vmatpush1.bf16.msra.mxu0 %v9861_v41  ;;  %v1252_v30 = vld [vmem:[%s10696_s8 + $0x1a88] sm:$0xff]  ;;  %v9918_v35 = vcombine.high %v1380_v27, %v1384_v29 }
 0x272   : > { %6996 = vmatpush1.bf16.msra.mxu1 %v9709_v42  ;;  %7032 = vmatprep.subr.bf16.mxu0 %v9854_v43  ;;  %v1256_v32 = vld [vmem:[%s10696_s8 + $0x1aa8] sm:$0xff]  ;;  %v9917_v43 = vcombine.low %v1380_v27, %v1384_v29  ;;  %v8984_v29 = vcombine.high %v445_v22, %v449_v23 }
 0x273   : > { %6997 = vmatprep.subr.bf16.mxu1 %v9830_v44  ;;  %v9790_v37 = vcombine.high %v1252_v30, %v1256_v32  ;;  %v1372_v38 = vld [vmem:[%s10696_s8 + $0x1e48] sm:$0xff]  ;;  %v9789_v44 = vcombine.low %v1252_v30, %v1256_v32 }
 0x274   : > { %v1376_v39 = vld [vmem:[%s10696_s8 + $0x1e68] sm:$0xff] }
 0x275   : > { %7033 = vmatpush1.bf16.msra.mxu0 %v9853_v52  ;;  %v1244_v41 = vld [vmem:[%s10696_s8 + $0x1a48] sm:$0xff]  ;;  %v9910_v46 = vcombine.high %v1372_v38, %v1376_v39 }
 0x276   : > { %6998 = vmatpush2.bf16.msra.mxu1 %v9829_v53  ;;  %7034 = vmatprep.subr.bf16.mxu0 %v9846_v54  ;;  %v1248_v42 = vld [vmem:[%s10696_s8 + $0x1a68] sm:$0xff]  ;;  %v9909_v54 = vcombine.low %v1372_v38, %v1376_v39  ;;  %v8983_v39 = vcombine.low %v445_v22, %v449_v23 }
 0x277   : > { %6999 = vmatprep.subr.bf16.mxu1 %v9822_v55  ;;  %v9782_v47 = vcombine.high %v1244_v41, %v1248_v42  ;;  %v1364_v49 = vld [vmem:[%s10696_s8 + $0x1e08] sm:$0xff]  ;;  %v9781_v55 = vcombine.low %v1244_v41, %v1248_v42 }
 0x278   : > { %v1368_v50 = vld [vmem:[%s10696_s8 + $0x1e28] sm:$0xff] }
 0x279   : > { %7035 = vmatpush1.bf16.msra.mxu0 %v9845_v62  ;;  %v1236_v52 = vld [vmem:[%s10696_s8 + $0x1a08] sm:$0xff]  ;;  %v9902_v56 = vcombine.high %v1364_v49, %v1368_v50  ;;  %v589_v62 = vld [vmem:[%s10696_s8 + $0x5d0] sm:$0xff] }
 0x27a   : > { %7000 = vmatpush2.bf16.msra.mxu1 %v9821_v0  ;;  %7036 = vmatprep.subr.bf16.mxu0 %v9838_v1  ;;  %v1240_v53 = vld [vmem:[%s10696_s8 + $0x1a28] sm:$0xff]  ;;  %v593_v0 = vld [vmem:[%s10696_s8 + $0x5f0] sm:$0xff]  ;;  %v9901_v1 = vcombine.low %v1364_v49, %v1368_v50 }
 0x27b   : > { %7001 = vmatprep.subr.bf16.mxu1 %v9814_v5  ;;  %v9774_v57 = vcombine.high %v1236_v52, %v1240_v53  ;;  %v9773_v5 = vcombine.low %v1236_v52, %v1240_v53  ;;  %v9128_v3 = vcombine.high %v589_v62, %v593_v0  ;;  %v557_v49 = vld [vmem:[%s10696_s8 + $0x4d0] sm:$0xff] }
 0x27c   : > { %v561_v50 = vld [vmem:[%s10696_s8 + $0x4f0] sm:$0xff] }
 0x27d   : > { %7037 = vmatpush1.bf16.msra.mxu0 %v9837_v4  ;;  %v581_v4 = vld [vmem:[%s10696_s8 + $0x590] sm:$0xff] }
 0x27e   : > { %7002 = vmatpush2.bf16.msra.mxu1 %v9813_v11  ;;  %7044 = vmatprep.subr.bf16.mxu0 %v9934_v12  ;;  %v585_v11 = vld [vmem:[%s10696_s8 + $0x5b0] sm:$0xff]  ;;  %v8999_v12 = vcombine.low %v461_v60, %v465_v61 }
 0x27f   : > { %7003 = vmatprep.subr.bf16.mxu1 %v9806_v19  ;;  %v9127_v19 = vcombine.low %v589_v62, %v593_v0  ;;  %v9120_v13 = vcombine.high %v581_v4, %v585_v11  ;;  %v9119_v27 = vcombine.low %v581_v4, %v585_v11  ;;  %v549_v61 = vld [vmem:[%s10696_s8 + $0x490] sm:$0xff] }
 0x280   : > { %v553_v62 = vld [vmem:[%s10696_s8 + $0x4b0] sm:$0xff] }
 0x281   : > { %7045 = vmatpush2.bf16.msra.mxu0 %v9933_v17  ;;  %v573_v17 = vld [vmem:[%s10696_s8 + $0x550] sm:$0xff]  ;;  %v9087_v23 = vcombine.low %v549_v61, %v553_v62 }
 0x282   : > { %7004 = vmatpush2.bf16.msra.mxu1 %v9805_v24  ;;  %7046 = vmatprep.subr.bf16.mxu0 %v9926_v25  ;;  %v577_v24 = vld [vmem:[%s10696_s8 + $0x570] sm:$0xff] }
 0x283   : > { %7005 = vmatprep.subr.bf16.mxu1 %v9798_v26  ;;  %v8991_v26 = vcombine.low %v453_v8, %v457_v10  ;;  %v9112_v32 = vcombine.high %v573_v17, %v577_v24  ;;  %v9111_v41 = vcombine.low %v573_v17, %v577_v24  ;;  %v9088_v10 = vcombine.high %v549_v61, %v553_v62  ;;  %v413_v4 = vld [vmem:[%s10696_s8 + $0x50] sm:$0xff] }
 0x284   : > { %v417_v11 = vld [vmem:[%s10696_s8 + $0x70] sm:$0xff] }
 0x285   : > { %7047 = vmatpush2.bf16.msra.mxu0 %v9925_v33  ;;  %v437_v33 = vld [vmem:[%s10696_s8 + $0x110] sm:$0xff]  ;;  %v8952_v17 = vcombine.high %v413_v4, %v417_v11 }
 0x286   : > { %7006 = vmatpush2.bf16.msra.mxu1 %v9797_v34  ;;  %7048 = vmatprep.subr.bf16.mxu0 %v9918_v35  ;;  %v441_v34 = vld [vmem:[%s10696_s8 + $0x130] sm:$0xff] }
 0x287   : > { %7007 = vmatprep.subr.bf16.mxu1 %v9790_v37  ;;  %v565_v35 = vld [vmem:[%s10696_s8 + $0x510] sm:$0xff]  ;;  %v8976_v42 = vcombine.high %v437_v33, %v441_v34  ;;  %v8975_v52 = vcombine.low %v437_v33, %v441_v34 }
 0x288   : > { %v569_v37 = vld [vmem:[%s10696_s8 + $0x530] sm:$0xff] }
 0x289   : > { %7049 = vmatpush2.bf16.msra.mxu0 %v9917_v43  ;;  %v9103_v53 = vcombine.low %v565_v35, %v569_v37  ;;  %v641_v61 = vld [vmem:[%s10696_s8 + $0x770] sm:$0xff] }
 0x28a   : > { %7008 = vmatpush2.bf16.msra.mxu1 %v9789_v44  ;;  %7050 = vmatprep.subr.bf16.mxu0 %v9910_v46  ;;  %v9104_v44 = vcombine.high %v565_v35, %v569_v37  ;;  %v429_v46 = vld [vmem:[%s10696_s8 + $0xd0] sm:$0xff] }
 0x28b   : > { %7009 = vmatprep.subr.bf16.mxu1 %v9782_v47  ;;  %v433_v47 = vld [vmem:[%s10696_s8 + $0xf0] sm:$0xff] }
 0x28c   : > { %v525_v35 = vld [vmem:[%s10696_s8 + $0x3d0] sm:$0xff] }
 0x28d   : > { %7051 = vmatpush2.bf16.msra.mxu0 %v9909_v54  ;;  %v8968_v54 = vcombine.high %v429_v46, %v433_v47  ;;  %v529_v37 = vld [vmem:[%s10696_s8 + $0x3f0] sm:$0xff] }
 0x28e   : > { %7010 = vmatpush2.bf16.msra.mxu1 %v9781_v55  ;;  %7052 = vmatprep.subr.bf16.mxu0 %v9902_v56  ;;  %v9096_v55 = vcombine.high %v557_v49, %v561_v50  ;;  %v421_v56 = vld [vmem:[%s10696_s8 + $0x90] sm:$0xff] }
 0x28f   : > { %7011 = vmatprep.subr.bf16.mxu1 %v9774_v57  ;;  %v425_v57 = vld [vmem:[%s10696_s8 + $0xb0] sm:$0xff] }
 0x291   : > { %7053 = vmatpush2.bf16.msra.mxu0 %v9901_v1  ;;  %v8967_v1 = vcombine.low %v429_v46, %v433_v47  ;;  %v517_v46 = vld [vmem:[%s10696_s8 + $0x390] sm:$0xff] }
 0x292   : > { %7012 = vmatpush2.bf16.msra.mxu1 %v9773_v5  ;;  %7063 = vmatprep.subr.bf16.mxu0 %v9000_v63  ;;  %v9095_v63 = vcombine.low %v557_v49, %v561_v50  ;;  %v521_v47 = vld [vmem:[%s10696_s8 + $0x3b0] sm:$0xff] }
 0x293   : > { %7104 = vmatprep.subr.bf16.mxu1 %v9128_v3  ;;  %v8960_v3 = vcombine.high %v421_v56, %v425_v57  ;;  %v645_v49 = vld [vmem:[%s10696_s8 + $0x790] sm:$0xff]  ;;  %v9055_v62 = vcombine.low %v517_v46, %v521_v47 }
 0x294   : > { %7055 = vmatmul.mubr.bf16.vlgmr.msra.gmra.mxu0 %v11006_v15  ;;  %v649_v50 = vld [vmem:[%s10696_s8 + $0x7b0] sm:$0xff] }
 0x295   : > { %v6769_v25 = vpop.f32.mrf.mxu1  ;;  %7014 = vmatmul.mubr.bf16.vlgmr.msra.gmra.mxu1 %v11020_v45  ;;  %7064 = vmatpush1.bf16.msra.mxu0 %v8999_v12 }
 0x296   : > { %7105 = vmatpush1.bf16.msra.mxu1 %v9127_v19  ;;  %7065 = vmatprep.subr.bf16.mxu0 %v8992_v21  ;;  %v541_v19 = vld [vmem:[%s10696_s8 + $0x450] sm:$0xff] }
 0x297   : > { %v6771_v30 = vpop.f32.mrf.mxu1  ;;  %7106 = vmatprep.subr.bf16.mxu1 %v9120_v13  ;;  %7095 = vmatprep.mubr.bf16.mxu0 %v10741_v58  ;;  %v545_v21 = vld [vmem:[%s10696_s8 + $0x470] sm:$0xff]  ;;  %v8959_v13 = vcombine.low %v421_v56, %v425_v57 }
 0x298   : > { %7136 = vmatprep.mubr.bf16.mxu1 %v10743_v59  ;;  %v9080_v24 = vcombine.high %v541_v19, %v545_v21  ;;  %v509_v56 = vld [vmem:[%s10696_s8 + $0x350] sm:$0xff] }
 0x299   : > { %v6773_v38 = vpop.f32.mrf.mxu1  ;;  %7066 = vmatpush1.bf16.msra.mxu0 %v8991_v26  ;;  %v409_v26 = vld [vmem:[%s10696_s8 + $0x30] sm:$0xff] }
 0x29a   : > { %7107 = vmatpush1.bf16.msra.mxu1 %v9119_v27  ;;  %7067 = vmatprep.subr.bf16.mxu0 %v8984_v29  ;;  %v533_v27 = vld [vmem:[%s10696_s8 + $0x410] sm:$0xff] }
 0x29b   : > { %v6774_v43 = vpop.f32.mrf.mxu1  ;;  %7108 = vmatprep.subr.bf16.mxu1 %v9112_v32  ;;  %v537_v29 = vld [vmem:[%s10696_s8 + $0x430] sm:$0xff]  ;;  %v9079_v32 = vcombine.low %v541_v19, %v545_v21 }
 0x29c   : > { %v9072_v34 = vcombine.high %v533_v27, %v537_v29  ;;  %v653_v38 = vld [vmem:[%s10696_s8 + $0x7d0] sm:$0xff]  ;;  %v9064_v43 = vcombine.high %v525_v35, %v529_v37 }
 0x29d   : > { %7068 = vmatpush1.bf16.msra.mxu0 %v8983_v39  ;;  %v657_v39 = vld [vmem:[%s10696_s8 + $0x7f0] sm:$0xff] }
 0x29e   : > { %7109 = vmatpush1.bf16.msra.mxu1 %v9111_v41  ;;  %7069 = vmatprep.subr.bf16.mxu0 %v8976_v42  ;;  %v9071_v42 = vcombine.low %v533_v27, %v537_v29  ;;  %v513_v57 = vld [vmem:[%s10696_s8 + $0x370] sm:$0xff] }
 0x29f   : > { %7110 = vmatprep.subr.bf16.mxu1 %v9104_v44  ;;  %v9192_v44 = vcombine.high %v653_v38, %v657_v39 }
 0x2a0   : > { %v6810_v60 = vpop.f32.mrf.mxu0 }
 0x2a1   : > { %v11325_v0 = vadd.f32 %v6810_v60, %v6769_v25  ;;  %7070 = vmatpush1.bf16.msra.mxu0 %v8975_v52  ;;  %v405_v25 = vld [vmem:[%s10696_s8 + $0x10] sm:$0xff]  ;;  %v9063_v52 = vcombine.low %v525_v35, %v529_v37 }
 0x2a2   : > { %7111 = vmatpush1.bf16.msra.mxu1 %v9103_v53  ;;  %v6812_v5 = vpop.f32.mrf.mxu0  ;;  %7071 = vmatprep.subr.bf16.mxu0 %v8968_v54  ;;  %v8944_v33 = vcombine.high %v405_v25, %v409_v26  ;;  %v8943_v41 = vcombine.low %v405_v25, %v409_v26  ;;  %v9191_v53 = vcombine.low %v653_v38, %v657_v39  ;;  %v637_v60 = vld [vmem:[%s10696_s8 + $0x750] sm:$0xff] }
 0x2a3   : > { %v11327_v8 = vadd.f32 %v6812_v5, %v6771_v30  ;;  %7112 = vmatprep.subr.bf16.mxu1 %v9096_v55  ;;  %v8951_v30 = vcombine.low %v413_v4, %v417_v11  ;;  %v9056_v54 = vcombine.high %v517_v46, %v521_v47  ;;  %v9184_v55 = vcombine.high %v645_v49, %v649_v50  ;;  %v629_v4 = vld [vmem:[%s10696_s8 + $0x710] sm:$0xff] }
 0x2a4   : > { %v6814_v12 = vpop.f32.mrf.mxu0  ;;  %v9048_v5 = vcombine.high %v509_v56, %v513_v57  ;;  %v633_v11 = vld [vmem:[%s10696_s8 + $0x730] sm:$0xff]  ;;  %v9175_v19 = vcombine.low %v637_v60, %v641_v61 }
 0x2a5   : > { %7072 = vmatpush1.bf16.msra.mxu0 %v8967_v1  ;;  %v9183_v1 = vcombine.low %v645_v49, %v649_v50  ;;  %v9047_v12 = vcombine.low %v509_v56, %v513_v57  ;;  %v9167_v26 = vcombine.low %v629_v4, %v633_v11 }
 0x2a6   : > { %7113 = vmatpush1.bf16.msra.mxu1 %v9095_v63  ;;  %v6815_v22 = vpop.f32.mrf.mxu0  ;;  %7073 = vmatprep.subr.bf16.mxu0 %v8960_v3  ;;  %v9176_v63 = vcombine.high %v637_v60, %v641_v61  ;;  %v501_v3 = vld [vmem:[%s10696_s8 + $0x310] sm:$0xff] }
 0x2a7   : > { %7114 = vmatprep.subr.bf16.mxu1 %v9088_v10  ;;  %v505_v10 = vld [vmem:[%s10696_s8 + $0x330] sm:$0xff] }
 0x2a8   : > { %v9040_v21 = vcombine.high %v501_v3, %v505_v10  ;;  %v493_v22 = vld [vmem:[%s10696_s8 + $0x2d0] sm:$0xff]  ;;  %v9039_v25 = vcombine.low %v501_v3, %v505_v10 }
 0x2a9   : > { %7074 = vmatpush1.bf16.msra.mxu0 %v8959_v13  ;;  %v9168_v13 = vcombine.high %v629_v4, %v633_v11 }
 0x2aa   : > { %7115 = vmatpush1.bf16.msra.mxu1 %v9087_v23  ;;  %7075 = vmatprep.subr.bf16.mxu0 %v8952_v17  ;;  %v497_v23 = vld [vmem:[%s10696_s8 + $0x2f0] sm:$0xff] }
 0x2ab   : > { %7116 = vmatprep.subr.bf16.mxu1 %v9080_v24  ;;  %v621_v17 = vld [vmem:[%s10696_s8 + $0x6d0] sm:$0xff]  ;;  %v9032_v27 = vcombine.high %v493_v22, %v497_v23  ;;  %v9031_v35 = vcombine.low %v493_v22, %v497_v23 }
 0x2ac   : > { %v625_v24 = vld [vmem:[%s10696_s8 + $0x6f0] sm:$0xff] }
 0x2ad   : > { %7076 = vmatpush1.bf16.msra.mxu0 %v8951_v30  ;;  %v9160_v29 = vcombine.high %v621_v17, %v625_v24  ;;  %v485_v30 = vld [vmem:[%s10696_s8 + $0x290] sm:$0xff]  ;;  %v9159_v37 = vcombine.low %v621_v17, %v625_v24 }
 0x2ae   : > { %7117 = vmatpush1.bf16.msra.mxu1 %v9079_v32  ;;  %7077 = vmatprep.subr.bf16.mxu0 %v8944_v33  ;;  %v489_v32 = vld [vmem:[%s10696_s8 + $0x2b0] sm:$0xff] }
 0x2af   : > { %7118 = vmatprep.subr.bf16.mxu1 %v9072_v34  ;;  %v613_v33 = vld [vmem:[%s10696_s8 + $0x690] sm:$0xff]  ;;  %v9024_v38 = vcombine.high %v485_v30, %v489_v32  ;;  %v9023_v46 = vcombine.low %v485_v30, %v489_v32 }
 0x2b0   : > { %v617_v34 = vld [vmem:[%s10696_s8 + $0x6b0] sm:$0xff] }
 0x2b1   : > { %7078 = vmatpush1.bf16.msra.mxu0 %v8943_v41  ;;  %v9152_v39 = vcombine.high %v613_v33, %v617_v34  ;;  %v477_v41 = vld [vmem:[%s10696_s8 + $0x250] sm:$0xff]  ;;  %v9151_v47 = vcombine.low %v613_v33, %v617_v34 }
 0x2b2   : > { %7119 = vmatpush1.bf16.msra.mxu1 %v9071_v42  ;;  %7079 = vmatprep.subr.bf16.mxu0 %v9064_v43  ;;  %v481_v42 = vld [vmem:[%s10696_s8 + $0x270] sm:$0xff] }
 0x2b3   : > { %7120 = vmatprep.subr.bf16.mxu1 %v9192_v44  ;;  %v605_v43 = vld [vmem:[%s10696_s8 + $0x650] sm:$0xff]  ;;  %v9016_v49 = vcombine.high %v477_v41, %v481_v42  ;;  %v9015_v56 = vcombine.low %v477_v41, %v481_v42 }
 0x2b4   : > { %v609_v44 = vld [vmem:[%s10696_s8 + $0x670] sm:$0xff] }
 0x2b5   : > { %7080 = vmatpush2.bf16.msra.mxu0 %v9063_v52  ;;  %v9144_v50 = vcombine.high %v605_v43, %v609_v44  ;;  %v469_v52 = vld [vmem:[%s10696_s8 + $0x210] sm:$0xff]  ;;  %v9143_v57 = vcombine.low %v605_v43, %v609_v44 }
 0x2b6   : > { %7121 = vmatpush2.bf16.msra.mxu1 %v9191_v53  ;;  %7081 = vmatprep.subr.bf16.mxu0 %v9056_v54  ;;  %v473_v53 = vld [vmem:[%s10696_s8 + $0x230] sm:$0xff] }
 0x2b7   : > { %7122 = vmatprep.subr.bf16.mxu1 %v9184_v55  ;;  %v597_v54 = vld [vmem:[%s10696_s8 + $0x610] sm:$0xff]  ;;  %v9008_v60 = vcombine.high %v469_v52, %v473_v53  ;;  %v9007_v3 = vcombine.low %v469_v52, %v473_v53 }
 0x2b8   : > { %v601_v55 = vld [vmem:[%s10696_s8 + $0x630] sm:$0xff] }
 0x2b9   : > { %7082 = vmatpush2.bf16.msra.mxu0 %v9055_v62  ;;  %v9136_v61 = vcombine.high %v597_v54, %v601_v55  ;;  %v717_v62 = vld [vmem:[%s10696_s8 + $0x9d0] sm:$0xff]  ;;  %v9135_v10 = vcombine.low %v597_v54, %v601_v55 }
 0x2ba   : > { %7123 = vmatpush2.bf16.msra.mxu1 %v9183_v1  ;;  %7083 = vmatprep.subr.bf16.mxu0 %v9048_v5  ;;  %v721_v1 = vld [vmem:[%s10696_s8 + $0x9f0] sm:$0xff] }
 0x2bb   : > { %7124 = vmatprep.subr.bf16.mxu1 %v9176_v63  ;;  %v845_v5 = vld [vmem:[%s10696_s8 + $0xdd0] sm:$0xff]  ;;  %v9256_v4 = vcombine.high %v717_v62, %v721_v1  ;;  %v9255_v22 = vcombine.low %v717_v62, %v721_v1 }
 0x2bc   : > { %v849_v63 = vld [vmem:[%s10696_s8 + $0xdf0] sm:$0xff] }
 0x2bd   : > { %7084 = vmatpush2.bf16.msra.mxu0 %v9047_v12  ;;  %v9384_v11 = vcombine.high %v845_v5, %v849_v63  ;;  %v709_v12 = vld [vmem:[%s10696_s8 + $0x990] sm:$0xff]  ;;  %v9383_v23 = vcombine.low %v845_v5, %v849_v63 }
 0x2be   : > { %7125 = vmatpush2.bf16.msra.mxu1 %v9175_v19  ;;  %7085 = vmatprep.subr.bf16.mxu0 %v9040_v21  ;;  %v713_v19 = vld [vmem:[%s10696_s8 + $0x9b0] sm:$0xff] }
 0x2bf   : > { %7126 = vmatprep.subr.bf16.mxu1 %v9168_v13  ;;  %v837_v21 = vld [vmem:[%s10696_s8 + $0xd90] sm:$0xff]  ;;  %v9248_v17 = vcombine.high %v709_v12, %v713_v19  ;;  %v9247_v32 = vcombine.low %v709_v12, %v713_v19 }
 0x2c0   : > { %v841_v13 = vld [vmem:[%s10696_s8 + $0xdb0] sm:$0xff] }
 0x2c1   : > { %7086 = vmatpush2.bf16.msra.mxu0 %v9039_v25  ;;  %v9376_v24 = vcombine.high %v837_v21, %v841_v13  ;;  %v701_v25 = vld [vmem:[%s10696_s8 + $0x950] sm:$0xff]  ;;  %v9375_v34 = vcombine.low %v837_v21, %v841_v13 }
 0x2c2   : > { %7127 = vmatpush2.bf16.msra.mxu1 %v9167_v26  ;;  %7087 = vmatprep.subr.bf16.mxu0 %v9032_v27  ;;  %v705_v26 = vld [vmem:[%s10696_s8 + $0x970] sm:$0xff] }
 0x2c3   : > { %7128 = vmatprep.subr.bf16.mxu1 %v9160_v29  ;;  %v829_v27 = vld [vmem:[%s10696_s8 + $0xd50] sm:$0xff] }
 0x2c4   : > { %v833_v29 = vld [vmem:[%s10696_s8 + $0xd70] sm:$0xff] }
 0x2c5   : > { %7088 = vmatpush2.bf16.msra.mxu0 %v9031_v35  ;;  %v9240_v35 = vcombine.high %v701_v25, %v705_v26  ;;  %v697_v41 = vld [vmem:[%s10696_s8 + $0x930] sm:$0xff] }
 0x2c6   : > { %7129 = vmatpush2.bf16.msra.mxu1 %v9159_v37  ;;  %7089 = vmatprep.subr.bf16.mxu0 %v9024_v38  ;;  %v9368_v38 = vcombine.high %v829_v27, %v833_v29  ;;  %v821_v43 = vld [vmem:[%s10696_s8 + $0xd10] sm:$0xff] }
 0x2c7   : > { %7130 = vmatprep.subr.bf16.mxu1 %v9152_v39  ;;  %v693_v39 = vld [vmem:[%s10696_s8 + $0x910] sm:$0xff] }
 0x2c8   : > { %v825_v44 = vld [vmem:[%s10696_s8 + $0xd30] sm:$0xff] }
 0x2c9   : > { %7090 = vmatpush2.bf16.msra.mxu0 %v9023_v46  ;;  %v9239_v46 = vcombine.low %v701_v25, %v705_v26  ;;  %v9360_v52 = vcombine.high %v821_v43, %v825_v44  ;;  %v689_v53 = vld [vmem:[%s10696_s8 + $0x8f0] sm:$0xff] }
 0x2ca   : > { %7131 = vmatpush2.bf16.msra.mxu1 %v9151_v47  ;;  %7091 = vmatprep.subr.bf16.mxu0 %v9016_v49  ;;  %v9367_v47 = vcombine.low %v829_v27, %v833_v29  ;;  %v9232_v49 = vcombine.high %v693_v39, %v697_v41  ;;  %v813_v54 = vld [vmem:[%s10696_s8 + $0xcd0] sm:$0xff] }
 0x2cb   : > { %7132 = vmatprep.subr.bf16.mxu1 %v9144_v50  ;;  %v817_v55 = vld [vmem:[%s10696_s8 + $0xcf0] sm:$0xff] }
 0x2cc   : > { %v677_v62 = vld [vmem:[%s10696_s8 + $0x890] sm:$0xff]  ;;  %v9351_v12 = vcombine.low %v813_v54, %v817_v55 }
 0x2cd   : > { %7092 = vmatpush2.bf16.msra.mxu0 %v9015_v56  ;;  %v9231_v56 = vcombine.low %v693_v39, %v697_v41  ;;  %v681_v1 = vld [vmem:[%s10696_s8 + $0x8b0] sm:$0xff] }
 0x2ce   : > { %7133 = vmatpush2.bf16.msra.mxu1 %v9143_v57  ;;  %7093 = vmatprep.subr.bf16.mxu0 %v9008_v60  ;;  %v9359_v57 = vcombine.low %v821_v43, %v825_v44  ;;  %v805_v63 = vld [vmem:[%s10696_s8 + $0xc90] sm:$0xff]  ;;  %v9216_v19 = vcombine.high %v677_v62, %v681_v1  ;;  %v9215_v26 = vcombine.low %v677_v62, %v681_v1 }
 0x2cf   : > { %7134 = vmatprep.subr.bf16.mxu1 %v9136_v61  ;;  %v9352_v61 = vcombine.high %v813_v54, %v817_v55  ;;  %v801_v25 = vld [vmem:[%s10696_s8 + $0xc70] sm:$0xff] }
 0x2d0   : > { %v781_v43 = vld [vmem:[%s10696_s8 + $0xbd0] sm:$0xff] }
 0x2d1   : > { %7094 = vmatpush2.bf16.msra.mxu0 %v9007_v3  ;;  %v809_v3 = vld [vmem:[%s10696_s8 + $0xcb0] sm:$0xff] }
 0x2d2   : > { %7135 = vmatpush2.bf16.msra.mxu1 %v9135_v10  ;;  %7145 = vmatprep.subr.bf16.mxu0 %v9256_v4  ;;  %v9344_v13 = vcombine.high %v805_v63, %v809_v3  ;;  %v9343_v29 = vcombine.low %v805_v63, %v809_v3  ;;  %v785_v44 = vld [vmem:[%s10696_s8 + $0xbf0] sm:$0xff] }
 0x2d3   : > { %7186 = vmatprep.subr.bf16.mxu1 %v9384_v11  ;;  %v901_v54 = vld [vmem:[%s10696_s8 + $0xf90] sm:$0xff] }
 0x2d4   : > { %7096 = vmatmul.mubr.bf16.vlgmr.msra.gmra.mxu0 %v10787_v16  ;;  %v905_v55 = vld [vmem:[%s10696_s8 + $0xfb0] sm:$0xff] }
 0x2d5   : > { %v6851_v30 = vpop.f32.mrf.mxu1  ;;  %7137 = vmatmul.mubr.bf16.vlgmr.msra.gmra.mxu1 %v10791_v20  ;;  %7146 = vmatpush1.bf16.msra.mxu0 %v9255_v22  ;;  %v669_v22 = vld [vmem:[%s10696_s8 + $0x850] sm:$0xff] }
 0x2d6   : > { %v6852_v33 = vadd.f32 %v6851_v30, %v11325_v0  ;;  %7187 = vmatpush1.bf16.msra.mxu1 %v9383_v23  ;;  %7147 = vmatprep.subr.bf16.mxu0 %v9248_v17  ;;  %v673_v23 = vld [vmem:[%s10696_s8 + $0x870] sm:$0xff] }
 0x2d7   : > { %v6853_v37 = vpop.f32.mrf.mxu1  ;;  %7188 = vmatprep.subr.bf16.mxu1 %v9376_v24  ;;  %7177 = vmatprep.mubr.bf16.mxu0 %v10795_v28  ;;  %v797_v24 = vld [vmem:[%s10696_s8 + $0xc50] sm:$0xff]  ;;  %v9208_v30 = vcombine.high %v669_v22, %v673_v23 }
 0x2d8   : > { %v6854_v42 = vadd.f32 %v6853_v37, %v11327_v8  ;;  %7218 = vmatprep.mubr.bf16.mxu1 %v10800_v31  ;;  %v685_v8 = vld [vmem:[%s10696_s8 + $0x8d0] sm:$0xff]  ;;  %v9335_v39 = vcombine.low %v797_v24, %v801_v25 }
 0x2d9   : > { %v6855_v0 = vpop.f32.mrf.mxu1  ;;  %7148 = vmatpush1.bf16.msra.mxu0 %v9247_v32  ;;  %v9224_v60 = vcombine.high %v685_v8, %v689_v53  ;;  %v9223_v4 = vcombine.low %v685_v8, %v689_v53  ;;  %v9336_v32 = vcombine.high %v797_v24, %v801_v25  ;;  %v793_v37 = vld [vmem:[%s10696_s8 + $0xc30] sm:$0xff] }
 0x2da   : > { %7189 = vmatpush1.bf16.msra.mxu1 %v9375_v34  ;;  %7149 = vmatprep.subr.bf16.mxu0 %v9240_v35  ;;  %v665_v34 = vld [vmem:[%s10696_s8 + $0x830] sm:$0xff] }
 0x2db   : > { %v6856_v50 = vpop.f32.mrf.mxu1  ;;  %7190 = vmatprep.subr.bf16.mxu1 %v9368_v38  ;;  %v789_v35 = vld [vmem:[%s10696_s8 + $0xc10] sm:$0xff]  ;;  %v9207_v38 = vcombine.low %v669_v22, %v673_v23 }
 0x2dc   : > { %v909_v0 = vld [vmem:[%s10696_s8 + $0xfd0] sm:$0xff]  ;;  %v9320_v50 = vcombine.high %v781_v43, %v785_v44 }
 0x2dd   : > { %7150 = vmatpush1.bf16.msra.mxu0 %v9239_v46  ;;  %v913_v46 = vld [vmem:[%s10696_s8 + $0xff0] sm:$0xff] }
 0x2de   : > { %7191 = vmatpush1.bf16.msra.mxu1 %v9367_v47  ;;  %7151 = vmatprep.subr.bf16.mxu0 %v9232_v49  ;;  %v9327_v49 = vcombine.low %v789_v35, %v793_v37  ;;  %v773_v8 = vld [vmem:[%s10696_s8 + $0xb90] sm:$0xff] }
 0x2df   : > { %7192 = vmatprep.subr.bf16.mxu1 %v9360_v52  ;;  %v9448_v52 = vcombine.high %v909_v0, %v913_v46  ;;  %v777_v53 = vld [vmem:[%s10696_s8 + $0xbb0] sm:$0xff] }
 0x2e0   : > { %v6892_v5 = vpop.f32.mrf.mxu0  ;;  %v765_v62 = vld [vmem:[%s10696_s8 + $0xb50] sm:$0xff]  ;;  %v9311_v3 = vcombine.low %v773_v8, %v777_v53 }
 0x2e1   : > { %v11399_v10 = vadd.f32 %v6892_v5, %v6852_v33  ;;  %7152 = vmatpush1.bf16.msra.mxu0 %v9231_v56  ;;  %v661_v33 = vld [vmem:[%s10696_s8 + $0x810] sm:$0xff]  ;;  %v9319_v56 = vcombine.low %v781_v43, %v785_v44 }
 0x2e2   : > { %7193 = vmatpush1.bf16.msra.mxu1 %v9359_v57  ;;  %v6894_v11 = vpop.f32.mrf.mxu0  ;;  %7153 = vmatprep.subr.bf16.mxu0 %v9224_v60  ;;  %v9200_v41 = vcombine.high %v661_v33, %v665_v34  ;;  %v9199_v47 = vcombine.low %v661_v33, %v665_v34  ;;  %v9447_v57 = vcombine.low %v909_v0, %v913_v46  ;;  %v769_v1 = vld [vmem:[%s10696_s8 + $0xb70] sm:$0xff] }
 0x2e3   : > { %v11401_v21 = vadd.f32 %v6894_v11, %v6854_v42  ;;  %7194 = vmatprep.subr.bf16.mxu1 %v9352_v61  ;;  %v9328_v42 = vcombine.high %v789_v35, %v793_v37  ;;  %v9312_v60 = vcombine.high %v773_v8, %v777_v53  ;;  %v9440_v61 = vcombine.high %v901_v54, %v905_v55  ;;  %v893_v5 = vld [vmem:[%s10696_s8 + $0xf50] sm:$0xff] }
 0x2e4   : > { %v6896_v17 = vpop.f32.mrf.mxu0  ;;  %v897_v63 = vld [vmem:[%s10696_s8 + $0xf70] sm:$0xff]  ;;  %v9304_v11 = vcombine.high %v765_v62, %v769_v1 }
 0x2e5   : > { %7154 = vmatpush1.bf16.msra.mxu0 %v9223_v4  ;;  %v9439_v4 = vcombine.low %v901_v54, %v905_v55  ;;  %v885_v22 = vld [vmem:[%s10696_s8 + $0xf10] sm:$0xff]  ;;  %v9303_v17 = vcombine.low %v765_v62, %v769_v1  ;;  %v9431_v24 = vcombine.low %v893_v5, %v897_v63 }
 0x2e6   : > { %7195 = vmatpush1.bf16.msra.mxu1 %v9351_v12  ;;  %v6897_v27 = vpop.f32.mrf.mxu0  ;;  %7155 = vmatprep.subr.bf16.mxu0 %v9216_v19  ;;  %v9432_v12 = vcombine.high %v893_v5, %v897_v63  ;;  %v757_v19 = vld [vmem:[%s10696_s8 + $0xb10] sm:$0xff] }
 0x2e7   : > { %7196 = vmatprep.subr.bf16.mxu1 %v9344_v13  ;;  %v761_v13 = vld [vmem:[%s10696_s8 + $0xb30] sm:$0xff] }
 0x2e8   : > { %v889_v23 = vld [vmem:[%s10696_s8 + $0xf30] sm:$0xff]  ;;  %v9296_v25 = vcombine.high %v757_v19, %v761_v13  ;;  %v9295_v33 = vcombine.low %v757_v19, %v761_v13 }
 0x2e9   : > { %7156 = vmatpush1.bf16.msra.mxu0 %v9215_v26  ;;  %v9424_v26 = vcombine.high %v885_v22, %v889_v23  ;;  %v749_v27 = vld [vmem:[%s10696_s8 + $0xad0] sm:$0xff]  ;;  %v9423_v34 = vcombine.low %v885_v22, %v889_v23 }
 0x2ea   : > { %7197 = vmatpush1.bf16.msra.mxu1 %v9343_v29  ;;  %7157 = vmatprep.subr.bf16.mxu0 %v9208_v30  ;;  %v753_v29 = vld [vmem:[%s10696_s8 + $0xaf0] sm:$0xff] }
 0x2eb   : > { %7198 = vmatprep.subr.bf16.mxu1 %v9336_v32  ;;  %v877_v30 = vld [vmem:[%s10696_s8 + $0xed0] sm:$0xff]  ;;  %v9288_v35 = vcombine.high %v749_v27, %v753_v29  ;;  %v9287_v43 = vcombine.low %v749_v27, %v753_v29 }
 0x2ec   : > { %v881_v32 = vld [vmem:[%s10696_s8 + $0xef0] sm:$0xff] }
 0x2ed   : > { %7158 = vmatpush1.bf16.msra.mxu0 %v9207_v38  ;;  %v9416_v37 = vcombine.high %v877_v30, %v881_v32  ;;  %v741_v38 = vld [vmem:[%s10696_s8 + $0xa90] sm:$0xff]  ;;  %v9415_v44 = vcombine.low %v877_v30, %v881_v32 }
 0x2ee   : > { %7199 = vmatpush1.bf16.msra.mxu1 %v9335_v39  ;;  %7159 = vmatprep.subr.bf16.mxu0 %v9200_v41  ;;  %v745_v39 = vld [vmem:[%s10696_s8 + $0xab0] sm:$0xff] }
 0x2ef   : > { %7200 = vmatprep.subr.bf16.mxu1 %v9328_v42  ;;  %v869_v41 = vld [vmem:[%s10696_s8 + $0xe90] sm:$0xff]  ;;  %v9280_v0 = vcombine.high %v741_v38, %v745_v39  ;;  %v9279_v8 = vcombine.low %v741_v38, %v745_v39 }
 0x2f0   : > { %v873_v42 = vld [vmem:[%s10696_s8 + $0xeb0] sm:$0xff] }
 0x2f1   : > { %7160 = vmatpush1.bf16.msra.mxu0 %v9199_v47  ;;  %v9408_v46 = vcombine.high %v869_v41, %v873_v42  ;;  %v733_v47 = vld [vmem:[%s10696_s8 + $0xa50] sm:$0xff]  ;;  %v9407_v53 = vcombine.low %v869_v41, %v873_v42 }
 0x2f2   : > { %7201 = vmatpush1.bf16.msra.mxu1 %v9327_v49  ;;  %7161 = vmatprep.subr.bf16.mxu0 %v9320_v50  ;;  %v737_v49 = vld [vmem:[%s10696_s8 + $0xa70] sm:$0xff] }
 0x2f3   : > { %7202 = vmatprep.subr.bf16.mxu1 %v9448_v52  ;;  %v861_v50 = vld [vmem:[%s10696_s8 + $0xe50] sm:$0xff]  ;;  %v9272_v54 = vcombine.high %v733_v47, %v737_v49  ;;  %v9271_v62 = vcombine.low %v733_v47, %v737_v49 }
 0x2f4   : > { %v865_v52 = vld [vmem:[%s10696_s8 + $0xe70] sm:$0xff] }
 0x2f5   : > { %7162 = vmatpush2.bf16.msra.mxu0 %v9319_v56  ;;  %v9400_v55 = vcombine.high %v861_v50, %v865_v52  ;;  %v725_v56 = vld [vmem:[%s10696_s8 + $0xa10] sm:$0xff]  ;;  %v9399_v1 = vcombine.low %v861_v50, %v865_v52 }
 0x2f6   : > { %7203 = vmatpush2.bf16.msra.mxu1 %v9447_v57  ;;  %7163 = vmatprep.subr.bf16.mxu0 %v9312_v60  ;;  %v729_v57 = vld [vmem:[%s10696_s8 + $0xa30] sm:$0xff] }
 0x2f7   : > { %7204 = vmatprep.subr.bf16.mxu1 %v9440_v61  ;;  %v853_v60 = vld [vmem:[%s10696_s8 + $0xe10] sm:$0xff]  ;;  %v9264_v5 = vcombine.high %v725_v56, %v729_v57  ;;  %v9263_v19 = vcombine.low %v725_v56, %v729_v57 }
 0x2f8   : > { %v857_v61 = vld [vmem:[%s10696_s8 + $0xe30] sm:$0xff] }
 0x2f9   : > { %7164 = vmatpush2.bf16.msra.mxu0 %v9311_v3  ;;  %v9392_v63 = vcombine.high %v853_v60, %v857_v61  ;;  %v973_v3 = vld [vmem:[%s10696_s8 + $0x11d0] sm:$0xff]  ;;  %v9391_v13 = vcombine.low %v853_v60, %v857_v61 }
 0x2fa   : > { %7205 = vmatpush2.bf16.msra.mxu1 %v9439_v4  ;;  %7165 = vmatprep.subr.bf16.mxu0 %v9304_v11  ;;  %v977_v4 = vld [vmem:[%s10696_s8 + $0x11f0] sm:$0xff] }
 0x2fb   : > { %7206 = vmatprep.subr.bf16.mxu1 %v9432_v12  ;;  %v1101_v11 = vld [vmem:[%s10696_s8 + $0x15d0] sm:$0xff]  ;;  %v9512_v22 = vcombine.high %v973_v3, %v977_v4  ;;  %v9511_v27 = vcombine.low %v973_v3, %v977_v4 }
 0x2fc   : > { %v1105_v12 = vld [vmem:[%s10696_s8 + $0x15f0] sm:$0xff] }
 0x2fd   : > { %7166 = vmatpush2.bf16.msra.mxu0 %v9303_v17  ;;  %v9640_v23 = vcombine.high %v1101_v11, %v1105_v12  ;;  %v965_v17 = vld [vmem:[%s10696_s8 + $0x1190] sm:$0xff]  ;;  %v9639_v29 = vcombine.low %v1101_v11, %v1105_v12 }
 0x2fe   : > { %7207 = vmatpush2.bf16.msra.mxu1 %v9431_v24  ;;  %7167 = vmatprep.subr.bf16.mxu0 %v9296_v25  ;;  %v969_v24 = vld [vmem:[%s10696_s8 + $0x11b0] sm:$0xff] }
 0x2ff   : > { %7208 = vmatprep.subr.bf16.mxu1 %v9424_v26  ;;  %v1093_v25 = vld [vmem:[%s10696_s8 + $0x1590] sm:$0xff]  ;;  %v9504_v30 = vcombine.high %v965_v17, %v969_v24  ;;  %v9503_v39 = vcombine.low %v965_v17, %v969_v24 }
 0x300   : > { %v1097_v26 = vld [vmem:[%s10696_s8 + $0x15b0] sm:$0xff] }
 0x301   : > { %7168 = vmatpush2.bf16.msra.mxu0 %v9295_v33  ;;  %v9632_v32 = vcombine.high %v1093_v25, %v1097_v26  ;;  %v957_v33 = vld [vmem:[%s10696_s8 + $0x1150] sm:$0xff]  ;;  %v9631_v42 = vcombine.low %v1093_v25, %v1097_v26 }
 0x302   : > { %7209 = vmatpush2.bf16.msra.mxu1 %v9423_v34  ;;  %7169 = vmatprep.subr.bf16.mxu0 %v9288_v35  ;;  %v961_v34 = vld [vmem:[%s10696_s8 + $0x1170] sm:$0xff] }
 0x303   : > { %7210 = vmatprep.subr.bf16.mxu1 %v9416_v37  ;;  %v1085_v35 = vld [vmem:[%s10696_s8 + $0x1550] sm:$0xff] }
 0x304   : > { %v1089_v37 = vld [vmem:[%s10696_s8 + $0x1570] sm:$0xff] }
 0x305   : > { %7170 = vmatpush2.bf16.msra.mxu0 %v9287_v43  ;;  %v9496_v43 = vcombine.high %v957_v33, %v961_v34  ;;  %v953_v47 = vld [vmem:[%s10696_s8 + $0x1130] sm:$0xff] }
 0x306   : > { %7211 = vmatpush2.bf16.msra.mxu1 %v9415_v44  ;;  %7171 = vmatprep.subr.bf16.mxu0 %v9280_v0  ;;  %v9624_v0 = vcombine.high %v1085_v35, %v1089_v37  ;;  %v1077_v50 = vld [vmem:[%s10696_s8 + $0x1510] sm:$0xff] }
 0x307   : > { %7212 = vmatprep.subr.bf16.mxu1 %v9408_v46  ;;  %v949_v46 = vld [vmem:[%s10696_s8 + $0x1110] sm:$0xff] }
 0x308   : > { %v1081_v52 = vld [vmem:[%s10696_s8 + $0x1530] sm:$0xff] }
 0x309   : > { %7172 = vmatpush2.bf16.msra.mxu0 %v9279_v8  ;;  %v9495_v8 = vcombine.low %v957_v33, %v961_v34  ;;  %v9616_v56 = vcombine.high %v1077_v50, %v1081_v52  ;;  %v945_v57 = vld [vmem:[%s10696_s8 + $0x10f0] sm:$0xff] }
 0x30a   : > { %7213 = vmatpush2.bf16.msra.mxu1 %v9407_v53  ;;  %7173 = vmatprep.subr.bf16.mxu0 %v9272_v54  ;;  %v9623_v53 = vcombine.low %v1085_v35, %v1089_v37  ;;  %v9488_v54 = vcombine.high %v949_v46, %v953_v47  ;;  %v1069_v60 = vld [vmem:[%s10696_s8 + $0x14d0] sm:$0xff] }
 0x30b   : > { %7214 = vmatprep.subr.bf16.mxu1 %v9400_v55  ;;  %v1073_v61 = vld [vmem:[%s10696_s8 + $0x14f0] sm:$0xff] }
 0x30c   : > { %v933_v3 = vld [vmem:[%s10696_s8 + $0x1090] sm:$0xff]  ;;  %v9607_v17 = vcombine.low %v1069_v60, %v1073_v61 }
 0x30d   : > { %7174 = vmatpush2.bf16.msra.mxu0 %v9271_v62  ;;  %v9487_v62 = vcombine.low %v949_v46, %v953_v47  ;;  %v937_v4 = vld [vmem:[%s10696_s8 + $0x10b0] sm:$0xff] }
 0x30e   : > { %7215 = vmatpush2.bf16.msra.mxu1 %v9399_v1  ;;  %7175 = vmatprep.subr.bf16.mxu0 %v9264_v5  ;;  %v9615_v1 = vcombine.low %v1077_v50, %v1081_v52  ;;  %v1061_v12 = vld [vmem:[%s10696_s8 + $0x1490] sm:$0xff]  ;;  %v9472_v24 = vcombine.high %v933_v3, %v937_v4  ;;  %v9471_v34 = vcombine.low %v933_v3, %v937_v4 }
 0x30f   : > { %7216 = vmatprep.subr.bf16.mxu1 %v9392_v63  ;;  %v9608_v63 = vcombine.high %v1069_v60, %v1073_v61  ;;  %v1057_v33 = vld [vmem:[%s10696_s8 + $0x1470] sm:$0xff] }
 0x310   : > { %v1037_v50 = vld [vmem:[%s10696_s8 + $0x13d0] sm:$0xff] }
 0x311   : > { %7176 = vmatpush2.bf16.msra.mxu0 %v9263_v19  ;;  %v1065_v19 = vld [vmem:[%s10696_s8 + $0x14b0] sm:$0xff] }
 0x312   : > { %7217 = vmatpush2.bf16.msra.mxu1 %v9391_v13  ;;  %7227 = vmatprep.subr.bf16.mxu0 %v9512_v22  ;;  %v9600_v26 = vcombine.high %v1061_v12, %v1065_v19  ;;  %v9599_v37 = vcombine.low %v1061_v12, %v1065_v19  ;;  %v1041_v52 = vld [vmem:[%s10696_s8 + $0x13f0] sm:$0xff] }
 0x313   : > { %7268 = vmatprep.subr.bf16.mxu1 %v9640_v23  ;;  %v1157_v60 = vld [vmem:[%s10696_s8 + $0x1790] sm:$0xff] }
 0x314   : > { %7178 = vmatmul.mubr.bf16.vlgmr.msra.gmra.mxu0 %v10863_v36  ;;  %v1161_v61 = vld [vmem:[%s10696_s8 + $0x17b0] sm:$0xff] }
 0x315   : > { %v6933_v38 = vpop.f32.mrf.mxu1  ;;  %7219 = vmatmul.mubr.bf16.vlgmr.msra.gmra.mxu1 %v10867_v40  ;;  %7228 = vmatpush1.bf16.msra.mxu0 %v9511_v27  ;;  %v925_v27 = vld [vmem:[%s10696_s8 + $0x1050] sm:$0xff] }
 0x316   : > { %v6934_v41 = vadd.f32 %v6933_v38, %v11399_v10  ;;  %7269 = vmatpush1.bf16.msra.mxu1 %v9639_v29  ;;  %7229 = vmatprep.subr.bf16.mxu0 %v9504_v30  ;;  %v929_v29 = vld [vmem:[%s10696_s8 + $0x1070] sm:$0xff] }
 0x317   : > { %v6935_v44 = vpop.f32.mrf.mxu1  ;;  %7270 = vmatprep.subr.bf16.mxu1 %v9632_v32  ;;  %7259 = vmatprep.mubr.bf16.mxu0 %v10871_v48  ;;  %v1053_v32 = vld [vmem:[%s10696_s8 + $0x1450] sm:$0xff]  ;;  %v9464_v38 = vcombine.high %v925_v27, %v929_v29 }
 0x318   : > { %v6936_v49 = vadd.f32 %v6935_v44, %v11401_v21  ;;  %7300 = vmatprep.mubr.bf16.mxu1 %v10876_v51  ;;  %v941_v21 = vld [vmem:[%s10696_s8 + $0x10d0] sm:$0xff]  ;;  %v9591_v46 = vcombine.low %v1053_v32, %v1057_v33 }
 0x319   : > { %v6937_v10 = vpop.f32.mrf.mxu1  ;;  %7230 = vmatpush1.bf16.msra.mxu0 %v9503_v39  ;;  %v9480_v5 = vcombine.high %v941_v21, %v945_v57  ;;  %v9479_v22 = vcombine.low %v941_v21, %v945_v57  ;;  %v9592_v39 = vcombine.high %v1053_v32, %v1057_v33  ;;  %v1049_v44 = vld [vmem:[%s10696_s8 + $0x1430] sm:$0xff] }
 0x31a   : > { %7271 = vmatpush1.bf16.msra.mxu1 %v9631_v42  ;;  %7231 = vmatprep.subr.bf16.mxu0 %v9496_v43  ;;  %v921_v42 = vld [vmem:[%s10696_s8 + $0x1030] sm:$0xff] }
 0x31b   : > { %v6938_v55 = vpop.f32.mrf.mxu1  ;;  %7272 = vmatprep.subr.bf16.mxu1 %v9624_v0  ;;  %v1045_v43 = vld [vmem:[%s10696_s8 + $0x1410] sm:$0xff]  ;;  %v9463_v0 = vcombine.low %v925_v27, %v929_v29 }
 0x31c   : > { %v1165_v10 = vld [vmem:[%s10696_s8 + $0x17d0] sm:$0xff]  ;;  %v9576_v55 = vcombine.high %v1037_v50, %v1041_v52 }
 0x31d   : > { %7232 = vmatpush1.bf16.msra.mxu0 %v9495_v8  ;;  %v1169_v8 = vld [vmem:[%s10696_s8 + $0x17f0] sm:$0xff] }
 0x31e   : > { %7273 = vmatpush1.bf16.msra.mxu1 %v9623_v53  ;;  %7233 = vmatprep.subr.bf16.mxu0 %v9488_v54  ;;  %v9583_v54 = vcombine.low %v1045_v43, %v1049_v44  ;;  %v1029_v21 = vld [vmem:[%s10696_s8 + $0x1390] sm:$0xff] }
 0x31f   : > { %7274 = vmatprep.subr.bf16.mxu1 %v9616_v56  ;;  %v9704_v56 = vcombine.high %v1165_v10, %v1169_v8  ;;  %v1033_v57 = vld [vmem:[%s10696_s8 + $0x13b0] sm:$0xff] }
 0x320   : > { %v6974_v11 = vpop.f32.mrf.mxu0  ;;  %v1021_v3 = vld [vmem:[%s10696_s8 + $0x1350] sm:$0xff]  ;;  %v9567_v19 = vcombine.low %v1029_v21, %v1033_v57 }
 0x321   : > { %v11473_v13 = vadd.f32 %v6974_v11, %v6934_v41  ;;  %7234 = vmatpush1.bf16.msra.mxu0 %v9487_v62  ;;  %v917_v41 = vld [vmem:[%s10696_s8 + $0x1010] sm:$0xff]  ;;  %v9575_v62 = vcombine.low %v1037_v50, %v1041_v52 }
 0x322   : > { %7275 = vmatpush1.bf16.msra.mxu1 %v9615_v1  ;;  %v6976_v23 = vpop.f32.mrf.mxu0  ;;  %7235 = vmatprep.subr.bf16.mxu0 %v9480_v5  ;;  %v9456_v47 = vcombine.high %v917_v41, %v921_v42  ;;  %v9455_v53 = vcombine.low %v917_v41, %v921_v42  ;;  %v9703_v1 = vcombine.low %v1165_v10, %v1169_v8  ;;  %v1025_v4 = vld [vmem:[%s10696_s8 + $0x1370] sm:$0xff] }
 0x323   : > { %v11475_v25 = vadd.f32 %v6976_v23, %v6936_v49  ;;  %7276 = vmatprep.subr.bf16.mxu1 %v9608_v63  ;;  %v9584_v49 = vcombine.high %v1045_v43, %v1049_v44  ;;  %v9568_v5 = vcombine.high %v1029_v21, %v1033_v57  ;;  %v9696_v63 = vcombine.high %v1157_v60, %v1161_v61  ;;  %v1149_v11 = vld [vmem:[%s10696_s8 + $0x1750] sm:$0xff] }
 0x324   : > { %v6978_v30 = vpop.f32.mrf.mxu0  ;;  %v1153_v12 = vld [vmem:[%s10696_s8 + $0x1770] sm:$0xff]  ;;  %v9560_v23 = vcombine.high %v1021_v3, %v1025_v4 }
 0x325   : > { %7236 = vmatpush1.bf16.msra.mxu0 %v9479_v22  ;;  %v9695_v22 = vcombine.low %v1157_v60, %v1161_v61  ;;  %v1141_v27 = vld [vmem:[%s10696_s8 + $0x1710] sm:$0xff]  ;;  %v9559_v30 = vcombine.low %v1021_v3, %v1025_v4  ;;  %v9687_v32 = vcombine.low %v1149_v11, %v1153_v12 }
 0x326   : > { %7277 = vmatpush1.bf16.msra.mxu1 %v9607_v17  ;;  %v6979_v35 = vpop.f32.mrf.mxu0  ;;  %7237 = vmatprep.subr.bf16.mxu0 %v9472_v24  ;;  %v9688_v17 = vcombine.high %v1149_v11, %v1153_v12  ;;  %v1013_v24 = vld [vmem:[%s10696_s8 + $0x1310] sm:$0xff] }
 0x327   : > { %7278 = vmatprep.subr.bf16.mxu1 %v9600_v26  ;;  %v1017_v26 = vld [vmem:[%s10696_s8 + $0x1330] sm:$0xff] }
 0x328   : > { %v1145_v29 = vld [vmem:[%s10696_s8 + $0x1730] sm:$0xff]  ;;  %v9552_v33 = vcombine.high %v1013_v24, %v1017_v26  ;;  %v9551_v41 = vcombine.low %v1013_v24, %v1017_v26 }
 0x329   : > { %7238 = vmatpush1.bf16.msra.mxu0 %v9471_v34  ;;  %v9680_v34 = vcombine.high %v1141_v27, %v1145_v29  ;;  %v1005_v35 = vld [vmem:[%s10696_s8 + $0x12d0] sm:$0xff]  ;;  %v9679_v42 = vcombine.low %v1141_v27, %v1145_v29 }
 0x32a   : > { %7279 = vmatpush1.bf16.msra.mxu1 %v9599_v37  ;;  %7239 = vmatprep.subr.bf16.mxu0 %v9464_v38  ;;  %v1009_v37 = vld [vmem:[%s10696_s8 + $0x12f0] sm:$0xff] }
 0x32b   : > { %7280 = vmatprep.subr.bf16.mxu1 %v9592_v39  ;;  %v1133_v38 = vld [vmem:[%s10696_s8 + $0x16d0] sm:$0xff]  ;;  %v9544_v43 = vcombine.high %v1005_v35, %v1009_v37  ;;  %v9543_v50 = vcombine.low %v1005_v35, %v1009_v37 }
 0x32c   : > { %v1137_v39 = vld [vmem:[%s10696_s8 + $0x16f0] sm:$0xff] }
 0x32d   : > { %7240 = vmatpush1.bf16.msra.mxu0 %v9463_v0  ;;  %v9672_v44 = vcombine.high %v1133_v38, %v1137_v39  ;;  %v997_v0 = vld [vmem:[%s10696_s8 + $0x1290] sm:$0xff]  ;;  %v9671_v52 = vcombine.low %v1133_v38, %v1137_v39 }
 0x32e   : > { %7281 = vmatpush1.bf16.msra.mxu1 %v9591_v46  ;;  %7241 = vmatprep.subr.bf16.mxu0 %v9456_v47  ;;  %v1001_v46 = vld [vmem:[%s10696_s8 + $0x12b0] sm:$0xff] }
 0x32f   : > { %7282 = vmatprep.subr.bf16.mxu1 %v9584_v49  ;;  %v1125_v47 = vld [vmem:[%s10696_s8 + $0x1690] sm:$0xff]  ;;  %v9536_v10 = vcombine.high %v997_v0, %v1001_v46  ;;  %v9535_v21 = vcombine.low %v997_v0, %v1001_v46 }
 0x330   : > { %v1129_v49 = vld [vmem:[%s10696_s8 + $0x16b0] sm:$0xff] }
 0x331   : > { %7242 = vmatpush1.bf16.msra.mxu0 %v9455_v53  ;;  %v9664_v8 = vcombine.high %v1125_v47, %v1129_v49  ;;  %v989_v53 = vld [vmem:[%s10696_s8 + $0x1250] sm:$0xff]  ;;  %v9663_v57 = vcombine.low %v1125_v47, %v1129_v49 }
 0x332   : > { %7283 = vmatpush1.bf16.msra.mxu1 %v9583_v54  ;;  %7243 = vmatprep.subr.bf16.mxu0 %v9576_v55  ;;  %v993_v54 = vld [vmem:[%s10696_s8 + $0x1270] sm:$0xff] }
 0x333   : > { %7284 = vmatprep.subr.bf16.mxu1 %v9704_v56  ;;  %v1117_v55 = vld [vmem:[%s10696_s8 + $0x1650] sm:$0xff]  ;;  %v9528_v60 = vcombine.high %v989_v53, %v993_v54  ;;  %v9527_v3 = vcombine.low %v989_v53, %v993_v54 }
 0x334   : > { %v1121_v56 = vld [vmem:[%s10696_s8 + $0x1670] sm:$0xff] }
 0x335   : > { %7244 = vmatpush2.bf16.msra.mxu0 %v9575_v62  ;;  %v9656_v61 = vcombine.high %v1117_v55, %v1121_v56  ;;  %v981_v62 = vld [vmem:[%s10696_s8 + $0x1210] sm:$0xff]  ;;  %v9655_v4 = vcombine.low %v1117_v55, %v1121_v56 }
 0x336   : > { %7285 = vmatpush2.bf16.msra.mxu1 %v9703_v1  ;;  %7245 = vmatprep.subr.bf16.mxu0 %v9568_v5  ;;  %v985_v1 = vld [vmem:[%s10696_s8 + $0x1230] sm:$0xff] }
 0x337   : > { %7286 = vmatprep.subr.bf16.mxu1 %v9696_v63  ;;  %v1109_v5 = vld [vmem:[%s10696_s8 + $0x1610] sm:$0xff]  ;;  %v9520_v11 = vcombine.high %v981_v62, %v985_v1  ;;  %v9519_v24 = vcombine.low %v981_v62, %v985_v1 }
 0x338   : > { %v1113_v63 = vld [vmem:[%s10696_s8 + $0x1630] sm:$0xff] }
 0x339   : > { %7246 = vmatpush2.bf16.msra.mxu0 %v9567_v19  ;;  %v9648_v12 = vcombine.high %v1109_v5, %v1113_v63  ;;  %v1229_v19 = vld [vmem:[%s10696_s8 + $0x19d0] sm:$0xff]  ;;  %v9647_v26 = vcombine.low %v1109_v5, %v1113_v63 }
 0x33a   : > { %7287 = vmatpush2.bf16.msra.mxu1 %v9695_v22  ;;  %7247 = vmatprep.subr.bf16.mxu0 %v9560_v23  ;;  %v1233_v22 = vld [vmem:[%s10696_s8 + $0x19f0] sm:$0xff] }
 0x33b   : > { %7288 = vmatprep.subr.bf16.mxu1 %v9688_v17  ;;  %v1357_v23 = vld [vmem:[%s10696_s8 + $0x1dd0] sm:$0xff]  ;;  %v9768_v27 = vcombine.high %v1229_v19, %v1233_v22  ;;  %v9767_v35 = vcombine.low %v1229_v19, %v1233_v22 }
 0x33c   : > { %v1361_v17 = vld [vmem:[%s10696_s8 + $0x1df0] sm:$0xff] }
 0x33d   : > { %7248 = vmatpush2.bf16.msra.mxu0 %v9559_v30  ;;  %v9896_v29 = vcombine.high %v1357_v23, %v1361_v17  ;;  %v1221_v30 = vld [vmem:[%s10696_s8 + $0x1990] sm:$0xff]  ;;  %v9895_v37 = vcombine.low %v1357_v23, %v1361_v17 }
 0x33e   : > { %7289 = vmatpush2.bf16.msra.mxu1 %v9687_v32  ;;  %7249 = vmatprep.subr.bf16.mxu0 %v9552_v33  ;;  %v1225_v32 = vld [vmem:[%s10696_s8 + $0x19b0] sm:$0xff] }
 0x33f   : > { %7290 = vmatprep.subr.bf16.mxu1 %v9680_v34  ;;  %v1349_v33 = vld [vmem:[%s10696_s8 + $0x1d90] sm:$0xff]  ;;  %v9760_v38 = vcombine.high %v1221_v30, %v1225_v32  ;;  %v9759_v47 = vcombine.low %v1221_v30, %v1225_v32 }
 0x340   : > { %v1353_v34 = vld [vmem:[%s10696_s8 + $0x1db0] sm:$0xff] }
 0x341   : > { %7250 = vmatpush2.bf16.msra.mxu0 %v9551_v41  ;;  %v9888_v39 = vcombine.high %v1349_v33, %v1353_v34  ;;  %v1213_v41 = vld [vmem:[%s10696_s8 + $0x1950] sm:$0xff] }
 0x342   : > { %7291 = vmatpush2.bf16.msra.mxu1 %v9679_v42  ;;  %7251 = vmatprep.subr.bf16.mxu0 %v9544_v43  ;;  %v1217_v42 = vld [vmem:[%s10696_s8 + $0x1970] sm:$0xff] }
 0x343   : > { %7292 = vmatprep.subr.bf16.mxu1 %v9672_v44  ;;  %v1341_v44 = vld [vmem:[%s10696_s8 + $0x1d50] sm:$0xff]  ;;  %v9751_v62 = vcombine.low %v1213_v41, %v1217_v42 }
 0x344   : > { %v1345_v0 = vld [vmem:[%s10696_s8 + $0x1d70] sm:$0xff] }
 0x345   : > { %7252 = vmatpush2.bf16.msra.mxu0 %v9543_v50  ;;  %v9880_v53 = vcombine.high %v1341_v44, %v1345_v0  ;;  %v1205_v54 = vld [vmem:[%s10696_s8 + $0x1910] sm:$0xff]  ;;  %v9879_v63 = vcombine.low %v1341_v44, %v1345_v0 }
 0x346   : > { %7293 = vmatpush2.bf16.msra.mxu1 %v9671_v52  ;;  %7253 = vmatprep.subr.bf16.mxu0 %v9536_v10  ;;  %v9887_v52 = vcombine.low %v1349_v33, %v1353_v34  ;;  %v9752_v10 = vcombine.high %v1213_v41, %v1217_v42  ;;  %v1209_v55 = vld [vmem:[%s10696_s8 + $0x1930] sm:$0xff] }
 0x347   : > { %7294 = vmatprep.subr.bf16.mxu1 %v9664_v8  ;;  %v1325_v19 = vld [vmem:[%s10696_s8 + $0x1cd0] sm:$0xff]  ;;  %v9743_v23 = vcombine.low %v1205_v54, %v1209_v55 }
 0x348   : > { %v1329_v22 = vld [vmem:[%s10696_s8 + $0x1cf0] sm:$0xff] }
 0x349   : > { %7254 = vmatpush2.bf16.msra.mxu0 %v9535_v21  ;;  %v1317_v30 = vld [vmem:[%s10696_s8 + $0x1c90] sm:$0xff]  ;;  %v9863_v34 = vcombine.low %v1325_v19, %v1329_v22 }
 0x34a   : > { %7295 = vmatpush2.bf16.msra.mxu1 %v9663_v57  ;;  %7255 = vmatprep.subr.bf16.mxu0 %v9528_v60  ;;  %v1337_v60 = vld [vmem:[%s10696_s8 + $0x1d30] sm:$0xff] }
 0x34b   : > { %7296 = vmatprep.subr.bf16.mxu1 %v9656_v61  ;;  %v1321_v32 = vld [vmem:[%s10696_s8 + $0x1cb0] sm:$0xff] }
 0x34c   : > { %v1309_v41 = vld [vmem:[%s10696_s8 + $0x1c50] sm:$0xff]  ;;  %v9855_v44 = vcombine.low %v1317_v30, %v1321_v32 }
 0x34d   : > { %7256 = vmatpush2.bf16.msra.mxu0 %v9527_v3  ;;  %v9744_v3 = vcombine.high %v1205_v54, %v1209_v55  ;;  %v1313_v42 = vld [vmem:[%s10696_s8 + $0x1c70] sm:$0xff] }
 0x34e   : > { %7297 = vmatpush2.bf16.msra.mxu1 %v9655_v4  ;;  %7257 = vmatprep.subr.bf16.mxu0 %v9520_v11  ;;  %v1197_v11 = vld [vmem:[%s10696_s8 + $0x18d0] sm:$0xff] }
 0x34f   : > { %7298 = vmatprep.subr.bf16.mxu1 %v9648_v12  ;;  %v1201_v12 = vld [vmem:[%s10696_s8 + $0x18f0] sm:$0xff] }
 0x350   : > { %v9735_v33 = vcombine.low %v1197_v11, %v1201_v12  ;;  %v1293_v55 = vld [vmem:[%s10696_s8 + $0x1bd0] sm:$0xff] }
 0x351   : > { %7258 = vmatpush2.bf16.msra.mxu0 %v9519_v24  ;;  %v9736_v24 = vcombine.high %v1197_v11, %v1201_v12 }
 0x352   : > { %7299 = vmatpush2.bf16.msra.mxu1 %v9647_v26  ;;  %7309 = vmatprep.subr.bf16.mxu0 %v9768_v27  ;;  %v9864_v26 = vcombine.high %v1325_v19, %v1329_v22  ;;  %v1189_v27 = vld [vmem:[%s10696_s8 + $0x1890] sm:$0xff] }
 0x353   : > { %7350 = vmatprep.subr.bf16.mxu1 %v9896_v29  ;;  %v1193_v29 = vld [vmem:[%s10696_s8 + $0x18b0] sm:$0xff] }
 0x354   : > { %v7056_v43 = vpop.f32.mrf.mxu0  ;;  %7260 = vmatmul.mubr.bf16.vlgmr.msra.gmra.mxu0 %v10939_v2 }
 0x355   : > { %v7015_v46 = vpop.f32.mrf.mxu1  ;;  %7301 = vmatmul.mubr.bf16.vlgmr.msra.gmra.mxu1 %v10943_v6  ;;  %7310 = vmatpush1.bf16.msra.mxu0 %v9767_v35  ;;  %v9728_v35 = vcombine.high %v1189_v27, %v1193_v29 }
 0x356   : > { %v7016_v49 = vadd.f32 %v7015_v46, %v11473_v13  ;;  %7351 = vmatpush1.bf16.msra.mxu1 %v9895_v37  ;;  %v7058_v50 = vpop.f32.mrf.mxu0  ;;  %7311 = vmatprep.subr.bf16.mxu0 %v9760_v38  ;;  %v1333_v13 = vld [vmem:[%s10696_s8 + $0x1d10] sm:$0xff]  ;;  %v9856_v37 = vcombine.high %v1317_v30, %v1321_v32  ;;  %v9848_v46 = vcombine.high %v1309_v41, %v1313_v42 }
 0x357   : > { %v7017_v8 = vpop.f32.mrf.mxu1  ;;  %7352 = vmatprep.subr.bf16.mxu1 %v9888_v39  ;;  %9941 = vmatprep.mubr.msk.bf16.mxu1 %vm6403_vm0, %v10947_v14  ;;  %v9872_v4 = vcombine.high %v1333_v13, %v1337_v60  ;;  %v9871_v17 = vcombine.low %v1333_v13, %v1337_v60  ;;  %v1181_v38 = vld [vmem:[%s10696_s8 + $0x1850] sm:$0xff] }
 0x358   : > { %v11536_v56 = vadd.f32 %v7056_v43, %v7016_v49  ;;  %v7018_v21 = vadd.f32 %v7017_v8, %v11475_v25  ;;  %v7060_v57 = vpop.f32.mrf.mxu0  ;;  %7341 = vmatprep.mubr.bf16.mxu0 %v10952_v18  ;;  %v1185_v39 = vld [vmem:[%s10696_s8 + $0x1870] sm:$0xff]  ;;  %v9727_v43 = vcombine.low %v1189_v27, %v1193_v29  ;;  %v9847_v8 = vcombine.low %v1309_v41, %v1313_v42 }
 0x359   : > { %v7019_v61 = vpop.f32.mrf.mxu1  ;;  %7312 = vmatpush1.bf16.msra.mxu0 %v9759_v47  ;;  %v9720_v0 = vcombine.high %v1181_v38, %v1185_v39  ;;  %v1173_v47 = vld [vmem:[%s10696_s8 + $0x1810] sm:$0xff] }
 0x35a   : > { %v11542_v1 = vadd.f32 %v7058_v50, %v7018_v21  ;;  %7353 = vmatpush1.bf16.msra.mxu1 %v9887_v52  ;;  %v7061_v5 = vpop.f32.mrf.mxu0  ;;  %7313 = vmatprep.subr.bf16.mxu0 %v9752_v10  ;;  %v1177_v49 = vld [vmem:[%s10696_s8 + $0x1830] sm:$0xff]  ;;  %v9719_v10 = vcombine.low %v1181_v38, %v1185_v39 }
 0x35b   : > { %v7020_v25 = vpop.f32.mrf.mxu1  ;;  %7354 = vmatprep.subr.bf16.mxu1 %v9880_v53  ;;  %v1301_v50 = vld [vmem:[%s10696_s8 + $0x1c10] sm:$0xff]  ;;  %v9712_v53 = vcombine.high %v1173_v47, %v1177_v49  ;;  %v9711_v60 = vcombine.low %v1173_v47, %v1177_v49 }
 0x35c   : > { %v1305_v52 = vld [vmem:[%s10696_s8 + $0x1c30] sm:$0xff] }
 0x35d   : > { %7314 = vmatpush1.bf16.msra.mxu0 %v9751_v62  ;;  %v9840_v54 = vcombine.high %v1301_v50, %v1305_v52  ;;  %v1297_v21 = vld [vmem:[%s10696_s8 + $0x1bf0] sm:$0xff]  ;;  %v9839_v61 = vcombine.low %v1301_v50, %v1305_v52 }
 0x35e   : > { %7355 = vmatpush1.bf16.msra.mxu1 %v9879_v63  ;;  %7315 = vmatprep.subr.bf16.mxu0 %v9744_v3  ;;  %v1397_v57 = vld [vmem:[%s10696_s8 + $0x1f10] sm:$0xff]  ;;  %v9832_v62 = vcombine.high %v1293_v55, %v1297_v21  ;;  %v9831_v11 = vcombine.low %v1293_v55, %v1297_v21 }
 0x35f   : > { %7356 = vmatprep.subr.bf16.mxu1 %v9872_v4  ;;  %v1401_v13 = vld [vmem:[%s10696_s8 + $0x1f30] sm:$0xff] }
 0x360   : > { %v9936_v5 = vcombine.high %v1397_v57, %v1401_v13  ;;  %v1285_v63 = vld [vmem:[%s10696_s8 + $0x1b90] sm:$0xff]  ;;  %v9935_v12 = vcombine.low %v1397_v57, %v1401_v13 }
 0x361   : > { %7316 = vmatpush1.bf16.msra.mxu0 %v9743_v23  ;;  %v1289_v3 = vld [vmem:[%s10696_s8 + $0x1bb0] sm:$0xff] }
 0x362   : > { %7357 = vmatpush1.bf16.msra.mxu1 %v9871_v17  ;;  %7317 = vmatprep.subr.bf16.mxu0 %v9736_v24  ;;  %v1389_v25 = vld [vmem:[%s10696_s8 + $0x1ed0] sm:$0xff]  ;;  %v9824_v19 = vcombine.high %v1285_v63, %v1289_v3  ;;  %v9823_v27 = vcombine.low %v1285_v63, %v1289_v3 }
 0x363   : > { %7358 = vmatprep.subr.bf16.mxu1 %v9864_v26  ;;  %v1393_v4 = vld [vmem:[%s10696_s8 + $0x1ef0] sm:$0xff] }
 0x364   : > { %v9928_v22 = vcombine.high %v1389_v25, %v1393_v4  ;;  %v1277_v23 = vld [vmem:[%s10696_s8 + $0x1b50] sm:$0xff]  ;;  %v9927_v29 = vcombine.low %v1389_v25, %v1393_v4 }
 0x365   : > { %7318 = vmatpush1.bf16.msra.mxu0 %v9735_v33  ;;  %v1281_v17 = vld [vmem:[%s10696_s8 + $0x1b70] sm:$0xff] }
 0x366   : > { %7359 = vmatpush1.bf16.msra.mxu1 %v9863_v34  ;;  %7319 = vmatprep.subr.bf16.mxu0 %v9728_v35  ;;  %v1381_v24 = vld [vmem:[%s10696_s8 + $0x1e90] sm:$0xff]  ;;  %v9816_v30 = vcombine.high %v1277_v23, %v1281_v17  ;;  %v9815_v38 = vcombine.low %v1277_v23, %v1281_v17 }
 0x367   : > { %7360 = vmatprep.subr.bf16.mxu1 %v9856_v37  ;;  %v1385_v26 = vld [vmem:[%s10696_s8 + $0x1eb0] sm:$0xff] }
 0x368   : > { %v9920_v32 = vcombine.high %v1381_v24, %v1385_v26  ;;  %v1269_v33 = vld [vmem:[%s10696_s8 + $0x1b10] sm:$0xff]  ;;  %v9919_v39 = vcombine.low %v1381_v24, %v1385_v26 }
 0x369   : > { %7320 = vmatpush1.bf16.msra.mxu0 %v9727_v43  ;;  %v1273_v34 = vld [vmem:[%s10696_s8 + $0x1b30] sm:$0xff] }
 0x36a   : > { %7361 = vmatpush1.bf16.msra.mxu1 %v9855_v44  ;;  %7321 = vmatprep.subr.bf16.mxu0 %v9720_v0  ;;  %v1373_v35 = vld [vmem:[%s10696_s8 + $0x1e50] sm:$0xff]  ;;  %v9808_v41 = vcombine.high %v1269_v33, %v1273_v34  ;;  %v9807_v47 = vcombine.low %v1269_v33, %v1273_v34 }
 0x36b   : > { %7362 = vmatprep.subr.bf16.mxu1 %v9848_v46  ;;  %v1377_v37 = vld [vmem:[%s10696_s8 + $0x1e70] sm:$0xff] }
 0x36c   : > { %v9912_v42 = vcombine.high %v1373_v35, %v1377_v37  ;;  %v1261_v43 = vld [vmem:[%s10696_s8 + $0x1ad0] sm:$0xff]  ;;  %v9911_v49 = vcombine.low %v1373_v35, %v1377_v37 }
 0x36d   : > { %7322 = vmatpush1.bf16.msra.mxu0 %v9719_v10  ;;  %v1265_v44 = vld [vmem:[%s10696_s8 + $0x1af0] sm:$0xff] }
 0x36e   : > { %7363 = vmatpush1.bf16.msra.mxu1 %v9847_v8  ;;  %7323 = vmatprep.subr.bf16.mxu0 %v9712_v53  ;;  %v1365_v0 = vld [vmem:[%s10696_s8 + $0x1e10] sm:$0xff]  ;;  %v9800_v50 = vcombine.high %v1261_v43, %v1265_v44  ;;  %v462_v53 = vld [vmem:[%s10696_s8 + $0x1d8] sm:$0xff]  ;;  %v9799_v55 = vcombine.low %v1261_v43, %v1265_v44 }
 0x36f   : > { %7364 = vmatprep.subr.bf16.mxu1 %v9840_v54  ;;  %v1369_v46 = vld [vmem:[%s10696_s8 + $0x1e30] sm:$0xff]  ;;  %v466_v54 = vld [vmem:[%s10696_s8 + $0x1f8] sm:$0xff] }
 0x370   : > { %v9904_v52 = vcombine.high %v1365_v0, %v1369_v46  ;;  %v1253_v10 = vld [vmem:[%s10696_s8 + $0x1a90] sm:$0xff]  ;;  %v9903_v21 = vcombine.low %v1365_v0, %v1369_v46  ;;  %v9002_v13 = vcombine.high %v462_v53, %v466_v54  ;;  %v9001_v3 = vcombine.low %v462_v53, %v466_v54  ;;  %v574_v46 = vld [vmem:[%s10696_s8 + $0x558] sm:$0xff] }
 0x371   : > { %7324 = vmatpush1.bf16.msra.mxu0 %v9711_v60  ;;  %v1257_v8 = vld [vmem:[%s10696_s8 + $0x1ab0] sm:$0xff] }
 0x372   : > { %7365 = vmatpush1.bf16.msra.mxu1 %v9839_v61  ;;  %7325 = vmatprep.subr.bf16.mxu0 %v9832_v62  ;;  %v9792_v57 = vcombine.high %v1253_v10, %v1257_v8  ;;  %v1245_v60 = vld [vmem:[%s10696_s8 + $0x1a50] sm:$0xff]  ;;  %v454_v62 = vld [vmem:[%s10696_s8 + $0x198] sm:$0xff]  ;;  %v9791_v63 = vcombine.low %v1253_v10, %v1257_v8 }
 0x373   : > { %7372 = vmatprep.subr.bf16.mxu1 %v9936_v5  ;;  %v1249_v61 = vld [vmem:[%s10696_s8 + $0x1a70] sm:$0xff]  ;;  %v458_v5 = vld [vmem:[%s10696_s8 + $0x1b8] sm:$0xff] }
 0x374   : > { %v9784_v25 = vcombine.high %v1245_v60, %v1249_v61  ;;  %v8994_v4 = vcombine.high %v454_v62, %v458_v5  ;;  %v9783_v23 = vcombine.low %v1245_v60, %v1249_v61  ;;  %v8993_v17 = vcombine.low %v454_v62, %v458_v5  ;;  %v566_v60 = vld [vmem:[%s10696_s8 + $0x518] sm:$0xff] }
 0x375   : > { %7326 = vmatpush2.bf16.msra.mxu0 %v9831_v11  ;;  %v1237_v11 = vld [vmem:[%s10696_s8 + $0x1a10] sm:$0xff]  ;;  %v570_v61 = vld [vmem:[%s10696_s8 + $0x538] sm:$0xff] }
 0x376   : > { %7373 = vmatpush2.bf16.msra.mxu1 %v9935_v12  ;;  %7327 = vmatprep.subr.bf16.mxu0 %v9824_v19  ;;  %v1241_v12 = vld [vmem:[%s10696_s8 + $0x1a30] sm:$0xff]  ;;  %v446_v19 = vld [vmem:[%s10696_s8 + $0x158] sm:$0xff] }
 0x377   : > { %7374 = vmatprep.subr.bf16.mxu1 %v9928_v22  ;;  %v450_v22 = vld [vmem:[%s10696_s8 + $0x178] sm:$0xff]  ;;  %v9776_v24 = vcombine.high %v1237_v11, %v1241_v12  ;;  %v9775_v33 = vcombine.low %v1237_v11, %v1241_v12  ;;  %v9106_v12 = vcombine.high %v566_v60, %v570_v61 }
 0x378   : > { %v8986_v26 = vcombine.high %v446_v19, %v450_v22  ;;  %v8985_v34 = vcombine.low %v446_v19, %v450_v22 }
 0x379   : > { %7328 = vmatpush2.bf16.msra.mxu0 %v9823_v27  ;;  %v590_v27 = vld [vmem:[%s10696_s8 + $0x5d8] sm:$0xff] }
 0x37a   : > { %7375 = vmatpush2.bf16.msra.mxu1 %v9927_v29  ;;  %7329 = vmatprep.subr.bf16.mxu0 %v9816_v30  ;;  %v594_v29 = vld [vmem:[%s10696_s8 + $0x5f8] sm:$0xff] }
 0x37b   : > { %7376 = vmatprep.subr.bf16.mxu1 %v9920_v32  ;;  %v438_v30 = vld [vmem:[%s10696_s8 + $0x118] sm:$0xff]  ;;  %v9130_v35 = vcombine.high %v590_v27, %v594_v29 }
 0x37c   : > { %v442_v32 = vld [vmem:[%s10696_s8 + $0x138] sm:$0xff] }
 0x37d   : > { %7330 = vmatpush2.bf16.msra.mxu0 %v9815_v38  ;;  %v8978_v37 = vcombine.high %v438_v30, %v442_v32  ;;  %v582_v38 = vld [vmem:[%s10696_s8 + $0x598] sm:$0xff]  ;;  %v8977_v43 = vcombine.low %v438_v30, %v442_v32 }
 0x37e   : > { %7377 = vmatpush2.bf16.msra.mxu1 %v9919_v39  ;;  %7331 = vmatprep.subr.bf16.mxu0 %v9808_v41  ;;  %v586_v39 = vld [vmem:[%s10696_s8 + $0x5b8] sm:$0xff] }
 0x37f   : > { %7378 = vmatprep.subr.bf16.mxu1 %v9912_v42  ;;  %v430_v41 = vld [vmem:[%s10696_s8 + $0xd8] sm:$0xff]  ;;  %v9122_v44 = vcombine.high %v582_v38, %v586_v39  ;;  %v9121_v8 = vcombine.low %v582_v38, %v586_v39 }
 0x380   : > { %v434_v42 = vld [vmem:[%s10696_s8 + $0xf8] sm:$0xff] }
 0x381   : > { %7332 = vmatpush2.bf16.msra.mxu0 %v9807_v47  ;;  %v8970_v0 = vcombine.high %v430_v41, %v434_v42  ;;  %v578_v47 = vld [vmem:[%s10696_s8 + $0x578] sm:$0xff] }
 0x382   : > { %7379 = vmatpush2.bf16.msra.mxu1 %v9911_v49  ;;  %7333 = vmatprep.subr.bf16.mxu0 %v9800_v50  ;;  %v422_v50 = vld [vmem:[%s10696_s8 + $0x98] sm:$0xff] }
 0x383   : > { %7380 = vmatprep.subr.bf16.mxu1 %v9904_v52  ;;  %v426_v52 = vld [vmem:[%s10696_s8 + $0xb8] sm:$0xff] }
 0x384   : > { %v8961_v11 = vcombine.low %v422_v50, %v426_v52 }
 0x385   : > { %7334 = vmatpush2.bf16.msra.mxu0 %v9799_v55  ;;  %v8969_v55 = vcombine.low %v430_v41, %v434_v42 }
 0x386   : > { %7381 = vmatpush2.bf16.msra.mxu1 %v9903_v21  ;;  %7335 = vmatprep.subr.bf16.mxu0 %v9792_v57  ;;  %v9114_v21 = vcombine.high %v574_v46, %v578_v47 }
 0x387   : > { %7391 = vmatprep.subr.bf16.mxu1 %v9002_v13  ;;  %v8962_v13 = vcombine.high %v422_v50, %v426_v52  ;;  %v534_v52 = vld [vmem:[%s10696_s8 + $0x418] sm:$0xff] }
 0x389   : > { %7383 = vmatmul.mubr.bf16.vlgmr.msra.gmra.mxu1 %v11006_v15  ;;  %7336 = vmatpush2.bf16.msra.mxu0 %v9791_v63  ;;  %v414_v63 = vld [vmem:[%s10696_s8 + $0x58] sm:$0xff] }
 0x38a   : > { %7392 = vmatpush1.bf16.msra.mxu1 %v9001_v3  ;;  %7337 = vmatprep.subr.bf16.mxu0 %v9784_v25  ;;  %v9113_v25 = vcombine.low %v574_v46, %v578_v47 }
 0x38b   : > { %7393 = vmatprep.subr.bf16.mxu1 %v8994_v4  ;;  %7423 = vmatprep.mubr.bf16.mxu1 %v10741_v58  ;;  %v9129_v58 = vcombine.low %v590_v27, %v594_v29  ;;  %v9105_v27 = vcombine.low %v566_v60, %v570_v61  ;;  %v654_v60 = vld [vmem:[%s10696_s8 + $0x7d8] sm:$0xff] }
 0x38c   : > { %v658_v61 = vld [vmem:[%s10696_s8 + $0x7f8] sm:$0xff] }
 0x38d   : > { %7338 = vmatpush2.bf16.msra.mxu0 %v9783_v23  ;;  %v558_v23 = vld [vmem:[%s10696_s8 + $0x4d8] sm:$0xff] }
 0x38e   : > { %7394 = vmatpush1.bf16.msra.mxu1 %v8993_v17  ;;  %7339 = vmatprep.subr.bf16.mxu0 %v9776_v24  ;;  %v562_v17 = vld [vmem:[%s10696_s8 + $0x4f8] sm:$0xff] }
 0x38f   : > { %7395 = vmatprep.subr.bf16.mxu1 %v8986_v26  ;;  %v406_v24 = vld [vmem:[%s10696_s8 + $0x18] sm:$0xff]  ;;  %v9098_v30 = vcombine.high %v558_v23, %v562_v17  ;;  %v9097_v38 = vcombine.low %v558_v23, %v562_v17  ;;  %v9193_v23 = vcombine.low %v654_v60, %v658_v61 }
 0x390   : > { %v410_v26 = vld [vmem:[%s10696_s8 + $0x38] sm:$0xff] }
 0x391   : > { %7340 = vmatpush2.bf16.msra.mxu0 %v9775_v33  ;;  %v8946_v32 = vcombine.high %v406_v24, %v410_v26  ;;  %v550_v33 = vld [vmem:[%s10696_s8 + $0x498] sm:$0xff]  ;;  %v8945_v39 = vcombine.low %v406_v24, %v410_v26 }
 0x392   : > { %7396 = vmatpush1.bf16.msra.mxu1 %v8985_v34  ;;  %7432 = vmatprep.subr.bf16.mxu0 %v9130_v35  ;;  %v554_v34 = vld [vmem:[%s10696_s8 + $0x4b8] sm:$0xff] }
 0x393   : > { %7397 = vmatprep.subr.bf16.mxu1 %v8978_v37  ;;  %v526_v35 = vld [vmem:[%s10696_s8 + $0x3d8] sm:$0xff]  ;;  %v9090_v41 = vcombine.high %v550_v33, %v554_v34  ;;  %v9089_v46 = vcombine.low %v550_v33, %v554_v34 }
 0x394   : > { %v7097_v49 = vpop.f32.mrf.mxu0  ;;  %7342 = vmatmul.mubr.bf16.vlgmr.msra.gmra.mxu0 %v11020_v45  ;;  %v530_v37 = vld [vmem:[%s10696_s8 + $0x3f8] sm:$0xff] }
 0x395   : > { %v7138_v10 = vpop.f32.mrf.mxu1  ;;  %7433 = vmatpush1.bf16.msra.mxu0 %v9129_v58  ;;  %7464 = vmatprep.mubr.bf16.mxu0 %v10743_v59  ;;  %v418_v59 = vld [vmem:[%s10696_s8 + $0x78] sm:$0xff]  ;;  %v9066_v42 = vcombine.high %v526_v35, %v530_v37  ;;  %v9065_v47 = vcombine.low %v526_v35, %v530_v37 }
 0x396   : > { %v11608_v53 = vadd.f32 %v7138_v10, %v7097_v49  ;;  %7398 = vmatpush1.bf16.msra.mxu1 %v8977_v43  ;;  %v7099_v54 = vpop.f32.mrf.mxu0  ;;  %7434 = vmatprep.subr.bf16.mxu0 %v9122_v44  ;;  %v8954_v22 = vcombine.high %v414_v63, %v418_v59  ;;  %v8953_v29 = vcombine.low %v414_v63, %v418_v59  ;;  %v542_v58 = vld [vmem:[%s10696_s8 + $0x458] sm:$0xff] }
 0x397   : > { %v7140_v57 = vpop.f32.mrf.mxu1  ;;  %7399 = vmatprep.subr.bf16.mxu1 %v8970_v0  ;;  %v546_v43 = vld [vmem:[%s10696_s8 + $0x478] sm:$0xff] }
 0x398   : > { %v11612_v62 = vadd.f32 %v7140_v57, %v7099_v54  ;;  %v7101_v5 = vpop.f32.mrf.mxu0  ;;  %v518_v44 = vld [vmem:[%s10696_s8 + $0x398] sm:$0xff]  ;;  %v9082_v49 = vcombine.high %v542_v58, %v546_v43 }
 0x399   : > { %v7142_v3 = vpop.f32.mrf.mxu1  ;;  %7435 = vmatpush1.bf16.msra.mxu0 %v9121_v8  ;;  %v522_v0 = vld [vmem:[%s10696_s8 + $0x3b8] sm:$0xff] }
 0x39a   : > { %7400 = vmatpush1.bf16.msra.mxu1 %v8969_v55  ;;  %v7102_v4 = vpop.f32.mrf.mxu0  ;;  %7436 = vmatprep.subr.bf16.mxu0 %v9114_v21  ;;  %v9058_v50 = vcombine.high %v518_v44, %v522_v0  ;;  %v538_v10 = vld [vmem:[%s10696_s8 + $0x438] sm:$0xff]  ;;  %v9081_v55 = vcombine.low %v542_v58, %v546_v43  ;;  %v9057_v21 = vcombine.low %v518_v44, %v522_v0 }
 0x39b   : > { %v7143_v19 = vpop.f32.mrf.mxu1  ;;  %7401 = vmatprep.subr.bf16.mxu1 %v8962_v13  ;;  %v510_v8 = vld [vmem:[%s10696_s8 + $0x358] sm:$0xff]  ;;  %v9074_v57 = vcombine.high %v534_v52, %v538_v10  ;;  %v9073_v59 = vcombine.low %v534_v52, %v538_v10 }
 0x39c   : > { %v514_v54 = vld [vmem:[%s10696_s8 + $0x378] sm:$0xff] }
 0x39d   : > { %7437 = vmatpush1.bf16.msra.mxu0 %v9113_v25  ;;  %v9050_v13 = vcombine.high %v510_v8, %v514_v54  ;;  %v502_v5 = vld [vmem:[%s10696_s8 + $0x318] sm:$0xff]  ;;  %v9049_v3 = vcombine.low %v510_v8, %v514_v54  ;;  %v9194_v25 = vcombine.high %v654_v60, %v658_v61 }
 0x39e   : > { %7402 = vmatpush1.bf16.msra.mxu1 %v8961_v11  ;;  %7438 = vmatprep.subr.bf16.mxu0 %v9106_v12  ;;  %v506_v63 = vld [vmem:[%s10696_s8 + $0x338] sm:$0xff] }
 0x39f   : > { %7403 = vmatprep.subr.bf16.mxu1 %v8954_v22  ;;  %v9042_v4 = vcombine.high %v502_v5, %v506_v63  ;;  %v646_v11 = vld [vmem:[%s10696_s8 + $0x798] sm:$0xff]  ;;  %v9041_v17 = vcombine.low %v502_v5, %v506_v63 }
 0x3a0   : > { %v650_v12 = vld [vmem:[%s10696_s8 + $0x7b8] sm:$0xff] }
 0x3a1   : > { %7439 = vmatpush1.bf16.msra.mxu0 %v9105_v27  ;;  %v494_v19 = vld [vmem:[%s10696_s8 + $0x2d8] sm:$0xff]  ;;  %v9186_v24 = vcombine.high %v646_v11, %v650_v12  ;;  %v9185_v33 = vcombine.low %v646_v11, %v650_v12 }
 0x3a2   : > { %7404 = vmatpush1.bf16.msra.mxu1 %v8953_v29  ;;  %7440 = vmatprep.subr.bf16.mxu0 %v9098_v30  ;;  %v498_v22 = vld [vmem:[%s10696_s8 + $0x2f8] sm:$0xff] }
 0x3a3   : > { %7405 = vmatprep.subr.bf16.mxu1 %v8946_v32  ;;  %v9034_v26 = vcombine.high %v494_v19, %v498_v22  ;;  %v638_v27 = vld [vmem:[%s10696_s8 + $0x758] sm:$0xff]  ;;  %v9033_v34 = vcombine.low %v494_v19, %v498_v22 }
 0x3a4   : > { %v642_v29 = vld [vmem:[%s10696_s8 + $0x778] sm:$0xff] }
 0x3a5   : > { %7441 = vmatpush1.bf16.msra.mxu0 %v9097_v38  ;;  %v486_v30 = vld [vmem:[%s10696_s8 + $0x298] sm:$0xff]  ;;  %v9178_v35 = vcombine.high %v638_v27, %v642_v29  ;;  %v9177_v58 = vcombine.low %v638_v27, %v642_v29 }
 0x3a6   : > { %7406 = vmatpush1.bf16.msra.mxu1 %v8945_v39  ;;  %7442 = vmatprep.subr.bf16.mxu0 %v9090_v41  ;;  %v490_v32 = vld [vmem:[%s10696_s8 + $0x2b8] sm:$0xff] }
 0x3a7   : > { %7407 = vmatprep.subr.bf16.mxu1 %v9066_v42  ;;  %v9026_v37 = vcombine.high %v486_v30, %v490_v32  ;;  %v630_v38 = vld [vmem:[%s10696_s8 + $0x718] sm:$0xff]  ;;  %v9025_v43 = vcombine.low %v486_v30, %v490_v32 }
 0x3a8   : > { %v634_v39 = vld [vmem:[%s10696_s8 + $0x738] sm:$0xff] }
 0x3a9   : > { %7443 = vmatpush1.bf16.msra.mxu0 %v9089_v46  ;;  %v478_v41 = vld [vmem:[%s10696_s8 + $0x258] sm:$0xff]  ;;  %v9170_v44 = vcombine.high %v630_v38, %v634_v39  ;;  %v9169_v52 = vcombine.low %v630_v38, %v634_v39 }
 0x3aa   : > { %7408 = vmatpush2.bf16.msra.mxu1 %v9065_v47  ;;  %7444 = vmatprep.subr.bf16.mxu0 %v9082_v49  ;;  %v482_v42 = vld [vmem:[%s10696_s8 + $0x278] sm:$0xff] }
 0x3ab   : > { %7409 = vmatprep.subr.bf16.mxu1 %v9058_v50  ;;  %v9018_v0 = vcombine.high %v478_v41, %v482_v42  ;;  %v622_v46 = vld [vmem:[%s10696_s8 + $0x6d8] sm:$0xff]  ;;  %v9017_v10 = vcombine.low %v478_v41, %v482_v42 }
 0x3ac   : > { %v626_v47 = vld [vmem:[%s10696_s8 + $0x6f8] sm:$0xff] }
 0x3ad   : > { %7445 = vmatpush1.bf16.msra.mxu0 %v9081_v55  ;;  %v470_v49 = vld [vmem:[%s10696_s8 + $0x218] sm:$0xff]  ;;  %v9162_v8 = vcombine.high %v622_v46, %v626_v47  ;;  %v9161_v60 = vcombine.low %v622_v46, %v626_v47 }
 0x3ae   : > { %7410 = vmatpush2.bf16.msra.mxu1 %v9057_v21  ;;  %7446 = vmatprep.subr.bf16.mxu0 %v9074_v57  ;;  %v474_v50 = vld [vmem:[%s10696_s8 + $0x238] sm:$0xff] }
 0x3af   : > { %7411 = vmatprep.subr.bf16.mxu1 %v9050_v13  ;;  %v9010_v54 = vcombine.high %v470_v49, %v474_v50  ;;  %v614_v55 = vld [vmem:[%s10696_s8 + $0x698] sm:$0xff]  ;;  %v9009_v61 = vcombine.low %v470_v49, %v474_v50 }
 0x3b0   : > { %v618_v21 = vld [vmem:[%s10696_s8 + $0x6b8] sm:$0xff] }
 0x3b1   : > { %7447 = vmatpush1.bf16.msra.mxu0 %v9073_v59  ;;  %v718_v57 = vld [vmem:[%s10696_s8 + $0x9d8] sm:$0xff]  ;;  %v9154_v5 = vcombine.high %v614_v55, %v618_v21  ;;  %v9153_v11 = vcombine.low %v614_v55, %v618_v21 }
 0x3b2   : > { %7412 = vmatpush2.bf16.msra.mxu1 %v9049_v3  ;;  %7448 = vmatprep.subr.bf16.mxu0 %v9194_v25  ;;  %v722_v13 = vld [vmem:[%s10696_s8 + $0x9f8] sm:$0xff] }
 0x3b3   : > { %7413 = vmatprep.subr.bf16.mxu1 %v9042_v4  ;;  %v9258_v63 = vcombine.high %v718_v57, %v722_v13  ;;  %v606_v59 = vld [vmem:[%s10696_s8 + $0x658] sm:$0xff]  ;;  %v9257_v12 = vcombine.low %v718_v57, %v722_v13 }
 0x3b4   : > { %v610_v3 = vld [vmem:[%s10696_s8 + $0x678] sm:$0xff] }
 0x3b5   : > { %7449 = vmatpush2.bf16.msra.mxu0 %v9193_v23  ;;  %v710_v25 = vld [vmem:[%s10696_s8 + $0x998] sm:$0xff]  ;;  %v9146_v19 = vcombine.high %v606_v59, %v610_v3  ;;  %v9145_v27 = vcombine.low %v606_v59, %v610_v3 }
 0x3b6   : > { %7414 = vmatpush2.bf16.msra.mxu1 %v9041_v17  ;;  %7450 = vmatprep.subr.bf16.mxu0 %v9186_v24  ;;  %v714_v4 = vld [vmem:[%s10696_s8 + $0x9b8] sm:$0xff] }
 0x3b7   : > { %7415 = vmatprep.subr.bf16.mxu1 %v9034_v26  ;;  %v9250_v22 = vcombine.high %v710_v25, %v714_v4  ;;  %v598_v23 = vld [vmem:[%s10696_s8 + $0x618] sm:$0xff]  ;;  %v9249_v29 = vcombine.low %v710_v25, %v714_v4 }
 0x3b8   : > { %v602_v17 = vld [vmem:[%s10696_s8 + $0x638] sm:$0xff] }
 0x3b9   : > { %7451 = vmatpush2.bf16.msra.mxu0 %v9185_v33  ;;  %v702_v24 = vld [vmem:[%s10696_s8 + $0x958] sm:$0xff]  ;;  %v9138_v30 = vcombine.high %v598_v23, %v602_v17 }
 0x3ba   : > { %7416 = vmatpush2.bf16.msra.mxu1 %v9033_v34  ;;  %7452 = vmatprep.subr.bf16.mxu0 %v9178_v35  ;;  %v706_v26 = vld [vmem:[%s10696_s8 + $0x978] sm:$0xff] }
 0x3bb   : > { %7417 = vmatprep.subr.bf16.mxu1 %v9026_v37  ;;  %v9242_v32 = vcombine.high %v702_v24, %v706_v26  ;;  %v846_v33 = vld [vmem:[%s10696_s8 + $0xdd8] sm:$0xff]  ;;  %v9241_v38 = vcombine.low %v702_v24, %v706_v26 }
 0x3bc   : > { %v850_v34 = vld [vmem:[%s10696_s8 + $0xdf8] sm:$0xff] }
 0x3bd   : > { %7453 = vmatpush2.bf16.msra.mxu0 %v9177_v58  ;;  %v694_v35 = vld [vmem:[%s10696_s8 + $0x918] sm:$0xff]  ;;  %v9386_v39 = vcombine.high %v846_v33, %v850_v34 }
 0x3be   : > { %7418 = vmatpush2.bf16.msra.mxu1 %v9025_v43  ;;  %7454 = vmatprep.subr.bf16.mxu0 %v9170_v44  ;;  %v698_v37 = vld [vmem:[%s10696_s8 + $0x938] sm:$0xff] }
 0x3bf   : > { %7419 = vmatprep.subr.bf16.mxu1 %v9018_v0  ;;  %v9234_v41 = vcombine.high %v694_v35, %v698_v37  ;;  %v838_v42 = vld [vmem:[%s10696_s8 + $0xd98] sm:$0xff]  ;;  %v9233_v0 = vcombine.low %v694_v35, %v698_v37 }
 0x3c0   : > { %v842_v58 = vld [vmem:[%s10696_s8 + $0xdb8] sm:$0xff] }
 0x3c1   : > { %7455 = vmatpush2.bf16.msra.mxu0 %v9169_v52  ;;  %v686_v43 = vld [vmem:[%s10696_s8 + $0x8d8] sm:$0xff]  ;;  %v9378_v46 = vcombine.high %v838_v42, %v842_v58  ;;  %v9377_v21 = vcombine.low %v838_v42, %v842_v58 }
 0x3c2   : > { %7420 = vmatpush2.bf16.msra.mxu1 %v9017_v10  ;;  %7456 = vmatprep.subr.bf16.mxu0 %v9162_v8  ;;  %v690_v44 = vld [vmem:[%s10696_s8 + $0x8f8] sm:$0xff] }
 0x3c3   : > { %7421 = vmatprep.subr.bf16.mxu1 %v9010_v54  ;;  %v9226_v47 = vcombine.high %v686_v43, %v690_v44  ;;  %v830_v49 = vld [vmem:[%s10696_s8 + $0xd58] sm:$0xff]  ;;  %v9225_v13 = vcombine.low %v686_v43, %v690_v44 }
 0x3c4   : > { %v834_v50 = vld [vmem:[%s10696_s8 + $0xd78] sm:$0xff] }
 0x3c5   : > { %7457 = vmatpush2.bf16.msra.mxu0 %v9161_v60  ;;  %v678_v10 = vld [vmem:[%s10696_s8 + $0x898] sm:$0xff]  ;;  %v9370_v60 = vcombine.high %v830_v49, %v834_v50 }
 0x3c6   : > { %7422 = vmatpush2.bf16.msra.mxu1 %v9009_v61  ;;  %7458 = vmatprep.subr.bf16.mxu0 %v9154_v5  ;;  %v682_v8 = vld [vmem:[%s10696_s8 + $0x8b8] sm:$0xff] }
 0x3c7   : > { %7473 = vmatprep.subr.bf16.mxu1 %v9258_v63  ;;  %v822_v63 = vld [vmem:[%s10696_s8 + $0xd18] sm:$0xff] }
 0x3c8   : > { %v826_v59 = vld [vmem:[%s10696_s8 + $0xd38] sm:$0xff] }
 0x3c9   : > { %7424 = vmatmul.mubr.bf16.vlgmr.msra.gmra.mxu1 %v10787_v16  ;;  %7459 = vmatpush2.bf16.msra.mxu0 %v9153_v11  ;;  %v9137_v16 = vcombine.low %v598_v23, %v602_v17  ;;  %v670_v25 = vld [vmem:[%s10696_s8 + $0x858] sm:$0xff] }
 0x3ca   : > { %7474 = vmatpush1.bf16.msra.mxu1 %v9257_v12  ;;  %7460 = vmatprep.subr.bf16.mxu0 %v9146_v19  ;;  %v9369_v12 = vcombine.low %v830_v49, %v834_v50  ;;  %v814_v24 = vld [vmem:[%s10696_s8 + $0xcd8] sm:$0xff] }
 0x3cb   : > { %7475 = vmatprep.subr.bf16.mxu1 %v9250_v22  ;;  %7505 = vmatprep.mubr.bf16.mxu1 %v10795_v28  ;;  %v9385_v28 = vcombine.low %v846_v33, %v850_v34  ;;  %v9362_v22 = vcombine.high %v822_v63, %v826_v59  ;;  %v818_v26 = vld [vmem:[%s10696_s8 + $0xcf8] sm:$0xff] }
 0x3cc   : > { %v9354_v33 = vcombine.high %v814_v24, %v818_v26  ;;  %v806_v35 = vld [vmem:[%s10696_s8 + $0xc98] sm:$0xff] }
 0x3cd   : > { %7461 = vmatpush2.bf16.msra.mxu0 %v9145_v27  ;;  %v662_v27 = vld [vmem:[%s10696_s8 + $0x818] sm:$0xff] }
 0x3ce   : > { %7476 = vmatpush1.bf16.msra.mxu1 %v9249_v29  ;;  %7462 = vmatprep.subr.bf16.mxu0 %v9138_v30  ;;  %v666_v29 = vld [vmem:[%s10696_s8 + $0x838] sm:$0xff]  ;;  %v9361_v30 = vcombine.low %v822_v63, %v826_v59 }
 0x3cf   : > { %7477 = vmatprep.subr.bf16.mxu1 %v9242_v32  ;;  %v9202_v34 = vcombine.high %v662_v27, %v666_v29  ;;  %v810_v37 = vld [vmem:[%s10696_s8 + $0xcb8] sm:$0xff] }
 0x3d0   : > { %v9346_v42 = vcombine.high %v806_v35, %v810_v37  ;;  %v798_v43 = vld [vmem:[%s10696_s8 + $0xc58] sm:$0xff] }
 0x3d1   : > { %7463 = vmatpush2.bf16.msra.mxu0 %v9137_v16  ;;  %v782_v16 = vld [vmem:[%s10696_s8 + $0xbd8] sm:$0xff] }
 0x3d2   : > { %7478 = vmatpush1.bf16.msra.mxu1 %v9241_v38  ;;  %7514 = vmatprep.subr.bf16.mxu0 %v9386_v39  ;;  %v786_v38 = vld [vmem:[%s10696_s8 + $0xbf8] sm:$0xff]  ;;  %v9353_v39 = vcombine.low %v814_v24, %v818_v26 }
 0x3d3   : > { %7479 = vmatprep.subr.bf16.mxu1 %v9234_v41  ;;  %v9201_v41 = vcombine.low %v662_v27, %v666_v29  ;;  %v9322_v58 = vcombine.high %v782_v16, %v786_v38  ;;  %v802_v44 = vld [vmem:[%s10696_s8 + $0xc78] sm:$0xff] }
 0x3d4   : > { %v7179_v52 = vpop.f32.mrf.mxu0  ;;  %7465 = vmatmul.mubr.bf16.vlgmr.msra.gmra.mxu0 %v10791_v20  ;;  %v9338_v49 = vcombine.high %v798_v43, %v802_v44  ;;  %v894_v24 = vld [vmem:[%s10696_s8 + $0xf58] sm:$0xff] }
 0x3d5   : > { %v7180_v54 = vadd.f32 %v7179_v52, %v11608_v53  ;;  %v7220_v55 = vpop.f32.mrf.mxu1  ;;  %7515 = vmatpush1.bf16.msra.mxu0 %v9385_v28  ;;  %7546 = vmatprep.mubr.bf16.mxu0 %v10800_v31  ;;  %v9218_v53 = vcombine.high %v678_v10, %v682_v8  ;;  %v674_v31 = vld [vmem:[%s10696_s8 + $0x878] sm:$0xff] }
 0x3d6   : > { %7480 = vmatpush1.bf16.msra.mxu1 %v9233_v0  ;;  %v7181_v57 = vpop.f32.mrf.mxu0  ;;  %7516 = vmatprep.subr.bf16.mxu0 %v9378_v46  ;;  %v9210_v17 = vcombine.high %v670_v25, %v674_v31  ;;  %v9209_v32 = vcombine.low %v670_v25, %v674_v31  ;;  %v774_v28 = vld [vmem:[%s10696_s8 + $0xb98] sm:$0xff]  ;;  %v9345_v46 = vcombine.low %v806_v35, %v810_v37 }
 0x3d7   : > { %v11681_v61 = vadd.f32 %v7220_v55, %v7180_v54  ;;  %v7182_v20 = vadd.f32 %v7181_v57, %v11612_v62  ;;  %v7222_v5 = vpop.f32.mrf.mxu1  ;;  %7481 = vmatprep.subr.bf16.mxu1 %v9226_v47  ;;  %v9217_v62 = vcombine.low %v678_v10, %v682_v8  ;;  %v778_v0 = vld [vmem:[%s10696_s8 + $0xbb8] sm:$0xff]  ;;  %v9321_v47 = vcombine.low %v782_v16, %v786_v38 }
 0x3d8   : > { %v7183_v3 = vpop.f32.mrf.mxu0  ;;  %v9314_v50 = vcombine.high %v774_v28, %v778_v0  ;;  %v790_v52 = vld [vmem:[%s10696_s8 + $0xc18] sm:$0xff]  ;;  %v9337_v55 = vcombine.low %v798_v43, %v802_v44 }
 0x3d9   : > { %v11688_v4 = vadd.f32 %v7222_v5, %v7182_v20  ;;  %v7224_v11 = vpop.f32.mrf.mxu1  ;;  %7517 = vmatpush1.bf16.msra.mxu0 %v9377_v21  ;;  %v794_v10 = vld [vmem:[%s10696_s8 + $0xc38] sm:$0xff]  ;;  %v9313_v21 = vcombine.low %v774_v28, %v778_v0 }
 0x3da   : > { %7482 = vmatpush1.bf16.msra.mxu1 %v9225_v13  ;;  %v7184_v19 = vpop.f32.mrf.mxu0  ;;  %7518 = vmatprep.subr.bf16.mxu0 %v9370_v60  ;;  %v766_v8 = vld [vmem:[%s10696_s8 + $0xb58] sm:$0xff]  ;;  %v9330_v57 = vcombine.high %v790_v52, %v794_v10  ;;  %v9329_v63 = vcombine.low %v790_v52, %v794_v10 }
 0x3db   : > { %v7225_v23 = vpop.f32.mrf.mxu1  ;;  %7483 = vmatprep.subr.bf16.mxu1 %v9218_v53  ;;  %v770_v54 = vld [vmem:[%s10696_s8 + $0xb78] sm:$0xff] }
 0x3dc   : > { %v9306_v13 = vcombine.high %v766_v8, %v770_v54  ;;  %v910_v60 = vld [vmem:[%s10696_s8 + $0xfd8] sm:$0xff]  ;;  %v9305_v59 = vcombine.low %v766_v8, %v770_v54 }
 0x3dd   : > { %7519 = vmatpush1.bf16.msra.mxu0 %v9369_v12  ;;  %v914_v20 = vld [vmem:[%s10696_s8 + $0xff8] sm:$0xff] }
 0x3de   : > { %7484 = vmatpush1.bf16.msra.mxu1 %v9217_v62  ;;  %7520 = vmatprep.subr.bf16.mxu0 %v9362_v22  ;;  %v758_v5 = vld [vmem:[%s10696_s8 + $0xb18] sm:$0xff]  ;;  %v9450_v3 = vcombine.high %v910_v60, %v914_v20  ;;  %v9449_v62 = vcombine.low %v910_v60, %v914_v20 }
 0x3df   : > { %7485 = vmatprep.subr.bf16.mxu1 %v9210_v17  ;;  %v762_v53 = vld [vmem:[%s10696_s8 + $0xb38] sm:$0xff] }
 0x3e0   : > { %v9298_v25 = vcombine.high %v758_v5, %v762_v53  ;;  %v902_v31 = vld [vmem:[%s10696_s8 + $0xf98] sm:$0xff]  ;;  %v9297_v22 = vcombine.low %v758_v5, %v762_v53 }
 0x3e1   : > { %7521 = vmatpush1.bf16.msra.mxu0 %v9361_v30  ;;  %v906_v11 = vld [vmem:[%s10696_s8 + $0xfb8] sm:$0xff] }
 0x3e2   : > { %7486 = vmatpush1.bf16.msra.mxu1 %v9209_v32  ;;  %7522 = vmatprep.subr.bf16.mxu0 %v9354_v33  ;;  %v750_v12 = vld [vmem:[%s10696_s8 + $0xad8] sm:$0xff]  ;;  %v9442_v23 = vcombine.high %v902_v31, %v906_v11  ;;  %v9441_v30 = vcombine.low %v902_v31, %v906_v11 }
 0x3e3   : > { %7487 = vmatprep.subr.bf16.mxu1 %v9202_v34  ;;  %v754_v19 = vld [vmem:[%s10696_s8 + $0xaf8] sm:$0xff] }
 0x3e4   : > { %v9290_v17 = vcombine.high %v750_v12, %v754_v19  ;;  %v898_v26 = vld [vmem:[%s10696_s8 + $0xf78] sm:$0xff]  ;;  %v9289_v32 = vcombine.low %v750_v12, %v754_v19 }
 0x3e5   : > { %7523 = vmatpush1.bf16.msra.mxu0 %v9353_v39  ;;  %v742_v27 = vld [vmem:[%s10696_s8 + $0xa98] sm:$0xff]  ;;  %v9434_v33 = vcombine.high %v894_v24, %v898_v26  ;;  %v9433_v39 = vcombine.low %v894_v24, %v898_v26 }
 0x3e6   : > { %7488 = vmatpush1.bf16.msra.mxu1 %v9201_v41  ;;  %7524 = vmatprep.subr.bf16.mxu0 %v9346_v42  ;;  %v746_v29 = vld [vmem:[%s10696_s8 + $0xab8] sm:$0xff] }
 0x3e7   : > { %7489 = vmatprep.subr.bf16.mxu1 %v9322_v58  ;;  %v9282_v34 = vcombine.high %v742_v27, %v746_v29  ;;  %v886_v35 = vld [vmem:[%s10696_s8 + $0xf18] sm:$0xff]  ;;  %v9281_v41 = vcombine.low %v742_v27, %v746_v29 }
 0x3e8   : > { %v890_v37 = vld [vmem:[%s10696_s8 + $0xf38] sm:$0xff] }
 0x3e9   : > { %7525 = vmatpush1.bf16.msra.mxu0 %v9345_v46  ;;  %v734_v16 = vld [vmem:[%s10696_s8 + $0xa58] sm:$0xff]  ;;  %v9426_v42 = vcombine.high %v886_v35, %v890_v37  ;;  %v9425_v46 = vcombine.low %v886_v35, %v890_v37 }
 0x3ea   : > { %7490 = vmatpush2.bf16.msra.mxu1 %v9321_v47  ;;  %7526 = vmatprep.subr.bf16.mxu0 %v9338_v49  ;;  %v738_v38 = vld [vmem:[%s10696_s8 + $0xa78] sm:$0xff] }
 0x3eb   : > { %7491 = vmatprep.subr.bf16.mxu1 %v9314_v50  ;;  %v9274_v58 = vcombine.high %v734_v16, %v738_v38  ;;  %v878_v43 = vld [vmem:[%s10696_s8 + $0xed8] sm:$0xff]  ;;  %v9273_v47 = vcombine.low %v734_v16, %v738_v38 }
 0x3ec   : > { %v882_v44 = vld [vmem:[%s10696_s8 + $0xef8] sm:$0xff] }
 0x3ed   : > { %7527 = vmatpush1.bf16.msra.mxu0 %v9337_v55  ;;  %v726_v28 = vld [vmem:[%s10696_s8 + $0xa18] sm:$0xff]  ;;  %v9418_v49 = vcombine.high %v878_v43, %v882_v44  ;;  %v9417_v55 = vcombine.low %v878_v43, %v882_v44 }
 0x3ee   : > { %7492 = vmatpush2.bf16.msra.mxu1 %v9313_v21  ;;  %7528 = vmatprep.subr.bf16.mxu0 %v9330_v57  ;;  %v730_v0 = vld [vmem:[%s10696_s8 + $0xa38] sm:$0xff] }
 0x3ef   : > { %7493 = vmatprep.subr.bf16.mxu1 %v9306_v13  ;;  %v9266_v50 = vcombine.high %v726_v28, %v730_v0  ;;  %v870_v52 = vld [vmem:[%s10696_s8 + $0xe98] sm:$0xff]  ;;  %v9265_v21 = vcombine.low %v726_v28, %v730_v0 }
 0x3f0   : > { %v874_v10 = vld [vmem:[%s10696_s8 + $0xeb8] sm:$0xff] }
 0x3f1   : > { %7529 = vmatpush1.bf16.msra.mxu0 %v9329_v63  ;;  %v974_v8 = vld [vmem:[%s10696_s8 + $0x11d8] sm:$0xff]  ;;  %v9410_v57 = vcombine.high %v870_v52, %v874_v10  ;;  %v9409_v63 = vcombine.low %v870_v52, %v874_v10 }
 0x3f2   : > { %7494 = vmatpush2.bf16.msra.mxu1 %v9305_v59  ;;  %7530 = vmatprep.subr.bf16.mxu0 %v9450_v3  ;;  %v978_v54 = vld [vmem:[%s10696_s8 + $0x11f8] sm:$0xff] }
 0x3f3   : > { %7495 = vmatprep.subr.bf16.mxu1 %v9298_v25  ;;  %v9514_v13 = vcombine.high %v974_v8, %v978_v54  ;;  %v862_v60 = vld [vmem:[%s10696_s8 + $0xe58] sm:$0xff]  ;;  %v9513_v59 = vcombine.low %v974_v8, %v978_v54 }
 0x3f4   : > { %v866_v20 = vld [vmem:[%s10696_s8 + $0xe78] sm:$0xff] }
 0x3f5   : > { %7531 = vmatpush2.bf16.msra.mxu0 %v9449_v62  ;;  %v966_v5 = vld [vmem:[%s10696_s8 + $0x1198] sm:$0xff]  ;;  %v9402_v3 = vcombine.high %v862_v60, %v866_v20  ;;  %v9401_v62 = vcombine.low %v862_v60, %v866_v20 }
 0x3f6   : > { %7496 = vmatpush2.bf16.msra.mxu1 %v9297_v22  ;;  %7532 = vmatprep.subr.bf16.mxu0 %v9442_v23  ;;  %v970_v53 = vld [vmem:[%s10696_s8 + $0x11b8] sm:$0xff] }
 0x3f7   : > { %7497 = vmatprep.subr.bf16.mxu1 %v9290_v17  ;;  %v9506_v25 = vcombine.high %v966_v5, %v970_v53  ;;  %v854_v31 = vld [vmem:[%s10696_s8 + $0xe18] sm:$0xff]  ;;  %v9505_v22 = vcombine.low %v966_v5, %v970_v53 }
 0x3f8   : > { %v858_v11 = vld [vmem:[%s10696_s8 + $0xe38] sm:$0xff] }
 0x3f9   : > { %7533 = vmatpush2.bf16.msra.mxu0 %v9441_v30  ;;  %v958_v12 = vld [vmem:[%s10696_s8 + $0x1158] sm:$0xff]  ;;  %v9394_v23 = vcombine.high %v854_v31, %v858_v11 }
 0x3fa   : > { %7498 = vmatpush2.bf16.msra.mxu1 %v9289_v32  ;;  %7534 = vmatprep.subr.bf16.mxu0 %v9434_v33  ;;  %v962_v19 = vld [vmem:[%s10696_s8 + $0x1178] sm:$0xff] }
 0x3fb   : > { %7499 = vmatprep.subr.bf16.mxu1 %v9282_v34  ;;  %v9498_v17 = vcombine.high %v958_v12, %v962_v19  ;;  %v1102_v24 = vld [vmem:[%s10696_s8 + $0x15d8] sm:$0xff]  ;;  %v9497_v30 = vcombine.low %v958_v12, %v962_v19 }
 0x3fc   : > { %v1106_v26 = vld [vmem:[%s10696_s8 + $0x15f8] sm:$0xff] }
 0x3fd   : > { %7535 = vmatpush2.bf16.msra.mxu0 %v9433_v39  ;;  %v950_v27 = vld [vmem:[%s10696_s8 + $0x1118] sm:$0xff]  ;;  %v9642_v32 = vcombine.high %v1102_v24, %v1106_v26 }
 0x3fe   : > { %7500 = vmatpush2.bf16.msra.mxu1 %v9281_v41  ;;  %7536 = vmatprep.subr.bf16.mxu0 %v9426_v42  ;;  %v954_v29 = vld [vmem:[%s10696_s8 + $0x1138] sm:$0xff] }
 0x3ff   : > { %7501 = vmatprep.subr.bf16.mxu1 %v9274_v58  ;;  %v9490_v33 = vcombine.high %v950_v27, %v954_v29  ;;  %v1094_v34 = vld [vmem:[%s10696_s8 + $0x1598] sm:$0xff]  ;;  %v9489_v38 = vcombine.low %v950_v27, %v954_v29 }
 0x400   : > { %v1098_v35 = vld [vmem:[%s10696_s8 + $0x15b8] sm:$0xff] }
 0x401   : > { %7537 = vmatpush2.bf16.msra.mxu0 %v9425_v46  ;;  %v942_v37 = vld [vmem:[%s10696_s8 + $0x10d8] sm:$0xff]  ;;  %v9634_v39 = vcombine.high %v1094_v34, %v1098_v35 }
 0x402   : > { %7502 = vmatpush2.bf16.msra.mxu1 %v9273_v47  ;;  %7538 = vmatprep.subr.bf16.mxu0 %v9418_v49  ;;  %v946_v16 = vld [vmem:[%s10696_s8 + $0x10f8] sm:$0xff]  ;;  %v9633_v47 = vcombine.low %v1094_v34, %v1098_v35 }
 0x403   : > { %7503 = vmatprep.subr.bf16.mxu1 %v9266_v50  ;;  %v9482_v41 = vcombine.high %v942_v37, %v946_v16  ;;  %v1086_v42 = vld [vmem:[%s10696_s8 + $0x1558] sm:$0xff]  ;;  %v9481_v50 = vcombine.low %v942_v37, %v946_v16 }
 0x404   : > { %v1090_v58 = vld [vmem:[%s10696_s8 + $0x1578] sm:$0xff] }
 0x405   : > { %7539 = vmatpush2.bf16.msra.mxu0 %v9417_v55  ;;  %v934_v44 = vld [vmem:[%s10696_s8 + $0x1098] sm:$0xff]  ;;  %v9626_v52 = vcombine.high %v1086_v42, %v1090_v58  ;;  %v9625_v20 = vcombine.low %v1086_v42, %v1090_v58 }
 0x406   : > { %7504 = vmatpush2.bf16.msra.mxu1 %v9265_v21  ;;  %7540 = vmatprep.subr.bf16.mxu0 %v9410_v57  ;;  %v938_v28 = vld [vmem:[%s10696_s8 + $0x10b8] sm:$0xff] }
 0x407   : > { %7555 = vmatprep.subr.bf16.mxu1 %v9514_v13  ;;  %v1078_v54 = vld [vmem:[%s10696_s8 + $0x1518] sm:$0xff] }
 0x408   : > { %v1082_v55 = vld [vmem:[%s10696_s8 + $0x1538] sm:$0xff] }
 0x409   : > { %7506 = vmatmul.mubr.bf16.vlgmr.msra.gmra.mxu1 %v10863_v36  ;;  %7541 = vmatpush2.bf16.msra.mxu0 %v9409_v63  ;;  %v9393_v36 = vcombine.low %v854_v31, %v858_v11  ;;  %v926_v57 = vld [vmem:[%s10696_s8 + $0x1058] sm:$0xff]  ;;  %v9618_v53 = vcombine.high %v1078_v54, %v1082_v55  ;;  %v9617_v12 = vcombine.low %v1078_v54, %v1082_v55 }
 0x40a   : > { %7556 = vmatpush1.bf16.msra.mxu1 %v9513_v59  ;;  %7542 = vmatprep.subr.bf16.mxu0 %v9402_v3  ;;  %v1070_v3 = vld [vmem:[%s10696_s8 + $0x14d8] sm:$0xff] }
 0x40b   : > { %7557 = vmatprep.subr.bf16.mxu1 %v9506_v25  ;;  %7587 = vmatprep.mubr.bf16.mxu1 %v10871_v48  ;;  %v9641_v48 = vcombine.low %v1102_v24, %v1106_v26  ;;  %v1074_v25 = vld [vmem:[%s10696_s8 + $0x14f8] sm:$0xff] }
 0x40c   : > { %v918_v31 = vld [vmem:[%s10696_s8 + $0x1018] sm:$0xff]  ;;  %v9609_v27 = vcombine.low %v1070_v3, %v1074_v25 }
 0x40d   : > { %7543 = vmatpush2.bf16.msra.mxu0 %v9401_v62  ;;  %v922_v11 = vld [vmem:[%s10696_s8 + $0x1038] sm:$0xff]  ;;  %v9610_v62 = vcombine.high %v1070_v3, %v1074_v25 }
 0x40e   : > { %7558 = vmatpush1.bf16.msra.mxu1 %v9505_v22  ;;  %7544 = vmatprep.subr.bf16.mxu0 %v9394_v23  ;;  %v9458_v22 = vcombine.high %v918_v31, %v922_v11  ;;  %v1062_v23 = vld [vmem:[%s10696_s8 + $0x1498] sm:$0xff]  ;;  %v9457_v29 = vcombine.low %v918_v31, %v922_v11 }
 0x40f   : > { %7559 = vmatprep.subr.bf16.mxu1 %v9498_v17  ;;  %v1066_v17 = vld [vmem:[%s10696_s8 + $0x14b8] sm:$0xff] }
 0x410   : > { %v1038_v24 = vld [vmem:[%s10696_s8 + $0x13d8] sm:$0xff]  ;;  %v9601_v37 = vcombine.low %v1062_v23, %v1066_v17 }
 0x411   : > { %7545 = vmatpush2.bf16.msra.mxu0 %v9393_v36  ;;  %v1042_v26 = vld [vmem:[%s10696_s8 + $0x13f8] sm:$0xff]  ;;  %v9602_v36 = vcombine.high %v1062_v23, %v1066_v17 }
 0x412   : > { %7560 = vmatpush1.bf16.msra.mxu1 %v9497_v30  ;;  %7596 = vmatprep.subr.bf16.mxu0 %v9642_v32  ;;  %v9578_v30 = vcombine.high %v1038_v24, %v1042_v26  ;;  %v1054_v32 = vld [vmem:[%s10696_s8 + $0x1458] sm:$0xff]  ;;  %v9577_v16 = vcombine.low %v1038_v24, %v1042_v26 }
 0x413   : > { %7561 = vmatprep.subr.bf16.mxu1 %v9490_v33  ;;  %v1058_v33 = vld [vmem:[%s10696_s8 + $0x1478] sm:$0xff] }
 0x414   : > { %v7261_v43 = vpop.f32.mrf.mxu0  ;;  %7547 = vmatmul.mubr.bf16.vlgmr.msra.gmra.mxu0 %v10867_v40  ;;  %v1030_v34 = vld [vmem:[%s10696_s8 + $0x1398] sm:$0xff] }
 0x415   : > { %v7262_v0 = vadd.f32 %v7261_v43, %v11681_v61  ;;  %v7302_v46 = vpop.f32.mrf.mxu1  ;;  %7597 = vmatpush1.bf16.msra.mxu0 %v9641_v48  ;;  %7628 = vmatprep.mubr.bf16.mxu0 %v10876_v51  ;;  %v9474_v61 = vcombine.high %v934_v44, %v938_v28  ;;  %v930_v51 = vld [vmem:[%s10696_s8 + $0x1078] sm:$0xff]  ;;  %v9594_v48 = vcombine.high %v1054_v32, %v1058_v33 }
 0x416   : > { %7562 = vmatpush1.bf16.msra.mxu1 %v9489_v38  ;;  %v7263_v49 = vpop.f32.mrf.mxu0  ;;  %7598 = vmatprep.subr.bf16.mxu0 %v9634_v39  ;;  %v9466_v59 = vcombine.high %v926_v57, %v930_v51  ;;  %v9465_v19 = vcombine.low %v926_v57, %v930_v51  ;;  %v1034_v35 = vld [vmem:[%s10696_s8 + $0x13b8] sm:$0xff]  ;;  %v9593_v43 = vcombine.low %v1054_v32, %v1058_v33 }
 0x417   : > { %v11755_v10 = vadd.f32 %v7302_v46, %v7262_v0  ;;  %v7264_v40 = vadd.f32 %v7263_v49, %v11688_v4  ;;  %v7304_v8 = vpop.f32.mrf.mxu1  ;;  %7563 = vmatprep.subr.bf16.mxu1 %v9482_v41  ;;  %v9473_v4 = vcombine.low %v934_v44, %v938_v28  ;;  %v9570_v38 = vcombine.high %v1030_v34, %v1034_v35  ;;  %v1046_v39 = vld [vmem:[%s10696_s8 + $0x1418] sm:$0xff] }
 0x418   : > { %v7265_v21 = vpop.f32.mrf.mxu0  ;;  %v1050_v41 = vld [vmem:[%s10696_s8 + $0x1438] sm:$0xff]  ;;  %v9569_v44 = vcombine.low %v1030_v34, %v1034_v35 }
 0x419   : > { %v11762_v13 = vadd.f32 %v7304_v8, %v7264_v40  ;;  %v7306_v60 = vpop.f32.mrf.mxu1  ;;  %7599 = vmatpush1.bf16.msra.mxu0 %v9633_v47  ;;  %v1022_v42 = vld [vmem:[%s10696_s8 + $0x1358] sm:$0xff]  ;;  %v9586_v28 = vcombine.high %v1046_v39, %v1050_v41 }
 0x41a   : > { %7564 = vmatpush1.bf16.msra.mxu1 %v9481_v50  ;;  %v7266_v5 = vpop.f32.mrf.mxu0  ;;  %7600 = vmatprep.subr.bf16.mxu0 %v9626_v52  ;;  %v1026_v58 = vld [vmem:[%s10696_s8 + $0x1378] sm:$0xff]  ;;  %v9585_v52 = vcombine.low %v1046_v39, %v1050_v41 }
 0x41b   : > { %v7307_v63 = vpop.f32.mrf.mxu1  ;;  %7565 = vmatprep.subr.bf16.mxu1 %v9474_v61  ;;  %v9562_v0 = vcombine.high %v1022_v42, %v1026_v58  ;;  %v1166_v46 = vld [vmem:[%s10696_s8 + $0x17d8] sm:$0xff]  ;;  %v9561_v40 = vcombine.low %v1022_v42, %v1026_v58 }
 0x41c   : > { %v1170_v47 = vld [vmem:[%s10696_s8 + $0x17f8] sm:$0xff] }
 0x41d   : > { %7601 = vmatpush1.bf16.msra.mxu0 %v9625_v20  ;;  %v1014_v49 = vld [vmem:[%s10696_s8 + $0x1318] sm:$0xff]  ;;  %v9706_v8 = vcombine.high %v1166_v46, %v1170_v47  ;;  %v9705_v51 = vcombine.low %v1166_v46, %v1170_v47 }
 0x41e   : > { %7566 = vmatpush1.bf16.msra.mxu1 %v9473_v4  ;;  %7602 = vmatprep.subr.bf16.mxu0 %v9618_v53  ;;  %v1018_v50 = vld [vmem:[%s10696_s8 + $0x1338] sm:$0xff] }
 0x41f   : > { %7567 = vmatprep.subr.bf16.mxu1 %v9466_v59  ;;  %v9554_v61 = vcombine.high %v1014_v49, %v1018_v50  ;;  %v1158_v54 = vld [vmem:[%s10696_s8 + $0x1798] sm:$0xff]  ;;  %v9553_v60 = vcombine.low %v1014_v49, %v1018_v50 }
 0x420   : > { %v1162_v55 = vld [vmem:[%s10696_s8 + $0x17b8] sm:$0xff] }
 0x421   : > { %7603 = vmatpush1.bf16.msra.mxu0 %v9617_v12  ;;  %v1006_v21 = vld [vmem:[%s10696_s8 + $0x12d8] sm:$0xff]  ;;  %v9698_v20 = vcombine.high %v1158_v54, %v1162_v55  ;;  %v9697_v3 = vcombine.low %v1158_v54, %v1162_v55 }
 0x422   : > { %7568 = vmatpush1.bf16.msra.mxu1 %v9465_v19  ;;  %7604 = vmatprep.subr.bf16.mxu0 %v9610_v62  ;;  %v1010_v57 = vld [vmem:[%s10696_s8 + $0x12f8] sm:$0xff] }
 0x423   : > { %7569 = vmatprep.subr.bf16.mxu1 %v9458_v22  ;;  %v9546_v5 = vcombine.high %v1006_v21, %v1010_v57  ;;  %v1150_v4 = vld [vmem:[%s10696_s8 + $0x1758] sm:$0xff]  ;;  %v9545_v25 = vcombine.low %v1006_v21, %v1010_v57 }
 0x424   : > { %v1154_v53 = vld [vmem:[%s10696_s8 + $0x1778] sm:$0xff] }
 0x425   : > { %7605 = vmatpush1.bf16.msra.mxu0 %v9609_v27  ;;  %v998_v63 = vld [vmem:[%s10696_s8 + $0x1298] sm:$0xff]  ;;  %v9690_v31 = vcombine.high %v1150_v4, %v1154_v53  ;;  %v9689_v23 = vcombine.low %v1150_v4, %v1154_v53 }
 0x426   : > { %7570 = vmatpush1.bf16.msra.mxu1 %v9457_v29  ;;  %7606 = vmatprep.subr.bf16.mxu0 %v9602_v36  ;;  %v1002_v59 = vld [vmem:[%s10696_s8 + $0x12b8] sm:$0xff] }
 0x427   : > { %7571 = vmatprep.subr.bf16.mxu1 %v9578_v30  ;;  %v9538_v11 = vcombine.high %v998_v63, %v1002_v59  ;;  %v1142_v12 = vld [vmem:[%s10696_s8 + $0x1718] sm:$0xff]  ;;  %v9537_v17 = vcombine.low %v998_v63, %v1002_v59 }
 0x428   : > { %v1146_v19 = vld [vmem:[%s10696_s8 + $0x1738] sm:$0xff] }
 0x429   : > { %7607 = vmatpush1.bf16.msra.mxu0 %v9601_v37  ;;  %v990_v62 = vld [vmem:[%s10696_s8 + $0x1258] sm:$0xff]  ;;  %v9682_v24 = vcombine.high %v1142_v12, %v1146_v19  ;;  %v9681_v32 = vcombine.low %v1142_v12, %v1146_v19 }
 0x42a   : > { %7572 = vmatpush2.bf16.msra.mxu1 %v9577_v16  ;;  %7608 = vmatprep.subr.bf16.mxu0 %v9594_v48  ;;  %v994_v22 = vld [vmem:[%s10696_s8 + $0x1278] sm:$0xff] }
 0x42b   : > { %7573 = vmatprep.subr.bf16.mxu1 %v9570_v38  ;;  %v9530_v26 = vcombine.high %v990_v62, %v994_v22  ;;  %v1134_v27 = vld [vmem:[%s10696_s8 + $0x16d8] sm:$0xff]  ;;  %v9529_v33 = vcombine.low %v990_v62, %v994_v22 }
 0x42c   : > { %v1138_v29 = vld [vmem:[%s10696_s8 + $0x16f8] sm:$0xff] }
 0x42d   : > { %7609 = vmatpush1.bf16.msra.mxu0 %v9593_v43  ;;  %v982_v36 = vld [vmem:[%s10696_s8 + $0x1218] sm:$0xff]  ;;  %v9674_v34 = vcombine.high %v1134_v27, %v1138_v29  ;;  %v9673_v39 = vcombine.low %v1134_v27, %v1138_v29 }
 0x42e   : > { %7574 = vmatpush2.bf16.msra.mxu1 %v9569_v44  ;;  %7610 = vmatprep.subr.bf16.mxu0 %v9586_v28  ;;  %v986_v30 = vld [vmem:[%s10696_s8 + $0x1238] sm:$0xff] }
 0x42f   : > { %7575 = vmatprep.subr.bf16.mxu1 %v9562_v0  ;;  %v9522_v35 = vcombine.high %v982_v36, %v986_v30  ;;  %v1126_v37 = vld [vmem:[%s10696_s8 + $0x1698] sm:$0xff]  ;;  %v9521_v41 = vcombine.low %v982_v36, %v986_v30 }
 0x430   : > { %v1130_v16 = vld [vmem:[%s10696_s8 + $0x16b8] sm:$0xff] }
 0x431   : > { %7611 = vmatpush1.bf16.msra.mxu0 %v9585_v52  ;;  %v1230_v48 = vld [vmem:[%s10696_s8 + $0x19d8] sm:$0xff]  ;;  %v9666_v42 = vcombine.high %v1126_v37, %v1130_v16  ;;  %v9665_v46 = vcombine.low %v1126_v37, %v1130_v16 }
 0x432   : > { %7576 = vmatpush2.bf16.msra.mxu1 %v9561_v40  ;;  %7612 = vmatprep.subr.bf16.mxu0 %v9706_v8  ;;  %v1234_v38 = vld [vmem:[%s10696_s8 + $0x19f8] sm:$0xff] }
 0x433   : > { %7577 = vmatprep.subr.bf16.mxu1 %v9554_v61  ;;  %v9770_v58 = vcombine.high %v1230_v48, %v1234_v38  ;;  %v1118_v43 = vld [vmem:[%s10696_s8 + $0x1658] sm:$0xff]  ;;  %v9769_v47 = vcombine.low %v1230_v48, %v1234_v38 }
 0x434   : > { %v1122_v44 = vld [vmem:[%s10696_s8 + $0x1678] sm:$0xff] }
 0x435   : > { %7613 = vmatpush2.bf16.msra.mxu0 %v9705_v51  ;;  %v1222_v28 = vld [vmem:[%s10696_s8 + $0x1998] sm:$0xff]  ;;  %v9658_v49 = vcombine.high %v1118_v43, %v1122_v44  ;;  %v9657_v55 = vcombine.low %v1118_v43, %v1122_v44 }
 0x436   : > { %7578 = vmatpush2.bf16.msra.mxu1 %v9553_v60  ;;  %7614 = vmatprep.subr.bf16.mxu0 %v9698_v20  ;;  %v1226_v0 = vld [vmem:[%s10696_s8 + $0x19b8] sm:$0xff] }
 0x437   : > { %7579 = vmatprep.subr.bf16.mxu1 %v9546_v5  ;;  %v9762_v50 = vcombine.high %v1222_v28, %v1226_v0  ;;  %v1110_v52 = vld [vmem:[%s10696_s8 + $0x1618] sm:$0xff]  ;;  %v9761_v21 = vcombine.low %v1222_v28, %v1226_v0 }
 0x438   : > { %v1114_v40 = vld [vmem:[%s10696_s8 + $0x1638] sm:$0xff] }
 0x439   : > { %7615 = vmatpush2.bf16.msra.mxu0 %v9697_v3  ;;  %v1214_v8 = vld [vmem:[%s10696_s8 + $0x1958] sm:$0xff]  ;;  %v9650_v57 = vcombine.high %v1110_v52, %v1114_v40  ;;  %v9649_v63 = vcombine.low %v1110_v52, %v1114_v40 }
 0x43a   : > { %7580 = vmatpush2.bf16.msra.mxu1 %v9545_v25  ;;  %7616 = vmatprep.subr.bf16.mxu0 %v9690_v31  ;;  %v1218_v61 = vld [vmem:[%s10696_s8 + $0x1978] sm:$0xff] }
 0x43b   : > { %7581 = vmatprep.subr.bf16.mxu1 %v9538_v11  ;;  %v9754_v60 = vcombine.high %v1214_v8, %v1218_v61  ;;  %v1358_v20 = vld [vmem:[%s10696_s8 + $0x1dd8] sm:$0xff]  ;;  %v9753_v59 = vcombine.low %v1214_v8, %v1218_v61 }
 0x43c   : > { %v1362_v5 = vld [vmem:[%s10696_s8 + $0x1df8] sm:$0xff] }
 0x43d   : > { %7617 = vmatpush2.bf16.msra.mxu0 %v9689_v23  ;;  %v1206_v4 = vld [vmem:[%s10696_s8 + $0x1918] sm:$0xff]  ;;  %v9898_v3 = vcombine.high %v1358_v20, %v1362_v5  ;;  %v9897_v62 = vcombine.low %v1358_v20, %v1362_v5 }
 0x43e   : > { %7582 = vmatpush2.bf16.msra.mxu1 %v9537_v17  ;;  %7618 = vmatprep.subr.bf16.mxu0 %v9682_v24  ;;  %v1210_v53 = vld [vmem:[%s10696_s8 + $0x1938] sm:$0xff] }
 0x43f   : > { %7583 = vmatprep.subr.bf16.mxu1 %v9530_v26  ;;  %v9746_v31 = vcombine.high %v1206_v4, %v1210_v53  ;;  %v1350_v11 = vld [vmem:[%s10696_s8 + $0x1d98] sm:$0xff]  ;;  %v9745_v22 = vcombine.low %v1206_v4, %v1210_v53 }
 0x440   : > { %v1354_v12 = vld [vmem:[%s10696_s8 + $0x1db8] sm:$0xff] }
 0x441   : > { %7619 = vmatpush2.bf16.msra.mxu0 %v9681_v32  ;;  %v1202_v19 = vld [vmem:[%s10696_s8 + $0x18f8] sm:$0xff]  ;;  %v9890_v23 = vcombine.high %v1350_v11, %v1354_v12  ;;  %v9889_v32 = vcombine.low %v1350_v11, %v1354_v12 }
 0x442   : > { %7584 = vmatpush2.bf16.msra.mxu1 %v9529_v33  ;;  %7620 = vmatprep.subr.bf16.mxu0 %v9674_v34  ;;  %v1342_v24 = vld [vmem:[%s10696_s8 + $0x1d58] sm:$0xff] }
 0x443   : > { %7585 = vmatprep.subr.bf16.mxu1 %v9522_v35  ;;  %v1346_v26 = vld [vmem:[%s10696_s8 + $0x1d78] sm:$0xff] }
 0x444   : > { %v1190_v29 = vld [vmem:[%s10696_s8 + $0x1898] sm:$0xff]  ;;  %v9882_v35 = vcombine.high %v1342_v24, %v1346_v26 }
 0x445   : > { %7621 = vmatpush2.bf16.msra.mxu0 %v9673_v39  ;;  %v1194_v36 = vld [vmem:[%s10696_s8 + $0x18b8] sm:$0xff] }
 0x446   : > { %7586 = vmatpush2.bf16.msra.mxu1 %v9521_v41  ;;  %7622 = vmatprep.subr.bf16.mxu0 %v9666_v42  ;;  %v9730_v16 = vcombine.high %v1190_v29, %v1194_v36  ;;  %v1338_v48 = vld [vmem:[%s10696_s8 + $0x1d38] sm:$0xff]  ;;  %v9881_v42 = vcombine.low %v1342_v24, %v1346_v26  ;;  %v9729_v43 = vcombine.low %v1190_v29, %v1194_v36 }
 0x447   : > { %7637 = vmatprep.subr.bf16.mxu1 %v9770_v58  ;;  %v1182_v39 = vld [vmem:[%s10696_s8 + $0x1858] sm:$0xff] }
 0x448   : > { %v1326_v28 = vld [vmem:[%s10696_s8 + $0x1cd8] sm:$0xff] }
 0x449   : > { %v7384_v54 = vpop.f32.mrf.mxu1  ;;  %7588 = vmatmul.mubr.bf16.vlgmr.msra.gmra.mxu1 %v10939_v2  ;;  %7623 = vmatpush2.bf16.msra.mxu0 %v9665_v46  ;;  %v1330_v0 = vld [vmem:[%s10696_s8 + $0x1cf8] sm:$0xff] }
 0x44a   : > { %7638 = vmatpush1.bf16.msra.mxu1 %v9769_v47  ;;  %7624 = vmatprep.subr.bf16.mxu0 %v9658_v49  ;;  %v1174_v46 = vld [vmem:[%s10696_s8 + $0x1818] sm:$0xff]  ;;  %v9866_v52 = vcombine.high %v1326_v28, %v1330_v0 }
 0x44b   : > { %v7386_v51 = vpop.f32.mrf.mxu1  ;;  %7639 = vmatprep.subr.bf16.mxu1 %v9762_v50  ;;  %7669 = vmatprep.mubr.bf16.mxu1 %v10952_v18  ;;  %v1198_v18 = vld [vmem:[%s10696_s8 + $0x18d8] sm:$0xff] }
 0x44c   : > { %v9738_v17 = vcombine.high %v1198_v18, %v1202_v19  ;;  %v9737_v34 = vcombine.low %v1198_v18, %v1202_v19  ;;  %v1178_v47 = vld [vmem:[%s10696_s8 + $0x1838] sm:$0xff] }
 0x44d   : > { %v7388_v2 = vpop.f32.mrf.mxu1  ;;  %7625 = vmatpush2.bf16.msra.mxu0 %v9657_v55  ;;  %v9714_v40 = vcombine.high %v1174_v46, %v1178_v47  ;;  %v1318_v8 = vld [vmem:[%s10696_s8 + $0x1c98] sm:$0xff] }
 0x44e   : > { %7640 = vmatpush1.bf16.msra.mxu1 %v9761_v21  ;;  %7626 = vmatprep.subr.bf16.mxu0 %v9650_v57  ;;  %v1322_v61 = vld [vmem:[%s10696_s8 + $0x1cb8] sm:$0xff]  ;;  %v9865_v21 = vcombine.low %v1326_v28, %v1330_v0  ;;  %v9713_v57 = vcombine.low %v1174_v46, %v1178_v47 }
 0x44f   : > { %v7389_v25 = vpop.f32.mrf.mxu1  ;;  %7641 = vmatprep.subr.bf16.mxu1 %v9754_v60  ;;  %v1298_v55 = vld [vmem:[%s10696_s8 + $0x1bf8] sm:$0xff]  ;;  %v9857_v2 = vcombine.low %v1318_v8, %v1322_v61 }
 0x450   : > { %v1310_v20 = vld [vmem:[%s10696_s8 + $0x1c58] sm:$0xff] }
 0x451   : > { %7627 = vmatpush2.bf16.msra.mxu0 %v9649_v63  ;;  %v1314_v5 = vld [vmem:[%s10696_s8 + $0x1c78] sm:$0xff] }
 0x452   : > { %7642 = vmatpush1.bf16.msra.mxu1 %v9753_v59  ;;  %7678 = vmatprep.subr.bf16.mxu0 %v9898_v3  ;;  %v1286_v4 = vld [vmem:[%s10696_s8 + $0x1b98] sm:$0xff]  ;;  %v9850_v59 = vcombine.high %v1310_v20, %v1314_v5  ;;  %v9849_v18 = vcombine.low %v1310_v20, %v1314_v5 }
 0x453   : > { %7643 = vmatprep.subr.bf16.mxu1 %v9746_v31  ;;  %v1290_v53 = vld [vmem:[%s10696_s8 + $0x1bb8] sm:$0xff] }
 0x454   : > { %v7343_v27 = vpop.f32.mrf.mxu0  ;;  %7629 = vmatmul.mubr.bf16.vlgmr.msra.gmra.mxu0 %v10943_v6  ;;  %v9826_v3 = vcombine.high %v1286_v4, %v1290_v53  ;;  %v1302_v25 = vld [vmem:[%s10696_s8 + $0x1c18] sm:$0xff]  ;;  %v9825_v19 = vcombine.low %v1286_v4, %v1290_v53 }
 0x455   : > { %v7344_v30 = vadd.f32 %v7343_v27, %v11755_v10  ;;  %7679 = vmatpush1.bf16.msra.mxu0 %v9897_v62  ;;  %9942 = vmatprep.mubr.msk.bf16.mxu0 %vm6403_vm0, %v10947_v14  ;;  %v1334_v10 = vld [vmem:[%s10696_s8 + $0x1d18] sm:$0xff] }
 0x456   : > { %7644 = vmatpush1.bf16.msra.mxu1 %v9745_v22  ;;  %v7345_v33 = vpop.f32.mrf.mxu0  ;;  %7680 = vmatprep.subr.bf16.mxu0 %v9890_v23  ;;  %v1186_v14 = vld [vmem:[%s10696_s8 + $0x1878] sm:$0xff]  ;;  %v9873_v49 = vcombine.low %v1334_v10, %v1338_v48 }
 0x457   : > { %v11830_v37 = vadd.f32 %v7384_v54, %v7344_v30  ;;  %v7346_v6 = vadd.f32 %v7345_v33, %v11762_v13  ;;  %7645 = vmatprep.subr.bf16.mxu1 %v9738_v17  ;;  %v9874_v13 = vcombine.high %v1334_v10, %v1338_v48  ;;  %v9722_v44 = vcombine.high %v1182_v39, %v1186_v14  ;;  %v1294_v54 = vld [vmem:[%s10696_s8 + $0x1bd8] sm:$0xff] }
 0x458   : > { %v7347_v38 = vpop.f32.mrf.mxu0  ;;  %v9721_v50 = vcombine.low %v1182_v39, %v1186_v14  ;;  %v9834_v60 = vcombine.high %v1294_v54, %v1298_v55  ;;  %v9833_v63 = vcombine.low %v1294_v54, %v1298_v55  ;;  %v1306_v31 = vld [vmem:[%s10696_s8 + $0x1c38] sm:$0xff] }
 0x459   : > { %v11837_v41 = vadd.f32 %v7386_v51, %v7346_v6  ;;  %7681 = vmatpush1.bf16.msra.mxu0 %v9889_v32  ;;  %v9858_v51 = vcombine.high %v1318_v8, %v1322_v61  ;;  %v1278_v11 = vld [vmem:[%s10696_s8 + $0x1b58] sm:$0xff]  ;;  %v9842_v62 = vcombine.high %v1302_v25, %v1306_v31  ;;  %v9841_v27 = vcombine.low %v1302_v25, %v1306_v31 }
 0x45a   : > { %7646 = vmatpush1.bf16.msra.mxu1 %v9737_v34  ;;  %v7348_v58 = vpop.f32.mrf.mxu0  ;;  %7682 = vmatprep.subr.bf16.mxu0 %v9882_v35  ;;  %v1282_v12 = vld [vmem:[%s10696_s8 + $0x1b78] sm:$0xff] }
 0x45b   : > { %7647 = vmatprep.subr.bf16.mxu1 %v9730_v16  ;;  %v9818_v22 = vcombine.high %v1278_v11, %v1282_v12  ;;  %v1398_v23 = vld [vmem:[%s10696_s8 + $0x1f18] sm:$0xff]  ;;  %v9817_v29 = vcombine.low %v1278_v11, %v1282_v12 }
 0x45c   : > { %v1402_v17 = vld [vmem:[%s10696_s8 + $0x1f38] sm:$0xff] }
 0x45d   : > { %7683 = vmatpush1.bf16.msra.mxu0 %v9881_v42  ;;  %v1270_v24 = vld [vmem:[%s10696_s8 + $0x1b18] sm:$0xff]  ;;  %v9938_v36 = vcombine.high %v1398_v23, %v1402_v17  ;;  %v9937_v6 = vcombine.low %v1398_v23, %v1402_v17 }
 0x45e   : > { %7648 = vmatpush1.bf16.msra.mxu1 %v9729_v43  ;;  %7684 = vmatprep.subr.bf16.mxu0 %v9874_v13  ;;  %v1274_v26 = vld [vmem:[%s10696_s8 + $0x1b38] sm:$0xff] }
 0x45f   : > { %7649 = vmatprep.subr.bf16.mxu1 %v9722_v44  ;;  %v9810_v30 = vcombine.high %v1270_v24, %v1274_v26  ;;  %v1390_v32 = vld [vmem:[%s10696_s8 + $0x1ed8] sm:$0xff]  ;;  %v9809_v16 = vcombine.low %v1270_v24, %v1274_v26 }
 0x460   : > { %v1394_v33 = vld [vmem:[%s10696_s8 + $0x1ef8] sm:$0xff] }
 0x461   : > { %7685 = vmatpush1.bf16.msra.mxu0 %v9873_v49  ;;  %v1262_v34 = vld [vmem:[%s10696_s8 + $0x1ad8] sm:$0xff]  ;;  %v9930_v10 = vcombine.high %v1390_v32, %v1394_v33  ;;  %v9929_v58 = vcombine.low %v1390_v32, %v1394_v33 }
 0x462   : > { %7650 = vmatpush1.bf16.msra.mxu1 %v9721_v50  ;;  %7686 = vmatprep.subr.bf16.mxu0 %v9866_v52  ;;  %v1266_v35 = vld [vmem:[%s10696_s8 + $0x1af8] sm:$0xff] }
 0x463   : > { %7651 = vmatprep.subr.bf16.mxu1 %v9714_v40  ;;  %v9802_v48 = vcombine.high %v1262_v34, %v1266_v35  ;;  %v1382_v38 = vld [vmem:[%s10696_s8 + $0x1e98] sm:$0xff]  ;;  %v9801_v43 = vcombine.low %v1262_v34, %v1266_v35  ;;  %v10178_v34 = vld [vmem:[%s11882_s29 + $0x70] sm:$0xff]  }
 0x464   : > { %v1386_v39 = vld [vmem:[%s10696_s8 + $0x1eb8] sm:$0xff]  ;;  %v10179_v35 = vld [vmem:[%s11882_s29 + $0xf0] sm:$0xff]  }
 0x465   : > { %7687 = vmatpush1.bf16.msra.mxu0 %v9865_v21  ;;  %v1254_v14 = vld [vmem:[%s10696_s8 + $0x1a98] sm:$0xff]  ;;  %v9922_v13 = vcombine.high %v1382_v38, %v1386_v39  ;;  %v9921_v49 = vcombine.low %v1382_v38, %v1386_v39  ;;  %v10183_v39 = vld [vmem:[%s11882_s29 + $0xe8] sm:$0xff]  }
 0x466   : > { %7652 = vmatpush1.bf16.msra.mxu1 %v9713_v57  ;;  %7688 = vmatprep.subr.bf16.mxu0 %v9858_v51  ;;  %v1258_v42 = vld [vmem:[%s10696_s8 + $0x1ab8] sm:$0xff] }
 0x467   : > { %7653 = vmatprep.subr.bf16.mxu1 %v9834_v60  ;;  %v9794_v44 = vcombine.high %v1254_v14, %v1258_v42  ;;  %v1374_v28 = vld [vmem:[%s10696_s8 + $0x1e58] sm:$0xff]  ;;  %v9793_v50 = vcombine.low %v1254_v14, %v1258_v42  ;;  %v10184_v42 = vld [vmem:[%s11882_s29 + $0x28] sm:$0xff]  }
 0x468   : > { %v1378_v0 = vld [vmem:[%s10696_s8 + $0x1e78] sm:$0xff] }
 0x469   : > { %7689 = vmatpush1.bf16.msra.mxu0 %v9857_v2  ;;  %v1246_v46 = vld [vmem:[%s10696_s8 + $0x1a58] sm:$0xff]  ;;  %v9914_v52 = vcombine.high %v1374_v28, %v1378_v0  ;;  %v9913_v21 = vcombine.low %v1374_v28, %v1378_v0  ;;  %v10188_v28 = vld [vmem:[%s11882_s29 + $0x20] sm:$0xff]  }
 0x46a   : > { %7654 = vmatpush2.bf16.msra.mxu1 %v9833_v63  ;;  %7690 = vmatprep.subr.bf16.mxu0 %v9850_v59  ;;  %v1250_v47 = vld [vmem:[%s10696_s8 + $0x1a78] sm:$0xff]  ;;  %v10189_v0 = vld [vmem:[%s11882_s29 + $0xa0] sm:$0xff]  }
 0x46b   : > { %7655 = vmatprep.subr.bf16.mxu1 %v9826_v3  ;;  %v9786_v40 = vcombine.high %v1246_v46, %v1250_v47  ;;  %v1366_v8 = vld [vmem:[%s10696_s8 + $0x1e18] sm:$0xff]  ;;  %v9785_v57 = vcombine.low %v1246_v46, %v1250_v47 }
 0x46c   : > { %v1370_v61 = vld [vmem:[%s10696_s8 + $0x1e38] sm:$0xff] }
 0x46d   : > { %7691 = vmatpush1.bf16.msra.mxu0 %v9849_v18  ;;  %v1238_v54 = vld [vmem:[%s10696_s8 + $0x1a18] sm:$0xff]  ;;  %v9906_v51 = vcombine.high %v1366_v8, %v1370_v61  ;;  %v9905_v20 = vcombine.low %v1366_v8, %v1370_v61  ;;  %v10194_v8 = vld [vmem:[%s11882_s29 + $0x50] sm:$0xff]  }
 0x46e   : > { %7656 = vmatpush2.bf16.msra.mxu1 %v9825_v19  ;;  %7692 = vmatprep.subr.bf16.mxu0 %v9842_v62  ;;  %v1242_v55 = vld [vmem:[%s10696_s8 + $0x1a38] sm:$0xff] }
 0x46f   : > { %7657 = vmatprep.subr.bf16.mxu1 %v9818_v22  ;;  %v9778_v60 = vcombine.high %v1238_v54, %v1242_v55  ;;  %v9777_v5 = vcombine.low %v1238_v54, %v1242_v55  ;;  %v10176_v32 = vld [vmem:[%s11882_s29 + $0x38] sm:$0xff]   ;;  %v10195_v54 = vld [vmem:[%s11882_s29 + $0xd0] sm:$0xff]  }
 0x470   : > { %v10177_v33 = vld [vmem:[%s11882_s29 + $0xb8] sm:$0xff]   ;;  %v10196_v55 = vld [vmem:[%s11882_s29 + $0x10] sm:$0xff]  }
 0x471   : > { %7693 = vmatpush1.bf16.msra.mxu0 %v9841_v27  ;;  %v10190_v46 = vld [vmem:[%s11882_s29 + $0x58] sm:$0xff]  }
 0x472   : > { %7658 = vmatpush2.bf16.msra.mxu1 %v9817_v29  ;;  %7700 = vmatprep.subr.bf16.mxu0 %v9938_v36  ;;  %v10174_v36 = vld [vmem:[%s11882_s29 + $0x78] sm:$0xff]  }
 0x473   : > { %7659 = vmatprep.subr.bf16.mxu1 %v9810_v30  ;;  %v10175_v30 = vld [vmem:[%s11882_s29 + $0xf8] sm:$0xff]  }
 0x475   : > { %7701 = vmatpush2.bf16.msra.mxu0 %v9937_v6  ;;  %v10180_v6 = vld [vmem:[%s11882_s29 + $0x30] sm:$0xff]  }
 0x476   : > { %7660 = vmatpush2.bf16.msra.mxu1 %v9809_v16  ;;  %7702 = vmatprep.subr.bf16.mxu0 %v9930_v10  ;;  %v10181_v10 = vld [vmem:[%s11882_s29 + $0xb0] sm:$0xff]  }
 0x477   : > { %7661 = vmatprep.subr.bf16.mxu1 %v9802_v48  ;;  %v10182_v48 = vld [vmem:[%s11882_s29 + $0x68] sm:$0xff]  }
 0x479   : > { %7703 = vmatpush2.bf16.msra.mxu0 %v9929_v58  ;;  %v10185_v58 = vld [vmem:[%s11882_s29 + $0xa8] sm:$0xff]  }
 0x47a   : > { %7662 = vmatpush2.bf16.msra.mxu1 %v9801_v43  ;;  %7704 = vmatprep.subr.bf16.mxu0 %v9922_v13  ;;  %v10186_v13 = vld [vmem:[%s11882_s29 + $0x60] sm:$0xff]  }
 0x47b   : > { %7663 = vmatprep.subr.bf16.mxu1 %v9794_v44  ;;  %v10187_v44 = vld [vmem:[%s11882_s29 + $0xe0] sm:$0xff]  }
 0x47d   : > { %7705 = vmatpush2.bf16.msra.mxu0 %v9921_v49  ;;  %v10191_v49 = vld [vmem:[%s11882_s29 + $0xd8] sm:$0xff]  }
 0x47e   : > { %7664 = vmatpush2.bf16.msra.mxu1 %v9793_v50  ;;  %7706 = vmatprep.subr.bf16.mxu0 %v9914_v52  ;;  %v10192_v50 = vld [vmem:[%s11882_s29 + $0x18] sm:$0xff]  }
 0x47f   : > { %7665 = vmatprep.subr.bf16.mxu1 %v9786_v40  ;;  %v10193_v40 = vld [vmem:[%s11882_s29 + $0x98] sm:$0xff]  }
 0x481   : > { %7707 = vmatpush2.bf16.msra.mxu0 %v9913_v21 }
 0x482   : > { %7666 = vmatpush2.bf16.msra.mxu1 %v9785_v57  ;;  %7708 = vmatprep.subr.bf16.mxu0 %v9906_v51  ;;  %v10197_v57 = vld [vmem:[%s11882_s29 + $0x90] sm:$0xff]   ;;  %v10198_v51 = vld [vmem:[%s11882_s29 + $0x48] sm:$0xff]  }
 0x483   : > { %7667 = vmatprep.subr.bf16.mxu1 %v9778_v60  ;;  %v10199_v60 = vld [vmem:[%s11882_s29 + $0xc8] sm:$0xff]  }
 0x485   : > { %7709 = vmatpush2.bf16.msra.mxu0 %v9905_v20  ;;  %v10200_v20 = vld [vmem:[%s11882_s29 + $0x8] sm:$0xff]  }
 0x486   : > { %7668 = vmatpush2.bf16.msra.mxu1 %v9777_v5  ;;  %10013 = vmatprep.subr.bf16.mxu0 %v10174_v36  ;;  %v10201_v5 = vld [vmem:[%s11882_s29 + $0x88] sm:$0xff]  }
 0x487   : > { %10035 = vmatprep.subr.bf16.mxu1 %v10175_v30 }
 0x488   : > { %7711 = vmatmul.mubr.bf16.vlgmr.msra.gmra.mxu0 %v11006_v15 }
 0x489   : > { %v7425_v4 = vpop.f32.mrf.mxu1  ;;  %7670 = vmatmul.mubr.bf16.vlgmr.msra.gmra.mxu1 %v11020_v45  ;;  %10014 = vmatpush3.bf16.msra.mxu0 %v10176_v32 }
 0x48a   : > { %10036 = vmatpush3.bf16.msra.mxu1 %v10177_v33  ;;  %10015 = vmatprep.subr.bf16.mxu0 %v10178_v34 }
 0x48b   : > { %v7427_v53 = vpop.f32.mrf.mxu1  ;;  %10037 = vmatprep.subr.bf16.mxu1 %v10179_v35 }
 0x48d   : > { %v7429_v2 = vpop.f32.mrf.mxu1  ;;  %10016 = vmatpush3.bf16.msra.mxu0 %v10180_v6 }
 0x48e   : > { %10038 = vmatpush3.bf16.msra.mxu1 %v10181_v10  ;;  %10017 = vmatprep.subr.bf16.mxu0 %v10182_v48  ;;  %v10204_v2 = vld [vmem:[%s11882_s29] sm:$0xff]  }
 0x48f   : > { %v7430_v63 = vpop.f32.mrf.mxu1  ;;  %10039 = vmatprep.subr.bf16.mxu1 %v10183_v39 }
 0x490   : > { %v10205_v63 = vld [vmem:[%s11882_s29 + $0x80] sm:$0xff]  }
 0x491   : > { %10018 = vmatpush3.bf16.msra.mxu0 %v10184_v42 }
 0x492   : > { %10040 = vmatpush3.bf16.msra.mxu1 %v10185_v58  ;;  %10019 = vmatprep.subr.bf16.mxu0 %v10186_v13 }
 0x493   : > { %10041 = vmatprep.subr.bf16.mxu1 %v10187_v44 }
 0x494   : > { %v7466_v59 = vpop.f32.mrf.mxu0 }
 0x495   : > { %v7467_v3 = vadd.f32 %v7466_v59, %v7425_v4  ;;  %10020 = vmatpush3.bf16.msra.mxu0 %v10188_v28  ;;  %v10202_v4 = vld [vmem:[%s11882_s29 + $0x40] sm:$0xff]   ;;  %v7737_v59 = vrot.slane %v11542_v1, 4 }
 0x496   : > { %v7468_v25 = vpop.f32.mrf.mxu0  ;;  %10042 = vmatpush3.bf16.msra.mxu1 %v10189_v0  ;;  %10021 = vmatprep.subr.bf16.mxu0 %v10190_v46 }
 0x497   : > { %v7469_v31 = vadd.f32 %v7468_v25, %v7427_v53  ;;  %10043 = vmatprep.subr.bf16.mxu1 %v10191_v49  ;;  %v10203_v53 = vld [vmem:[%s11882_s29 + $0xc0] sm:$0xff]   ;;  %v10207_v25 = vld [vmem:[%s11882_s29 + $0x1f8] sm:$0xff]  }
 0x498   : > { %v7470_v11 = vpop.f32.mrf.mxu0 }
 0x499   : > { %10022 = vmatpush3.bf16.msra.mxu0 %v10192_v50  ;;  %v7731_v11 = vrot.slane %v11536_v56, 4 }
 0x49a   : > { %v7471_v12 = vpop.f32.mrf.mxu0  ;;  %10044 = vmatpush3.bf16.msra.mxu1 %v10193_v40  ;;  %10023 = vmatprep.subr.bf16.mxu0 %v10194_v8 }
 0x49b   : > { %10045 = vmatprep.subr.bf16.mxu1 %v10195_v54  ;;  %v7719_v12 = vrot.slane %v11252_v7, 4 }
 0x49d   : > { %10024 = vmatpush3.bf16.msra.mxu0 %v10196_v55 }
 0x49e   : > { %10046 = vmatpush3.bf16.msra.mxu1 %v10197_v57  ;;  %10025 = vmatprep.subr.bf16.mxu0 %v10198_v51 }
 0x49f   : > { %10047 = vmatprep.subr.bf16.mxu1 %v10199_v60 }
 0x4a1   : > { %10026 = vmatpush3.bf16.msra.mxu0 %v10200_v20 }
 0x4a2   : > { %10048 = vmatpush3.bf16.msra.mxu1 %v10201_v5  ;;  %10027 = vmatprep.subr.bf16.mxu0 %v10202_v4 }
 0x4a3   : > { %10049 = vmatprep.subr.bf16.mxu1 %v10203_v53 }
 0x4a5   : > { %10028 = vmatpush3.bf16.msra.mxu0 %v10204_v2 }
 0x4a6   : > { %10050 = vmatpush3.bf16.msra.mxu1 %v10205_v63 }
 0x4a7   : > { %10079 = vmatprep.subr.bf16.mxu1 %v10207_v25 }
 0x4c9   : > { %v7507_v18 = vpop.f32.mrf.mxu1 }
 0x4ca   : > { %v7508_v19 = vadd.f32 %v7507_v18, %v7467_v3  ;;  %v10206_v3 = vld [vmem:[%s11882_s29 + $0x178] sm:$0xff]   ;;  %v7738_v18 = vadd.f32 %v7737_v59, %v11542_v1 }
 0x4cb   : > { %v7509_v62 = vpop.f32.mrf.mxu1  ;;  %10057 = vmatprep.subr.bf16.mxu0 %v10206_v3 }
 0x4cc   : > { %v7510_v22 = vadd.f32 %v7509_v62, %v7469_v31  ;;  %v7725_v31 = vrot.slane %v11259_v9, 4 }
 0x4cd   : > { %v7511_v23 = vpop.f32.mrf.mxu1 }
 0x4ce   : > { %v7726_v62 = vadd.f32 %v7725_v31, %v11259_v9  ;;  %v7743_v23 = vrot.slane %v11830_v37, 4 }
 0x4cf   : > { %v7512_v17 = vpop.f32.mrf.mxu1 }
 0x4d0   : > { %v7720_v17 = vadd.f32 %v7719_v12, %v11252_v7  ;;  %v7744_v36 = vadd.f32 %v7743_v23, %v11830_v37 }
 0x4d2   : > { %v7721_v30 = vrot.slane %v7720_v17, 2  ;;  %v7745_v6 = vrot.slane %v7744_v36, 2 }
 0x4d4   : > { %v7548_v15 = vpop.f32.mrf.mxu0  ;;  %v7722_v10 = vadd.f32 %v7721_v30, %v7720_v17  ;;  %v7746_v58 = vadd.f32 %v7745_v6, %v7744_v36 }
 0x4d5   : > { %v11877_v24 = vadd.f32 %v7548_v15, %v7508_v19  ;;  %v7749_v19 = vrot.slane %v11837_v41, 4  ;;  %v7739_v15 = vrot.slane %v7738_v18, 2 }
 0x4d6   : > { %v7550_v45 = vpop.f32.mrf.mxu0  ;;  %v7747_v46 = vrot.slane %v7746_v58, 1 }
 0x4d7   : > { %v11879_v26 = vadd.f32 %v7550_v45, %v7510_v22  ;;  %v7732_v22 = vadd.f32 %v7731_v11, %v11536_v56  ;;  %v7750_v45 = vadd.f32 %v7749_v19, %v11837_v41  ;;  %v7740_v32 = vadd.f32 %v7739_v15, %v7738_v18 }
 0x4d8   : > { %v7552_v27 = vpop.f32.mrf.mxu0  ;;  %v7748_v54 = vadd.f32 %v7747_v46, %v7746_v58 }
 0x4d9   : > { %v7727_v27 = vrot.slane %v7726_v62, 2  ;;  %v7751_v33 = vrot.slane %v7750_v45, 2  ;;  %v7741_v48 = vrot.slane %v7740_v32, 1 }
 0x4da   : > { %v7553_v29 = vpop.f32.mrf.mxu0  ;;  %v11954_v20 = vmul.f32 0.125, %v7748_v54 }
 0x4db   : > { %v7733_v29 = vrot.slane %v7732_v22, 2  ;;  %v7728_v34 = vadd.f32 %v7727_v27, %v7726_v62  ;;  %v7752_v39 = vadd.f32 %v7751_v33, %v7750_v45  ;;  %v7742_v13 = vadd.f32 %v7741_v48, %v7740_v32 }
 0x4dc   : > { %v7779_v3 = vsub.f32 %v11830_v37, %v11954_v20 }
 0x4dd   : > { %v7734_v35 = vadd.f32 %v7733_v29, %v7732_v22  ;;  %v7753_v44 = vrot.slane %v7752_v39, 1  ;;  %v11938_v50 = vmul.f32 0.125, %v7742_v13 }
 0x4de   : > { %v7787_v45 = vmul.f32 %v7779_v3, %v7779_v3 }
 0x4df   : > { %v7735_v42 = vrot.slane %v7734_v35, 1  ;;  %v7754_v40 = vadd.f32 %v7753_v44, %v7752_v39 }
 0x4e1   : > { %v7736_v0 = vadd.f32 %v7735_v42, %v7734_v35  ;;  %v11948_v57 = vmul.f32 0.125, %v7754_v40 }
 0x4e3   : > { %v7780_v53 = vsub.f32 %v11837_v41, %v11948_v57 }
 0x4e5   : > { %v7788_v62 = vmul.f32 %v7780_v53, %v7780_v53 }
 0x4e7   : > { %v7821_v30 = vrot.slane %v7788_v62, 4 }
 0x4e9   : > { %v7822_v58 = vadd.f32 %v7821_v30, %v7788_v62 }
 0x509   : > { %v11891_v16 = vpop.f32.mrf.mxu1 }
 0x50a   : > { %v7590_v2 = vadd.f32 %v11891_v16, %v11877_v24 }
 0x50b   : > { %v11895_v38 = vpop.f32.mrf.mxu1 }
 0x50c   : > { %v7592_v25 = vadd.f32 %v11895_v38, %v11879_v26 }
 0x50d   : > { %v7593_v14 = vpop.f32.mrf.mxu1 }
 0x50e   : > { %v7729_v14 = vrot.slane %v7728_v34, 1 }
 0x50f   : > { %v7594_v43 = vpop.f32.mrf.mxu1 }
 0x510   : > { %v7723_v43 = vrot.slane %v7722_v10, 1  ;;  %v7730_v28 = vadd.f32 %v7729_v14, %v7728_v34 }
 0x512   : > { %v7724_v49 = vadd.f32 %v7723_v43, %v7722_v10  ;;  %v11940_v8 = vmul.f32 0.125, %v7730_v28  ;;  %v7815_v10 = vrot.slane %v7787_v45, 4 }
 0x514   : > { %v11905_v47 = vpop.f32.mrf.mxu0  ;;  %v11944_v55 = vmul.f32 0.125, %v7724_v49  ;;  %v7776_v51 = vsub.f32 %v11259_v9, %v11940_v8 }
 0x515   : > { %v7631_v31 = vadd.f32 %v11905_v47, %v7590_v2 }
 0x516   : > { %v11909_v52 = vpop.f32.mrf.mxu0  ;;  %v7775_v5 = vsub.f32 %v11252_v7, %v11944_v55  ;;  %v7784_v63 = vmul.f32 %v7776_v51, %v7776_v51 }
 0x517   : > { %v7633_v22 = vadd.f32 %v11909_v52, %v7592_v25 }
 0x518   : > { %v7634_v61 = vpop.f32.mrf.mxu0  ;;  %v7783_v12 = vmul.f32 %v7775_v5, %v7775_v5  ;;  %v7797_v24 = vrot.slane %v7784_v63, 4 }
 0x519   : > { %v11942_v61 = vmul.f32 0.125, %v7736_v0  ;;  %v7816_v0 = vadd.f32 %v7815_v10, %v7787_v45 }
 0x51a   : > { %v7635_v21 = vpop.f32.mrf.mxu0  ;;  %v7791_v26 = vrot.slane %v7783_v12, 4  ;;  %v7798_v52 = vadd.f32 %v7797_v24, %v7784_v63 }
 0x51b   : > { %v7778_v21 = vsub.f32 %v11542_v1, %v11938_v50  ;;  %v7777_v60 = vsub.f32 %v11536_v56, %v11942_v61  ;;  %v7817_v53 = vrot.slane %v7816_v0, 2 }
 0x51c   : > { %v7792_v14 = vadd.f32 %v7791_v26, %v7783_v12  ;;  %v7799_v44 = vrot.slane %v7798_v52, 2 }
 0x51d   : > { %v7786_v4 = vmul.f32 %v7778_v21, %v7778_v21  ;;  %v7785_v59 = vmul.f32 %v7777_v60, %v7777_v60  ;;  %v7823_v21 = vrot.slane %v7822_v58, 2 }
 0x51e   : > { %v7793_v40 = vrot.slane %v7792_v14, 2  ;;  %v7800_v5 = vadd.f32 %v7799_v44, %v7798_v52 }
 0x51f   : > { %v7809_v19 = vrot.slane %v7786_v4, 4  ;;  %v7803_v15 = vrot.slane %v7785_v59, 4  ;;  %v7824_v25 = vadd.f32 %v7823_v21, %v7822_v58 }
 0x520   : > { %v7801_v12 = vrot.slane %v7800_v5, 1 }
 0x521   : > { %v7810_v47 = vadd.f32 %v7809_v19, %v7786_v4  ;;  %v7804_v6 = vadd.f32 %v7803_v15, %v7785_v59  ;;  %v7794_v59 = vadd.f32 %v7793_v40, %v7792_v14  ;;  %v7818_v19 = vadd.f32 %v7817_v53, %v7816_v0 }
 0x522   : > { %v7825_v24 = vrot.slane %v7824_v25, 1  ;;  %v7802_v45 = vadd.f32 %v7801_v12, %v7800_v5 }
 0x523   : > { %v7811_v42 = vrot.slane %v7810_v47, 2  ;;  %v7805_v28 = vrot.slane %v7804_v6, 2 }
 0x525   : > { %v7812_v54 = vadd.f32 %v7811_v42, %v7810_v47  ;;  %v7806_v4 = vadd.f32 %v7805_v28, %v7804_v6 }
 0x527   : > { %v7813_v3 = vrot.slane %v7812_v54, 1 }
 0x548   : > { %v7712_v11 = vpop.f32.mrf.mxu0 }
 0x549   : > { %v7671_v18 = vpop.f32.mrf.mxu1 }
 0x54a   : > { %v7672_v23 = vadd.f32 %v7671_v18, %v7631_v31  ;;  %v7714_v17 = vpop.f32.mrf.mxu0  ;;  %v7807_v18 = vrot.slane %v7806_v4, 1 }
 0x54b   : > { %v7673_v16 = vpop.f32.mrf.mxu1 }
 0x54c   : > { %v11968_v27 = vadd.f32 %v7712_v11, %v7672_v23  ;;  %v7674_v29 = vadd.f32 %v7673_v16, %v7633_v22  ;;  %v7716_v36 = vpop.f32.mrf.mxu0  ;;  %v7795_v23 = vrot.slane %v7794_v59, 1 }
 0x54d   : > { %v7675_v38 = vpop.f32.mrf.mxu1  ;;  %v7819_v36 = vrot.slane %v7818_v19, 1 }
 0x54e   : > { %v7755_v32 = vrot.slane %v11968_v27, 4  ;;  %v11971_v33 = vadd.f32 %v7714_v17, %v7674_v29  ;;  %v7717_v34 = vpop.f32.mrf.mxu0  ;;  %v7814_v17 = vadd.f32 %v7813_v3, %v7812_v54  ;;  %v7808_v29 = vadd.f32 %v7807_v18, %v7806_v4 }
 0x54f   : > { %v7676_v35 = vpop.f32.mrf.mxu1  ;;  %v7796_v47 = vadd.f32 %v7795_v23, %v7794_v59  ;;  %v7820_v10 = vadd.f32 %v7819_v36, %v7818_v19  ;;  %v10446_v59 = vmov 1966171168  }
 0x550   : > { %v7756_v48 = vadd.f32 %v7755_v32, %v11968_v27  ;;  %v7761_v39 = vrot.slane %v11971_v33, 4  ;;  %v7842_v30 = vmul.f32 0.125, %v7814_v17  ;;  %v7826_v32 = vadd.f32 %v7825_v24, %v7824_v25 }
 0x551   : > { %v7840_v35 = vmul.f32 0.125, %v7802_v45  ;;  %v7841_v6 = vmul.f32 0.125, %v7808_v29  ;;  %v7839_v14 = vmul.f32 0.125, %v7796_v47  ;;  %v7843_v0 = vmul.f32 0.125, %v7820_v10 }
 0x552   : > { %v7757_v43 = vrot.slane %v7756_v48, 2  ;;  %v7762_v13 = vadd.f32 %v7761_v39, %v11971_v33  ;;  %v7851_v42 = vadd.f32 1e-05, %v7842_v30  ;;  %v7844_v58 = vmul.f32 0.125, %v7826_v32 }
 0x553   : > { %v7849_v44 = vadd.f32 1e-05, %v7840_v35  ;;  %v7850_v28 = vadd.f32 1e-05, %v7841_v6  ;;  %v7848_v40 = vadd.f32 1e-05, %v7839_v14  ;;  %v7877_v3 = vunpack.c.l.s4 %v10446_v59 }
 0x554   : > { %v7758_v46 = vadd.f32 %v7757_v43, %v7756_v48  ;;  %v7763_v49 = vrot.slane %v7762_v13, 2  ;;  %10238 = vrsqrt.f32 %v7851_v42  ;;  %v7853_v54 = vadd.f32 1e-05, %v7844_v58 }
 0x555   : > { %10240 = vrsqrt.f32 %v7849_v44  ;;  %v7879_v25 = vlaneseq  ;;  %v7878_v18 = vunpack.c.0.s8 %v7877_v3 }
 0x556   : > { %v7759_v51 = vrot.slane %v7758_v46, 1  ;;  %v7764_v60 = vadd.f32 %v7763_v49, %v7762_v13  ;;  %10242 = vrsqrt.f32 %v7850_v28 }
 0x557   : > { %10244 = vrsqrt.f32 %v7848_v40  ;;  %v11984_v19 = vshrl.u32 %v7879_v25, 7 }
 0x558   : > { %v7760_v2 = vadd.f32 %v7759_v51, %v7758_v46  ;;  %v7765_v63 = vrot.slane %v7764_v60, 1  ;;  %10246 = vrsqrt.f32 %v7853_v54 }
 0x559   : > { %v7947_v42 = vsub.s32 5, %v11984_v19  ;;  %v7951_v58 = vsub.s32 6, %v11984_v19  ;;  %v7931_v44 = vsub.s32 1, %v11984_v19  ;;  %v7935_v28 = vsub.s32 2, %v11984_v19 }
 0x55a   : > { %v11976_v31 = vmul.f32 0.125, %v7760_v2  ;;  %v7766_v11 = vadd.f32 %v7765_v63, %v7764_v60  ;;  %v7852_v60 = vadd.f32 1e-05, %v7843_v0  ;;  %v7939_v0 = vsub.s32 3, %v11984_v19 }
 0x55c   : > { %v7781_v62 = vsub.f32 %v11968_v27, %v11976_v31  ;;  %v11980_v22 = vmul.f32 0.125, %v7766_v11  ;;  %10248 = vrsqrt.f32 %v7852_v60 }
 0x55e   : > { %v7789_v16 = vmul.f32 %v7781_v62, %v7781_v62  ;;  %v7782_v15 = vsub.f32 %v11971_v33, %v11980_v22 }
 0x560   : > { %v7827_v26 = vrot.slane %v7789_v16, 4  ;;  %v7790_v38 = vmul.f32 %v7782_v15, %v7782_v15  ;;  %v7881_v15 = vsub.s32 %v7878_v18, %v11984_v19 }
 0x561   : > { %v10239_v11 = vpop.eup %10238 }
 0x562   : > { %v7828_v34 = vadd.f32 %v7827_v26, %v7789_v16  ;;  %v7833_v52 = vrot.slane %v7790_v38, 4  ;;  %v10241_v12 = vpop.eup %10240 }
 0x563   : > { %v10243_v62 = vpop.eup %10242 }
 0x564   : > { %v7829_v48 = vrot.slane %v7828_v34, 2  ;;  %v7834_v39 = vadd.f32 %v7833_v52, %v7790_v38  ;;  %v10245_v23 = vpop.eup %10244  ;;  %v7873_v17 = vcombine.low %v10243_v62, %v10239_v11 }
 0x565   : > { %v10247_v24 = vpop.eup %10246  ;;  %v7872_v16 = vcombine.low %v10245_v23, %v10241_v12 }
 0x566   : > { %v7830_v43 = vadd.f32 %v7829_v48, %v7828_v34  ;;  %v7835_v13 = vrot.slane %v7834_v39, 2  ;;  %v7889_v36 = vrot.slane %v7873_v17, %v7881_v15  ;;  %v7847_v48 = vld [vmem:[%s10703_s9] sm:$0xff] }
 0x567   : > { %v7882_v47 = vrot.slane %v7872_v16, %v7881_v15 }
 0x568   : > { %v7831_v46 = vrot.slane %v7830_v43, 1  ;;  %v7836_v49 = vadd.f32 %v7835_v13, %v7834_v39  ;;  %v7943_v39 = vsub.s32 4, %v11984_v19  ;;  %v7927_v13 = vsub.s32 0, %v11984_v19 }
 0x569   : > { %v10249_v45 = vpop.eup %10248  ;;  %v7904_v32 = vcombine.low %v7882_v47, %v7889_v36 }
 0x56a   : > { %v7832_v21 = vadd.f32 %v7831_v46, %v7830_v43  ;;  %v7837_v51 = vrot.slane %v7836_v49, 1  ;;  %v7874_v26 = vcombine.low %v10249_v45, %v10247_v24  ;;  %v7955_v43 = vsub.s32 7, %v11984_v19 }
 0x56b   : > { %v7912_v6 = vrot.slane %v7904_v32, %v7881_v15 }
 0x56c   : > { %v7845_v5 = vmul.f32 0.125, %v7832_v21  ;;  %v7838_v4 = vadd.f32 %v7837_v51, %v7836_v49  ;;  %v7896_v34 = vrot.slane %v7874_v26, %v7881_v15 }
 0x56e   : > { %v7854_v53 = vadd.f32 1e-05, %v7845_v5  ;;  %v7846_v2 = vmul.f32 0.125, %v7838_v4 }
 0x570   : > { %v7855_v63 = vadd.f32 1e-05, %v7846_v2  ;;  %10250 = vrsqrt.f32 %v7854_v53 }
 0x572   : > { %10252 = vrsqrt.f32 %v7855_v63 }
 0x57d   : > { %v10251_v29 = vpop.eup %10250 }
 0x57f   : > { %v10253_v38 = vpop.eup %10252 }
 0x580   : > { %v7875_v30 = vcombine.low %v10251_v29, %v10253_v38 }
 0x582   : > { %v7903_v52 = vrot.slane %v7875_v30, %v7881_v15 }
 0x584   : > { %v7905_v35 = vcombine.low %v7896_v34, %v7903_v52 }
 0x586   : > { %v7919_v10 = vrot.slane %v7905_v35, %v7881_v15 }
 0x588   : > { %v7920_v14 = vcombine.low %v7912_v6, %v7919_v10 }
 0x58a   : > { %v7922_v46 = vmul.f32 %v7920_v14, %v7847_v48 }
 0x58c   : > { %v11998_v49 = vrot.slane %v7922_v46, %v7943_v39  ;;  %v7948_v40 = vrot.slane %v7922_v46, %v7947_v42  ;;  %v12002_v54 = vrot.slane %v7922_v46, %v7951_v58  ;;  %v7956_v21 = vrot.slane %v7922_v46, %v7955_v43 }
 0x58d   : > { %v7928_v51 = vrot.slane %v7922_v46, %v7927_v13  ;;  %v7932_v60 = vrot.slane %v7922_v46, %v7931_v44  ;;  %v7936_v5 = vrot.slane %v7922_v46, %v7935_v28  ;;  %v7940_v4 = vrot.slane %v7922_v46, %v7939_v0 }
 0x58e   : > { %v7969_v53 = vmul.f32 %v11998_v49, %v11954_v20  ;;  %v7970_v2 = vmul.f32 %v7948_v40, %v11948_v57  ;;  %v7971_v63 = vmul.f32 %v12002_v54, %v11976_v31  ;;  %v7972_v59 = vmul.f32 %v7956_v21, %v11980_v22 }
 0x58f   : > { %v7965_v3 = vmul.f32 %v7928_v51, %v11944_v55  ;;  %v7966_v25 = vmul.f32 %v7932_v60, %v11940_v8  ;;  %v7967_v11 = vmul.f32 %v7936_v5, %v11942_v61  ;;  %v7968_v12 = vmul.f32 %v7940_v4, %v11938_v50  ;;  %v7923_v55 = vld [vmem:[%s10705_s24] sm:$0xff] }
 0x590   : > { %v7983_v18 = vcombine.low %v7969_v53, %v7970_v2  ;;  %v7984_v62 = vcombine.low %v7971_v63, %v7972_v59  ;;  %v8033_v8 = vmul.f32 %v7932_v60, %v11259_v9  ;;  %v8035_v50 = vmul.f32 %v7940_v4, %v11542_v1  ;;  %v10211_v60 = vld [vmem:[%s11882_s29 + $0x1f0] sm:$0xff]   ;;  %v10214_v63 = vld [vmem:[%s11882_s29 + $0x168] sm:$0xff]  }
 0x591   : > { %v7981_v23 = vcombine.low %v7965_v3, %v7966_v25  ;;  %v7982_v20 = vcombine.low %v7967_v11, %v7968_v12  ;;  %v8032_v61 = vmul.f32 %v7928_v51, %v11252_v7  ;;  %v8034_v38 = vmul.f32 %v7936_v5, %v11536_v56  ;;  %v10210_v51 = vld [vmem:[%s11882_s29 + $0x170] sm:$0xff]   ;;  %v10215_v59 = vld [vmem:[%s11882_s29 + $0x1e8] sm:$0xff]   ;;  %v10218_v11 = vld [vmem:[%s11882_s29 + $0x160] sm:$0xff]  }
 0x592   : > { %v8005_v17 = vrot.slane %v7983_v18, %v7881_v15  ;;  %v8012_v57 = vrot.slane %v7984_v62, %v7881_v15  ;;  %v8037_v34 = vmul.f32 %v7948_v40, %v11837_v41  ;;  %v8039_v9 = vmul.f32 %v7956_v21, %v11971_v33  ;;  %v10208_v40 = vld [vmem:[%s11882_s29 + $0x138] sm:$0xff]   ;;  %v10212_v53 = vld [vmem:[%s11882_s29 + $0x130] sm:$0xff]   ;;  %v10216_v3 = vld [vmem:[%s11882_s29 + $0x128] sm:$0xff]  }
 0x593   : > { %v7991_v24 = vrot.slane %v7981_v23, %v7881_v15  ;;  %v7998_v16 = vrot.slane %v7982_v20, %v7881_v15  ;;  %v10209_v21 = vld [vmem:[%s11882_s29 + $0x1b8] sm:$0xff]   ;;  %v10213_v2 = vld [vmem:[%s11882_s29 + $0x1b0] sm:$0xff]   ;;  %v10217_v25 = vld [vmem:[%s11882_s29 + $0x1a8] sm:$0xff]  }
 0x594   : > { %v8014_v31 = vcombine.low %v8005_v17, %v8012_v57  ;;  %v10219_v12 = vld [vmem:[%s11882_s29 + $0x1e0] sm:$0xff]   ;;  %v10222_v23 = vld [vmem:[%s11882_s29 + $0x158] sm:$0xff]  }
 0x595   : > { %v8013_v45 = vcombine.low %v7991_v24, %v7998_v16  ;;  %v10220_v18 = vld [vmem:[%s11882_s29 + $0x120] sm:$0xff]   ;;  %v10223_v20 = vld [vmem:[%s11882_s29 + $0x1d8] sm:$0xff]   ;;  %v10226_v24 = vld [vmem:[%s11882_s29 + $0x150] sm:$0xff]  }
 0x596   : > { %v8028_v22 = vrot.slane %v8014_v31, %v7881_v15  ;;  %v10221_v62 = vld [vmem:[%s11882_s29 + $0x1a0] sm:$0xff]   ;;  %v10224_v17 = vld [vmem:[%s11882_s29 + $0x118] sm:$0xff]   ;;  %v10227_v16 = vld [vmem:[%s11882_s29 + $0x1d0] sm:$0xff]  }
 0x597   : > { %v8021_v29 = vrot.slane %v8013_v45, %v7881_v15  ;;  %v10225_v57 = vld [vmem:[%s11882_s29 + $0x198] sm:$0xff]   ;;  %v10228_v31 = vld [vmem:[%s11882_s29 + $0x110] sm:$0xff]  }
 0x598   : > { %v10229_v45 = vld [vmem:[%s11882_s29 + $0x190] sm:$0xff]  }
 0x599   : > { %v8029_v36 = vcombine.low %v8021_v29, %v8028_v22  ;;  %v10230_v22 = vld [vmem:[%s11882_s29 + $0x148] sm:$0xff]  }
 0x59a   : > { %v10231_v29 = vld [vmem:[%s11882_s29 + $0x1c8] sm:$0xff]  }
 0x59b   : > { %v12015_v26 = vsub.f32 %v7923_v55, %v8029_v36 }
 0x59d   : > { %v8048_v47 = vrot.slane %v12015_v26, %v7931_v44  ;;  %v8056_v30 = vrot.slane %v12015_v26, %v7939_v0  ;;  %v8044_v32 = vrot.slane %v12015_v26, %v7927_v13  ;;  %v8052_v15 = vrot.slane %v12015_v26, %v7935_v28 }
 0x59e   : > { %v8064_v52 = vrot.slane %v12015_v26, %v7947_v42  ;;  %v8072_v1 = vrot.slane %v12015_v26, %v7955_v43  ;;  %v8060_v55 = vrot.slane %v12015_v26, %v7943_v39  ;;  %v8068_v36 = vrot.slane %v12015_v26, %v7951_v58  ;;  %v10235_v39 = vld [vmem:[%s11882_s29 + $0x1c0] sm:$0xff]  }
 0x59f   : > { %v8082_v35 = vadd.f32 %v8048_v47, %v8033_v8  ;;  %v8084_v7 = vadd.f32 %v8056_v30, %v8035_v50  ;;  %v8081_v56 = vadd.f32 %v8044_v32, %v8032_v61  ;;  %v8083_v6 = vadd.f32 %v8052_v15, %v8034_v38  ;;  %v10232_v61 = vld [vmem:[%s11882_s29 + $0x108] sm:$0xff]   ;;  %v10234_v47 = vld [vmem:[%s11882_s29 + $0x140] sm:$0xff]  }
 0x5a0   : > { %v8086_v10 = vadd.f32 %v8064_v52, %v8037_v34  ;;  %v8088_v48 = vadd.f32 %v8072_v1, %v8039_v9  ;;  %v8036_v8 = vmul.f32 %v11998_v49, %v11830_v37  ;;  %v8038_v50 = vmul.f32 %v12002_v54, %v11968_v27  ;;  %v10233_v38 = vld [vmem:[%s11882_s29 + $0x188] sm:$0xff]   ;;  %v10236_v58 = vld [vmem:[%s11882_s29 + $0x100] sm:$0xff]  }
 0x5a1   : > { %v8090_v14 = vmax.f32 %v8082_v35, 0.0  ;;  %v8092_v13 = vmax.f32 %v8084_v7, 0.0  ;;  %v8089_v44 = vmax.f32 %v8081_v56, 0.0  ;;  %v8091_v41 = vmax.f32 %v8083_v6, 0.0  ;;  %v10237_v26 = vld [vmem:[%s11882_s29 + $0x180] sm:$0xff]  }
 0x5a2   : > { %v8094_v28 = vmax.f32 %v8086_v10, 0.0  ;;  %v8096_v42 = vmax.f32 %v8088_v48, 0.0  ;;  %v8085_v30 = vadd.f32 %v8060_v55, %v8036_v8  ;;  %v8087_v19 = vadd.f32 %v8068_v36, %v8038_v50 }
 0x5a3   : > { %v8098_v0 = vpack.c.bf16 %v8090_v14, %v8090_v14  ;;  %v8100_v33 = vpack.c.bf16 %v8092_v13, %v8092_v13  ;;  %v8097_v43 = vpack.c.bf16 %v8089_v44, %v8089_v44  ;;  %v8099_v46 = vpack.c.bf16 %v8091_v41, %v8091_v41 }
 0x5a4   : > { %v8102_v5 = vpack.c.bf16 %v8094_v28, %v8094_v28  ;;  %v8104_v4 = vpack.c.bf16 %v8096_v42, %v8096_v42  ;;  %v8093_v37 = vmax.f32 %v8085_v30, 0.0  ;;  %v8095_v49 = vmax.f32 %v8087_v19, 0.0 }
 0x5a5   : > { %8649 = vmatprep.mubr.bf16.mxu0 %v8098_v0  ;;  %8689 = vmatprep.mubr.bf16.mxu1 %v8100_v33 }
 0x5a6   : > { %8650 = vmatmul.mubr.bf16.vlgmr.msra.gmra.mxu0 %v8097_v43  ;;  %8690 = vmatmul.mubr.bf16.vlgmr.msra.gmra.mxu1 %v8099_v46  ;;  %v8101_v27 = vpack.c.bf16 %v8093_v37, %v8093_v37  ;;  %v8103_v54 = vpack.c.bf16 %v8095_v49, %v8095_v49 }
 0x5a7   : > { %10058 = vmatpush3.bf16.msra.mxu0 %v10208_v40  ;;  %10080 = vmatpush3.bf16.msra.mxu1 %v10209_v21 }
 0x5a8   : > { %8729 = vmatprep.mubr.bf16.mxu0 %v8102_v5  ;;  %8769 = vmatprep.mubr.bf16.mxu1 %v8104_v4 }
 0x5a9   : > { %10059 = vmatprep.subr.bf16.mxu0 %v10210_v51  ;;  %10081 = vmatprep.subr.bf16.mxu1 %v10211_v60 }
 0x5ab   : > { %10060 = vmatpush3.bf16.msra.mxu0 %v10212_v53  ;;  %10082 = vmatpush3.bf16.msra.mxu1 %v10213_v2 }
 0x5ac   : > { %10061 = vmatprep.subr.bf16.mxu0 %v10214_v63  ;;  %10083 = vmatprep.subr.bf16.mxu1 %v10215_v59 }
 0x5af   : > { %10062 = vmatpush3.bf16.msra.mxu0 %v10216_v3  ;;  %10084 = vmatpush3.bf16.msra.mxu1 %v10217_v25 }
 0x5b0   : > { %10063 = vmatprep.subr.bf16.mxu0 %v10218_v11  ;;  %10085 = vmatprep.subr.bf16.mxu1 %v10219_v12 }
 0x5b3   : > { %10064 = vmatpush3.bf16.msra.mxu0 %v10220_v18  ;;  %10086 = vmatpush3.bf16.msra.mxu1 %v10221_v62 }
 0x5b4   : > { %10065 = vmatprep.subr.bf16.mxu0 %v10222_v23  ;;  %10087 = vmatprep.subr.bf16.mxu1 %v10223_v20 }
 0x5b7   : > { %10066 = vmatpush3.bf16.msra.mxu0 %v10224_v17  ;;  %10088 = vmatpush3.bf16.msra.mxu1 %v10225_v57 }
 0x5b8   : > { %10067 = vmatprep.subr.bf16.mxu0 %v10226_v24  ;;  %10089 = vmatprep.subr.bf16.mxu1 %v10227_v16 }
 0x5bb   : > { %10068 = vmatpush3.bf16.msra.mxu0 %v10228_v31  ;;  %10090 = vmatpush3.bf16.msra.mxu1 %v10229_v45 }
 0x5bc   : > { %10069 = vmatprep.subr.bf16.mxu0 %v10230_v22  ;;  %10091 = vmatprep.subr.bf16.mxu1 %v10231_v29 }
 0x5bf   : > { %10070 = vmatpush3.bf16.msra.mxu0 %v10232_v61  ;;  %10092 = vmatpush3.bf16.msra.mxu1 %v10233_v38 }
 0x5c0   : > { %10071 = vmatprep.subr.bf16.mxu0 %v10234_v47  ;;  %10093 = vmatprep.subr.bf16.mxu1 %v10235_v39 }
 0x5c3   : > { %10072 = vmatpush3.bf16.msra.mxu0 %v10236_v58  ;;  %10094 = vmatpush3.bf16.msra.mxu1 %v10237_v26 }
 0x5c6   : > { %8730 = vmatmul.mubr.bf16.vlgmr.msra.gmra.mxu0 %v8101_v27  ;;  %8770 = vmatmul.mubr.bf16.vlgmr.msra.gmra.mxu1 %v8103_v54 }
 0x666   : > { %v10029_v32 = vpop.f32.mrf.mxu0  ;;  %v10051_v15 = vpop.f32.mrf.mxu1 }
 0x668   : > { %v10030_v34 = vpop.f32.mrf.mxu0  ;;  %v10052_v52 = vpop.f32.mrf.mxu1 }
 0x669   : > { %v10031_v56 = vadd.f32 %v10030_v34, %v10029_v32  ;;  %v10053_v6 = vadd.f32 %v10052_v52, %v10051_v15 }
 0x66a   : > { %v10032_v9 = vpop.f32.mrf.mxu0  ;;  %v10054_v1 = vpop.f32.mrf.mxu1 }
 0x66b   : > { %v8692_v44 = vadd.f32 %v10053_v6, %v10031_v56 }
 0x66c   : > { %v10033_v35 = vpop.f32.mrf.mxu0  ;;  %v10055_v7 = vpop.f32.mrf.mxu1 }
 0x686   : > { %v10073_v10 = vpop.f32.mrf.mxu0  ;;  %v10095_v48 = vpop.f32.mrf.mxu1 }
 0x688   : > { %v10074_v14 = vpop.f32.mrf.mxu0  ;;  %v10096_v13 = vpop.f32.mrf.mxu1 }
 0x689   : > { %v10075_v41 = vadd.f32 %v10074_v14, %v10073_v10  ;;  %v10097_v33 = vadd.f32 %v10096_v13, %v10095_v48 }
 0x68a   : > { %v10076_v28 = vpop.f32.mrf.mxu0  ;;  %v10098_v42 = vpop.f32.mrf.mxu1 }
 0x68b   : > { %v8732_v0 = vadd.f32 %v10075_v41, %v8692_v44 }
 0x68c   : > { %v10077_v43 = vpop.f32.mrf.mxu0  ;;  %v10099_v46 = vpop.f32.mrf.mxu1 }
 0x68d   : > { %v8772_v40 = vadd.f32 %v10097_v33, %v8732_v0 }
 0x68f   : > { %8777 = vst [vmem:[%s369_s17] sm:$0xff] %v8772_v40 }
 0x690 PF: > { %p19_p2 = scmp.ge.s32.totalorder %s10498_s22, 4   ;;  %s12113_s18 = smov %s10426_s19 }
 0x691   : > { %s12114_s19 = smov %s10430_s20  ;;  %s12115_s20 = smov %s10508_s25 }
 0x692   : > { %s12116_s21 = smov %s10498_s22  ;;  %21 = sbr.rel (!%p19_p2) target bundleno = 8 (0x8), region = 120 }
 0x697   :  { %8797 = vsyncpa [#allocation3], 1 }
 0x698   :  { %8799 = vsyncpa [#allocation3 + $0x1], 1 }
 0x699   :  { %8800 = vsyncpa [#allocation5], 1 }
 0x69a   :  { %8802 = vsyncpa [#allocation5 + $0x1], 1 }
 0x69b   :  { %8803 = vsyncpa [#allocation8], 1 }
 0x69c   :  { %8805 = vsyncpa [#allocation8 + $0x1], 1 }

</bundles_post_ra>
